<compile_context>
chip_gen: v7x
topology: tpu7x:2x2x1
jax: 0.10.0
libtpu: 0.0.40
codegen_flags: <defaults>
</compile_context>

<pallas_src>
import functools
import math

import jax
import jax.numpy as jnp
from jax.experimental import pallas as pl
from jax.experimental.pallas import tpu as pltpu

# ----------------------------- model config ---------------------------------
BATCH = 2
SEQ = 8            # config.pad_size
HIDDEN = 32        # config.hidden_size
NUM_HEADS = 4
HEAD_DIM = HIDDEN // NUM_HEADS
INTERMEDIATE = 64  # 4 * hidden (BertConfig default ratio, scaled down)
NUM_LAYERS = 2
VOCAB = 100        # synthetic stand-in for len(pickle.load(vocab))
NUM_CLASSES = 3    # config.num_classes
LN_EPS = 1e-5      # layer_norm_eps=1e-05
SLAB_LANES = 128


# ------------------------------ weight packing -------------------------------
class _SlabPacker:
    """Packs many small f32 arrays into one (rows, 128) slab (one DMA)."""

    def __init__(self, lanes=SLAB_LANES):
        self.lanes = lanes
        self.entries = []      # (row_offset, array)
        self.layout = {}       # name -> (row_off, nrows, ncols)  (static ints)
        self.row = 0

    def add(self, name, arr, align=8):
        arr = jnp.asarray(arr, jnp.float32)
        if arr.ndim == 1:
            arr = arr[None, :]
        nrows, ncols = arr.shape
        assert ncols <= self.lanes
        self.row = -(-self.row // align) * align
        self.layout[name] = (self.row, nrows, ncols)
        self.entries.append((self.row, arr))
        self.row += nrows

    def finish(self):
        total = -(-self.row // 8) * 8
        slab = jnp.zeros((total, self.lanes), jnp.float32)
        for off, arr in self.entries:
            slab = slab.at[off:off + arr.shape[0], :arr.shape[1]].set(arr)
        return slab, self.layout


def pack_params(p):
    """Pack every constant of the model into a single (rows, 128) slab."""
    nh = p["num_heads"]
    hdim = p["word_emb"].shape[1]
    dh = hdim // nh

    pk = _SlabPacker()
    pk.add("word_emb", p["word_emb"])                     # (V, H)
    pk.add("pos_emb", p["pos_emb"])                       # (S, H)
    pk.add("type0", p["type_emb"][0])                     # (1, H)
    pk.add("emb_ln_g", p["emb_ln_g"], align=1)
    pk.add("emb_ln_b", p["emb_ln_b"], align=1)
    pk.add("pool_b", p["pool_b"], align=1)
    pk.add("fc_b", p["fc_b"], align=1)
    pk.add("pool_w", p["pool_w"])                         # (H, H)
    pk.add("fc_w", p["fc_w"])                             # (H, C)
    for l, lp in enumerate(p["layers"]):
        # Transposed Q/K/V weights: head h lives in 8-row-aligned rows
        # [h*dh, (h+1)*dh) -> sublane-aligned slices inside the kernel.
        pk.add(f"wqT_{l}", lp["wq"].T)                    # (H, H)
        pk.add(f"wkT_{l}", lp["wk"].T)
        pk.add(f"wvT_{l}", lp["wv"].T)
        pk.add(f"wo_{l}", lp["wo"])                       # (H, H) rows = head-concat dim
        pk.add(f"wi_{l}", lp["wi"])                       # (H, I)
        pk.add(f"wf_{l}", lp["wf"])                       # (I, H)
        # Per-head bias rows -> each head's bias is a (1, dh) load at lane 0.
        pk.add(f"bq_{l}", lp["bq"].reshape(nh, dh))
        pk.add(f"bk_{l}", lp["bk"].reshape(nh, dh), align=1)
        pk.add(f"bv_{l}", lp["bv"].reshape(nh, dh), align=1)
        pk.add(f"bo_{l}", lp["bo"], align=1)
        pk.add(f"ln1_g_{l}", lp["ln1_g"], align=1)
        pk.add(f"ln1_b_{l}", lp["ln1_b"], align=1)
        pk.add(f"bi_{l}", lp["bi"], align=1)
        pk.add(f"bf_{l}", lp["bf"], align=1)
        pk.add(f"ln2_g_{l}", lp["ln2_g"], align=1)
        pk.add(f"ln2_b_{l}", lp["ln2_b"], align=1)
    return pk.finish()


# ------------------------------ fused Pallas kernel --------------------------
def _fused_ernie_kernel(ids_ref, mask_ref, w_ref, out_ref, *,
                        layout, num_layers, batch, seq, hidden, num_heads,
                        vocab, eps):
    """one-hot embed -> LN -> L x (attn + FFN) -> pooler -> classifier."""
    head_dim = hidden // num_heads
    scale = 1.0 / math.sqrt(head_dim)

    def slab(name, row0=0, nrows=None):
        off, nr, nc = layout[name]
        if nrows is None:
            nrows = nr
        r = off + row0
        return w_ref[r:r + nrows, 0:nc]                    # static slice -> load

    def layer_norm(x, gname, bname):
        mu = jnp.mean(x, axis=-1, keepdims=True)
        d = x - mu
        var = jnp.mean(d * d, axis=-1, keepdims=True)      # biased, as torch
        return d * jax.lax.rsqrt(var + eps) * slab(gname) + slab(bname)

    # ---------------- embeddings (gather done in-kernel as one-hot matmul) ---
    ids = ids_ref[...]                                     # (B*S, 1) int32
    iota = jax.lax.broadcasted_iota(jnp.int32, (batch * seq, vocab), 1)
    onehot = (iota == ids).astype(jnp.float32)             # (B*S, V)
    we = jnp.dot(onehot, slab("word_emb"),
                 preferred_element_type=jnp.float32)       # (B*S, H)
    pe = jnp.concatenate([slab("pos_emb")] * batch, axis=0)  # (B*S, H)
    h = layer_norm(we + pe + slab("type0"), "emb_ln_g", "emb_ln_b")

    mask_i = mask_ref[...]                                 # (B, S) int32
    mask_bias = jnp.where(mask_i == 0, jnp.float32(-10000.0), jnp.float32(0.0))

    # ---------------- encoder layers (statically unrolled) -------------------
    for l in range(num_layers):
        attn_rows = []
        for b in range(batch):
            xb = h[b * seq:(b + 1) * seq, :]               # (S, H) sublane slice
            mb = mask_bias[b:b + 1, :]                     # (1, S)
            acc = None
            for hd in range(num_heads):
                r0 = hd * head_dim
                wq_h = slab(f"wqT_{l}", r0, head_dim)      # (dh, H) sublane-aligned
                wk_h = slab(f"wkT_{l}", r0, head_dim)
                wv_h = slab(f"wvT_{l}", r0, head_dim)
                wo_h = slab(f"wo_{l}", r0, head_dim)       # (dh, H)
                q = jax.lax.dot_general(
                    xb, wq_h, (((1,), (1,)), ((), ())),
                    preferred_element_type=jnp.float32) + slab(f"bq_{l}", hd, 1)
                k = jax.lax.dot_general(
                    xb, wk_h, (((1,), (1,)), ((), ())),
                    preferred_element_type=jnp.float32) + slab(f"bk_{l}", hd, 1)
                v = jax.lax.dot_general(
                    xb, wv_h, (((1,), (1,)), ((), ())),
                    preferred_element_type=jnp.float32) + slab(f"bv_{l}", hd, 1)
                s = jax.lax.dot_general(
                    q, k, (((1,), (1,)), ((), ())),
                    preferred_element_type=jnp.float32) * scale + mb    # (S, S)
                s = s - jnp.max(s, axis=-1, keepdims=True)
                e = jnp.exp(s)
                p_attn = e * pl.reciprocal(
                    jnp.sum(e, axis=-1, keepdims=True), approx=True)
                ctx = jnp.dot(p_attn, v,
                              preferred_element_type=jnp.float32)       # (S, dh)
                # fold the output projection per head: no head concatenation
                contrib = jnp.dot(ctx, wo_h,
                                  preferred_element_type=jnp.float32)   # (S, H)
                acc = contrib if acc is None else acc + contrib
            attn_rows.append(acc + slab(f"bo_{l}"))
        attn_out = jnp.concatenate(attn_rows, axis=0)      # (B*S, H) sublane concat
        h = layer_norm(attn_out + h, f"ln1_g_{l}", f"ln1_b_{l}")

        inter = jnp.dot(h, slab(f"wi_{l}"),
                        preferred_element_type=jnp.float32) + slab(f"bi_{l}")
        inter = jnp.maximum(inter, 0.0)                    # hidden_act='relu'
        ff = jnp.dot(inter, slab(f"wf_{l}"),
                     preferred_element_type=jnp.float32) + slab(f"bf_{l}")
        h = layer_norm(ff + h, f"ln2_g_{l}", f"ln2_b_{l}")

    # ---------------- pooler (first token) + classifier ----------------------
    first_tok = jnp.concatenate(
        [h[b * seq:b * seq + 1, :] for b in range(batch)], axis=0)      # (B, H)
    pooled = jnp.tanh(
        jnp.dot(first_tok, slab("pool_w"),
                preferred_element_type=jnp.float32) + slab("pool_b"))
    out_ref[...] = jnp.dot(pooled, slab("fc_w"),
                           preferred_element_type=jnp.float32) + slab("fc_b")


# ------------------------------- forward pass --------------------------------
def ernie_forward(slab, layout, x, *, num_layers=NUM_LAYERS, hidden=HIDDEN,
                  num_heads=NUM_HEADS, vocab=VOCAB, num_classes=NUM_CLASSES):
    """x = (context_ids, seq_len, mask) — mirrors the PyTorch Model.forward."""
    context, _, mask = x
    b, s = context.shape

    ids = context.reshape(b * s, 1).astype(jnp.int32)      # (B*S, 1)
    mask_i = mask.astype(jnp.int32)                        # (B, S)

    kernel = functools.partial(
        _fused_ernie_kernel,
        layout=layout, num_layers=num_layers, batch=b, seq=s, hidden=hidden,
        num_heads=num_heads, vocab=vocab, eps=LN_EPS)

    # Single fused pallas_call, no grid: 3 operands (ids, mask, weight slab),
    # everything resident in VMEM for the whole model.
    return pl.pallas_call(
        kernel,
        out_shape=jax.ShapeDtypeStruct((b, num_classes), jnp.float32),
        compiler_params=pltpu.CompilerParams(vmem_limit_bytes=4 * 1024 * 1024),
    )(ids, mask_i, slab)


# --------------------------- parameter construction --------------------------
def init_params(key):
    def normal(key, shape, std=0.02):
        return (std * jax.random.normal(key, shape)).astype(jnp.float32)

    keys = iter(jax.random.split(key, 128))
    p = {
        "num_heads": NUM_HEADS,
        "word_emb": normal(next(keys), (VOCAB, HIDDEN)),
        "pos_emb": normal(next(keys), (SEQ, HIDDEN)),
        "type_emb": normal(next(keys), (2, HIDDEN)),
        "emb_ln_g": jnp.ones((HIDDEN,), jnp.float32),
        "emb_ln_b": jnp.zeros((HIDDEN,), jnp.float32),
        "layers": [],
        "pool_w": normal(next(keys), (HIDDEN, HIDDEN)),
        "pool_b": jnp.zeros((HIDDEN,), jnp.float32),
        "fc_w": normal(next(keys), (HIDDEN, NUM_CLASSES)),
        "fc_b": jnp.zeros((NUM_CLASSES,), jnp.float32),
    }
    for _ in range(NUM_LAYERS):
        p["layers"].append({
            "wq": normal(next(keys), (HIDDEN, HIDDEN)), "bq": jnp.zeros((HIDDEN,), jnp.float32),
            "wk": normal(next(keys), (HIDDEN, HIDDEN)), "bk": jnp.zeros((HIDDEN,), jnp.float32),
            "wv": normal(next(keys), (HIDDEN, HIDDEN)), "bv": jnp.zeros((HIDDEN,), jnp.float32),
            "wo": normal(next(keys), (HIDDEN, HIDDEN)), "bo": jnp.zeros((HIDDEN,), jnp.float32),
            "ln1_g": jnp.ones((HIDDEN,), jnp.float32), "ln1_b": jnp.zeros((HIDDEN,), jnp.float32),
            "wi": normal(next(keys), (HIDDEN, INTERMEDIATE)), "bi": jnp.zeros((INTERMEDIATE,), jnp.float32),
            "wf": normal(next(keys), (INTERMEDIATE, HIDDEN)), "bf": jnp.zeros((HIDDEN,), jnp.float32),
            "ln2_g": jnp.ones((HIDDEN,), jnp.float32), "ln2_b": jnp.zeros((HIDDEN,), jnp.float32),
        })
    return p


# ------------------------- pure-JAX reference (check) -------------------------
def reference_forward(params, x):
    context, _, mask = x
    b, s = context.shape
    h_dim = params["word_emb"].shape[1]
    n_heads = params["num_heads"]
    dh = h_dim // n_heads

    def ln(t, g, bb):
        mu = jnp.mean(t, -1, keepdims=True)
        var = jnp.mean((t - mu) ** 2, -1, keepdims=True)
        return (t - mu) / jnp.sqrt(var + LN_EPS) * g + bb

    emb = (jnp.take(params["word_emb"], context, axis=0)
           + params["pos_emb"][:s][None] + params["type_emb"][0][None, None])
    hidden = ln(emb, params["emb_ln_g"], params["emb_ln_b"])
    mb = ((1.0 - mask.astype(jnp.float32)) * -10000.0)[:, None, None, :]
    for lp in params["layers"]:
        def heads(t):
            return t.reshape(b, s, n_heads, dh).transpose(0, 2, 1, 3)
        q = heads(hidden @ lp["wq"] + lp["bq"])
        k = heads(hidden @ lp["wk"] + lp["bk"])
        v = heads(hidden @ lp["wv"] + lp["bv"])
        sc = jnp.einsum("bhqd,bhkd->bhqk", q, k) / math.sqrt(dh) + mb
        p = jax.nn.softmax(sc, axis=-1)
        ctx = jnp.einsum("bhqk,bhkd->bhqd", p, v).transpose(0, 2, 1, 3).reshape(b, s, h_dim)
        hidden = ln(ctx @ lp["wo"] + lp["bo"] + hidden, lp["ln1_g"], lp["ln1_b"])
        inter = jax.nn.relu(hidden @ lp["wi"] + lp["bi"])
        hidden = ln(inter @ lp["wf"] + lp["bf"] + hidden, lp["ln2_g"], lp["ln2_b"])
    pooled = jnp.tanh(hidden[:, 0, :] @ params["pool_w"] + params["pool_b"])
    return pooled @ params["fc_w"] + params["fc_b"]


# ---------------------------------- main -------------------------------------
if __name__ == "__main__":
    key = jax.random.PRNGKey(0)
    pkey, ckey = jax.random.split(key)
    params = init_params(pkey)
    slab, layout = pack_params(params)       # done once (one weight DMA per call)

    context = jax.random.randint(ckey, (BATCH, SEQ), 0, VOCAB, dtype=jnp.int32)
    seq_len = jnp.array([SEQ, SEQ - 3], dtype=jnp.int32)
    mask = jnp.array([[1] * SEQ,
                      [1] * (SEQ - 3) + [0] * 3], dtype=jnp.int32)
    x = (context, seq_len, mask)

    logits = ernie_forward(slab, layout, x)
    logits = jax.block_until_ready(logits)

    ref = reference_forward(params, x)
    assert logits.shape == (BATCH, NUM_CLASSES)
    assert bool(jnp.all(jnp.isfinite(logits)))
    assert bool(jnp.allclose(logits, ref, atol=1e-2, rtol=1e-2))
    print("KERNEL_OK")
</pallas_src>

<mosaic_0001>
module attributes {stable_mosaic.version = 11 : i64} {
  func.func @_fused_ernie_kernel(%arg0: memref<16x1xi32, #tpu.memory_space<vmem>>, %arg1: memref<2x8xi32, #tpu.memory_space<vmem>>, %arg2: memref<680x128xf32, #tpu.memory_space<vmem>>, %arg3: memref<2x3xf32, #tpu.memory_space<vmem>>) attributes {dimension_semantics = [], scalar_prefetch = 0 : i64, scratch_operands = 0 : i64, tpu.core_type = #tpu.core_type<tc>} {
    %c0 = arith.constant 0 : index
    %c0_0 = arith.constant 0 : index
    %0 = vector.load %arg0[%c0, %c0_0] : memref<16x1xi32, #tpu.memory_space<vmem>>, vector<16x1xi32>
    %1 = tpu.iota {dimensions = array<i32: 1>} : vector<16x100xi32>
    %2 = vector.broadcast %0 : vector<16x1xi32> to vector<16x100xi32>
    %3 = arith.cmpi eq, %1, %2 : vector<16x100xi32>
    %4 = arith.extui %3 : vector<16x100xi1> to vector<16x100xi32>
    %5 = arith.sitofp %4 : vector<16x100xi32> to vector<16x100xf32>
    %c0_1 = arith.constant 0 : index
    %c0_2 = arith.constant 0 : index
    %6 = vector.load %arg2[%c0_1, %c0_2] : memref<680x128xf32, #tpu.memory_space<vmem>>, vector<100x32xf32>
    %cst = arith.constant dense<0.000000e+00> : vector<16x32xf32>
    %7 = tpu.matmul %5, %6, %cst {dimension_numbers = #tpu.dot_dimension_numbers<[1], [0], [0], [1], [0, 0, 1, 1], [], []>} : vector<16x100xf32>, vector<100x32xf32>, vector<16x32xf32> -> vector<16x32xf32>
    %c104 = arith.constant 104 : index
    %c0_3 = arith.constant 0 : index
    %8 = vector.load %arg2[%c104, %c0_3] : memref<680x128xf32, #tpu.memory_space<vmem>>, vector<8x32xf32>
    %9 = tpu.concatenate %8, %8 in 0 : vector<8x32xf32>, vector<8x32xf32> -> vector<16x32xf32>
    %10 = arith.addf %7, %9 : vector<16x32xf32>
    %c112 = arith.constant 112 : index
    %c0_4 = arith.constant 0 : index
    %11 = vector.load %arg2[%c112, %c0_4] : memref<680x128xf32, #tpu.memory_space<vmem>>, vector<1x32xf32>
    %12 = vector.broadcast %11 : vector<1x32xf32> to vector<16x32xf32>
    %13 = arith.addf %10, %12 : vector<16x32xf32>
    %cst_5 = arith.constant dense<0.000000e+00> : vector<16xf32>
    %14 = vector.multi_reduction <add>, %13, %cst_5 [1] : vector<16x32xf32> to vector<16xf32>
    %15 = vector.shape_cast %14 : vector<16xf32> to vector<16x1xf32>
    %cst_6 = arith.constant 3.200000e+01 : f32
    %16 = vector.broadcast %cst_6 : f32 to vector<16x1xf32>
    %17 = arith.divf %15, %16 : vector<16x1xf32>
    %18 = vector.broadcast %17 : vector<16x1xf32> to vector<16x32xf32>
    %19 = arith.subf %13, %18 : vector<16x32xf32>
    %20 = arith.mulf %19, %19 : vector<16x32xf32>
    %cst_7 = arith.constant dense<0.000000e+00> : vector<16xf32>
    %21 = vector.multi_reduction <add>, %20, %cst_7 [1] : vector<16x32xf32> to vector<16xf32>
    %22 = vector.shape_cast %21 : vector<16xf32> to vector<16x1xf32>
    %cst_8 = arith.constant 3.200000e+01 : f32
    %23 = vector.broadcast %cst_8 : f32 to vector<16x1xf32>
    %24 = arith.divf %22, %23 : vector<16x1xf32>
    %cst_9 = arith.constant 9.99999974E-6 : f32
    %25 = vector.broadcast %cst_9 : f32 to vector<16x1xf32>
    %26 = arith.addf %24, %25 : vector<16x1xf32>
    %27 = math.rsqrt %26 : vector<16x1xf32>
    %28 = vector.broadcast %27 : vector<16x1xf32> to vector<16x32xf32>
    %29 = arith.mulf %19, %28 : vector<16x32xf32>
    %c113 = arith.constant 113 : index
    %c0_10 = arith.constant 0 : index
    %30 = vector.load %arg2[%c113, %c0_10] : memref<680x128xf32, #tpu.memory_space<vmem>>, vector<1x32xf32>
    %31 = vector.broadcast %30 : vector<1x32xf32> to vector<16x32xf32>
    %32 = arith.mulf %29, %31 : vector<16x32xf32>
    %c114 = arith.constant 114 : index
    %c0_11 = arith.constant 0 : index
    %33 = vector.load %arg2[%c114, %c0_11] : memref<680x128xf32, #tpu.memory_space<vmem>>, vector<1x32xf32>
    %34 = vector.broadcast %33 : vector<1x32xf32> to vector<16x32xf32>
    %35 = arith.addf %32, %34 : vector<16x32xf32>
    %c0_12 = arith.constant 0 : index
    %c0_13 = arith.constant 0 : index
    %36 = vector.load %arg1[%c0_12, %c0_13] : memref<2x8xi32, #tpu.memory_space<vmem>>, vector<2x8xi32>
    %c0_i32 = arith.constant 0 : i32
    %37 = vector.broadcast %c0_i32 : i32 to vector<2x8xi32>
    %38 = arith.cmpi eq, %36, %37 : vector<2x8xi32>
    %cst_14 = arith.constant -1.000000e+04 : f32
    %cst_15 = arith.constant 0.000000e+00 : f32
    %39 = vector.broadcast %cst_14 : f32 to vector<2x8xf32>
    %40 = vector.broadcast %cst_15 : f32 to vector<2x8xf32>
    %41 = arith.select %38, %39, %40 : vector<2x8xi1>, vector<2x8xf32>
    %42 = vector.extract_strided_slice %35 {offsets = [0, 0], sizes = [8, 32], strides = [1, 1]} : vector<16x32xf32> to vector<8x32xf32>
    %43 = vector.extract_strided_slice %41 {offsets = [0, 0], sizes = [1, 8], strides = [1, 1]} : vector<2x8xf32> to vector<1x8xf32>
    %c184 = arith.constant 184 : index
    %c0_16 = arith.constant 0 : index
    %44 = vector.load %arg2[%c184, %c0_16] : memref<680x128xf32, #tpu.memory_space<vmem>>, vector<8x32xf32>
    %c216 = arith.constant 216 : index
    %c0_17 = arith.constant 0 : index
    %45 = vector.load %arg2[%c216, %c0_17] : memref<680x128xf32, #tpu.memory_space<vmem>>, vector<8x32xf32>
    %c248 = arith.constant 248 : index
    %c0_18 = arith.constant 0 : index
    %46 = vector.load %arg2[%c248, %c0_18] : memref<680x128xf32, #tpu.memory_space<vmem>>, vector<8x32xf32>
    %c280 = arith.constant 280 : index
    %c0_19 = arith.constant 0 : index
    %47 = vector.load %arg2[%c280, %c0_19] : memref<680x128xf32, #tpu.memory_space<vmem>>, vector<8x32xf32>
    %cst_20 = arith.constant dense<0.000000e+00> : vector<8x8xf32>
    %48 = tpu.matmul %42, %44, %cst_20 {dimension_numbers = #tpu.dot_dimension_numbers<[1], [1], [0], [0], [0, 0, 1, 0], [], []>} : vector<8x32xf32>, vector<8x32xf32>, vector<8x8xf32> -> vector<8x8xf32>
    %c408 = arith.constant 408 : index
    %c0_21 = arith.constant 0 : index
    %49 = vector.load %arg2[%c408, %c0_21] : memref<680x128xf32, #tpu.memory_space<vmem>>, vector<1x8xf32>
    %50 = vector.broadcast %49 : vector<1x8xf32> to vector<8x8xf32>
    %51 = arith.addf %48, %50 : vector<8x8xf32>
    %cst_22 = arith.constant dense<0.000000e+00> : vector<8x8xf32>
    %52 = tpu.matmul %42, %45, %cst_22 {dimension_numbers = #tpu.dot_dimension_numbers<[1], [1], [0], [0], [0, 0, 1, 0], [], []>} : vector<8x32xf32>, vector<8x32xf32>, vector<8x8xf32> -> vector<8x8xf32>
    %c412 = arith.constant 412 : index
    %c0_23 = arith.constant 0 : index
    %53 = vector.load %arg2[%c412, %c0_23] : memref<680x128xf32, #tpu.memory_space<vmem>>, vector<1x8xf32>
    %54 = vector.broadcast %53 : vector<1x8xf32> to vector<8x8xf32>
    %55 = arith.addf %52, %54 : vector<8x8xf32>
    %cst_24 = arith.constant dense<0.000000e+00> : vector<8x8xf32>
    %56 = tpu.matmul %42, %46, %cst_24 {dimension_numbers = #tpu.dot_dimension_numbers<[1], [1], [0], [0], [0, 0, 1, 0], [], []>} : vector<8x32xf32>, vector<8x32xf32>, vector<8x8xf32> -> vector<8x8xf32>
    %c416 = arith.constant 416 : index
    %c0_25 = arith.constant 0 : index
    %57 = vector.load %arg2[%c416, %c0_25] : memref<680x128xf32, #tpu.memory_space<vmem>>, vector<1x8xf32>
    %58 = vector.broadcast %57 : vector<1x8xf32> to vector<8x8xf32>
    %59 = arith.addf %56, %58 : vector<8x8xf32>
    %cst_26 = arith.constant dense<0.000000e+00> : vector<8x8xf32>
    %60 = tpu.matmul %51, %55, %cst_26 {dimension_numbers = #tpu.dot_dimension_numbers<[1], [1], [0], [0], [0, 0, 1, 0], [], []>} : vector<8x8xf32>, vector<8x8xf32>, vector<8x8xf32> -> vector<8x8xf32>
    %cst_27 = arith.constant 0.353553385 : f32
    %61 = vector.broadcast %cst_27 : f32 to vector<8x8xf32>
    %62 = arith.mulf %60, %61 : vector<8x8xf32>
    %63 = vector.broadcast %43 : vector<1x8xf32> to vector<8x8xf32>
    %64 = arith.addf %62, %63 : vector<8x8xf32>
    %cst_28 = arith.constant dense<0xFF800000> : vector<8xf32>
    %65 = vector.multi_reduction <maximumf>, %64, %cst_28 [1] : vector<8x8xf32> to vector<8xf32>
    %66 = vector.shape_cast %65 : vector<8xf32> to vector<8x1xf32>
    %67 = vector.broadcast %66 : vector<8x1xf32> to vector<8x8xf32>
    %68 = arith.subf %64, %67 : vector<8x8xf32>
    %69 = math.exp %68 : vector<8x8xf32>
    %cst_29 = arith.constant dense<0.000000e+00> : vector<8xf32>
    %70 = vector.multi_reduction <add>, %69, %cst_29 [1] : vector<8x8xf32> to vector<8xf32>
    %71 = vector.shape_cast %70 : vector<8xf32> to vector<8x1xf32>
    %72 = tpu.reciprocal %71 {approx = true} : vector<8x1xf32> -> vector<8x1xf32>
    %73 = vector.broadcast %72 : vector<8x1xf32> to vector<8x8xf32>
    %74 = arith.mulf %69, %73 : vector<8x8xf32>
    %cst_30 = arith.constant dense<0.000000e+00> : vector<8x8xf32>
    %75 = tpu.matmul %74, %59, %cst_30 {dimension_numbers = #tpu.dot_dimension_numbers<[1], [0], [0], [1], [0, 0, 1, 1], [], []>} : vector<8x8xf32>, vector<8x8xf32>, vector<8x8xf32> -> vector<8x8xf32>
    %cst_31 = arith.constant dense<0.000000e+00> : vector<8x32xf32>
    %76 = tpu.matmul %75, %47, %cst_31 {dimension_numbers = #tpu.dot_dimension_numbers<[1], [0], [0], [1], [0, 0, 1, 1], [], []>} : vector<8x8xf32>, vector<8x32xf32>, vector<8x32xf32> -> vector<8x32xf32>
    %c192 = arith.constant 192 : index
    %c0_32 = arith.constant 0 : index
    %77 = vector.load %arg2[%c192, %c0_32] : memref<680x128xf32, #tpu.memory_space<vmem>>, vector<8x32xf32>
    %c224 = arith.constant 224 : index
    %c0_33 = arith.constant 0 : index
    %78 = vector.load %arg2[%c224, %c0_33] : memref<680x128xf32, #tpu.memory_space<vmem>>, vector<8x32xf32>
    %c256 = arith.constant 256 : index
    %c0_34 = arith.constant 0 : index
    %79 = vector.load %arg2[%c256, %c0_34] : memref<680x128xf32, #tpu.memory_space<vmem>>, vector<8x32xf32>
    %c288 = arith.constant 288 : index
    %c0_35 = arith.constant 0 : index
    %80 = vector.load %arg2[%c288, %c0_35] : memref<680x128xf32, #tpu.memory_space<vmem>>, vector<8x32xf32>
    %cst_36 = arith.constant dense<0.000000e+00> : vector<8x8xf32>
    %81 = tpu.matmul %42, %77, %cst_36 {dimension_numbers = #tpu.dot_dimension_numbers<[1], [1], [0], [0], [0, 0, 1, 0], [], []>} : vector<8x32xf32>, vector<8x32xf32>, vector<8x8xf32> -> vector<8x8xf32>
    %c409 = arith.constant 409 : index
    %c0_37 = arith.constant 0 : index
    %82 = vector.load %arg2[%c409, %c0_37] : memref<680x128xf32, #tpu.memory_space<vmem>>, vector<1x8xf32>
    %83 = vector.broadcast %82 : vector<1x8xf32> to vector<8x8xf32>
    %84 = arith.addf %81, %83 : vector<8x8xf32>
    %cst_38 = arith.constant dense<0.000000e+00> : vector<8x8xf32>
    %85 = tpu.matmul %42, %78, %cst_38 {dimension_numbers = #tpu.dot_dimension_numbers<[1], [1], [0], [0], [0, 0, 1, 0], [], []>} : vector<8x32xf32>, vector<8x32xf32>, vector<8x8xf32> -> vector<8x8xf32>
    %c413 = arith.constant 413 : index
    %c0_39 = arith.constant 0 : index
    %86 = vector.load %arg2[%c413, %c0_39] : memref<680x128xf32, #tpu.memory_space<vmem>>, vector<1x8xf32>
    %87 = vector.broadcast %86 : vector<1x8xf32> to vector<8x8xf32>
    %88 = arith.addf %85, %87 : vector<8x8xf32>
    %cst_40 = arith.constant dense<0.000000e+00> : vector<8x8xf32>
    %89 = tpu.matmul %42, %79, %cst_40 {dimension_numbers = #tpu.dot_dimension_numbers<[1], [1], [0], [0], [0, 0, 1, 0], [], []>} : vector<8x32xf32>, vector<8x32xf32>, vector<8x8xf32> -> vector<8x8xf32>
    %c417 = arith.constant 417 : index
    %c0_41 = arith.constant 0 : index
    %90 = vector.load %arg2[%c417, %c0_41] : memref<680x128xf32, #tpu.memory_space<vmem>>, vector<1x8xf32>
    %91 = vector.broadcast %90 : vector<1x8xf32> to vector<8x8xf32>
    %92 = arith.addf %89, %91 : vector<8x8xf32>
    %cst_42 = arith.constant dense<0.000000e+00> : vector<8x8xf32>
    %93 = tpu.matmul %84, %88, %cst_42 {dimension_numbers = #tpu.dot_dimension_numbers<[1], [1], [0], [0], [0, 0, 1, 0], [], []>} : vector<8x8xf32>, vector<8x8xf32>, vector<8x8xf32> -> vector<8x8xf32>
    %cst_43 = arith.constant 0.353553385 : f32
    %94 = vector.broadcast %cst_43 : f32 to vector<8x8xf32>
    %95 = arith.mulf %93, %94 : vector<8x8xf32>
    %96 = vector.broadcast %43 : vector<1x8xf32> to vector<8x8xf32>
    %97 = arith.addf %95, %96 : vector<8x8xf32>
    %cst_44 = arith.constant dense<0xFF800000> : vector<8xf32>
    %98 = vector.multi_reduction <maximumf>, %97, %cst_44 [1] : vector<8x8xf32> to vector<8xf32>
    %99 = vector.shape_cast %98 : vector<8xf32> to vector<8x1xf32>
    %100 = vector.broadcast %99 : vector<8x1xf32> to vector<8x8xf32>
    %101 = arith.subf %97, %100 : vector<8x8xf32>
    %102 = math.exp %101 : vector<8x8xf32>
    %cst_45 = arith.constant dense<0.000000e+00> : vector<8xf32>
    %103 = vector.multi_reduction <add>, %102, %cst_45 [1] : vector<8x8xf32> to vector<8xf32>
    %104 = vector.shape_cast %103 : vector<8xf32> to vector<8x1xf32>
    %105 = tpu.reciprocal %104 {approx = true} : vector<8x1xf32> -> vector<8x1xf32>
    %106 = vector.broadcast %105 : vector<8x1xf32> to vector<8x8xf32>
    %107 = arith.mulf %102, %106 : vector<8x8xf32>
    %cst_46 = arith.constant dense<0.000000e+00> : vector<8x8xf32>
    %108 = tpu.matmul %107, %92, %cst_46 {dimension_numbers = #tpu.dot_dimension_numbers<[1], [0], [0], [1], [0, 0, 1, 1], [], []>} : vector<8x8xf32>, vector<8x8xf32>, vector<8x8xf32> -> vector<8x8xf32>
    %cst_47 = arith.constant dense<0.000000e+00> : vector<8x32xf32>
    %109 = tpu.matmul %108, %80, %cst_47 {dimension_numbers = #tpu.dot_dimension_numbers<[1], [0], [0], [1], [0, 0, 1, 1], [], []>} : vector<8x8xf32>, vector<8x32xf32>, vector<8x32xf32> -> vector<8x32xf32>
    %110 = arith.addf %76, %109 : vector<8x32xf32>
    %c200 = arith.constant 200 : index
    %c0_48 = arith.constant 0 : index
    %111 = vector.load %arg2[%c200, %c0_48] : memref<680x128xf32, #tpu.memory_space<vmem>>, vector<8x32xf32>
    %c232 = arith.constant 232 : index
    %c0_49 = arith.constant 0 : index
    %112 = vector.load %arg2[%c232, %c0_49] : memref<680x128xf32, #tpu.memory_space<vmem>>, vector<8x32xf32>
    %c264 = arith.constant 264 : index
    %c0_50 = arith.constant 0 : index
    %113 = vector.load %arg2[%c264, %c0_50] : memref<680x128xf32, #tpu.memory_space<vmem>>, vector<8x32xf32>
    %c296 = arith.constant 296 : index
    %c0_51 = arith.constant 0 : index
    %114 = vector.load %arg2[%c296, %c0_51] : memref<680x128xf32, #tpu.memory_space<vmem>>, vector<8x32xf32>
    %cst_52 = arith.constant dense<0.000000e+00> : vector<8x8xf32>
    %115 = tpu.matmul %42, %111, %cst_52 {dimension_numbers = #tpu.dot_dimension_numbers<[1], [1], [0], [0], [0, 0, 1, 0], [], []>} : vector<8x32xf32>, vector<8x32xf32>, vector<8x8xf32> -> vector<8x8xf32>
    %c410 = arith.constant 410 : index
    %c0_53 = arith.constant 0 : index
    %116 = vector.load %arg2[%c410, %c0_53] : memref<680x128xf32, #tpu.memory_space<vmem>>, vector<1x8xf32>
    %117 = vector.broadcast %116 : vector<1x8xf32> to vector<8x8xf32>
    %118 = arith.addf %115, %117 : vector<8x8xf32>
    %cst_54 = arith.constant dense<0.000000e+00> : vector<8x8xf32>
    %119 = tpu.matmul %42, %112, %cst_54 {dimension_numbers = #tpu.dot_dimension_numbers<[1], [1], [0], [0], [0, 0, 1, 0], [], []>} : vector<8x32xf32>, vector<8x32xf32>, vector<8x8xf32> -> vector<8x8xf32>
    %c414 = arith.constant 414 : index
    %c0_55 = arith.constant 0 : index
    %120 = vector.load %arg2[%c414, %c0_55] : memref<680x128xf32, #tpu.memory_space<vmem>>, vector<1x8xf32>
    %121 = vector.broadcast %120 : vector<1x8xf32> to vector<8x8xf32>
    %122 = arith.addf %119, %121 : vector<8x8xf32>
    %cst_56 = arith.constant dense<0.000000e+00> : vector<8x8xf32>
    %123 = tpu.matmul %42, %113, %cst_56 {dimension_numbers = #tpu.dot_dimension_numbers<[1], [1], [0], [0], [0, 0, 1, 0], [], []>} : vector<8x32xf32>, vector<8x32xf32>, vector<8x8xf32> -> vector<8x8xf32>
    %c418 = arith.constant 418 : index
    %c0_57 = arith.constant 0 : index
    %124 = vector.load %arg2[%c418, %c0_57] : memref<680x128xf32, #tpu.memory_space<vmem>>, vector<1x8xf32>
    %125 = vector.broadcast %124 : vector<1x8xf32> to vector<8x8xf32>
    %126 = arith.addf %123, %125 : vector<8x8xf32>
    %cst_58 = arith.constant dense<0.000000e+00> : vector<8x8xf32>
    %127 = tpu.matmul %118, %122, %cst_58 {dimension_numbers = #tpu.dot_dimension_numbers<[1], [1], [0], [0], [0, 0, 1, 0], [], []>} : vector<8x8xf32>, vector<8x8xf32>, vector<8x8xf32> -> vector<8x8xf32>
    %cst_59 = arith.constant 0.353553385 : f32
    %128 = vector.broadcast %cst_59 : f32 to vector<8x8xf32>
    %129 = arith.mulf %127, %128 : vector<8x8xf32>
    %130 = vector.broadcast %43 : vector<1x8xf32> to vector<8x8xf32>
    %131 = arith.addf %129, %130 : vector<8x8xf32>
    %cst_60 = arith.constant dense<0xFF800000> : vector<8xf32>
    %132 = vector.multi_reduction <maximumf>, %131, %cst_60 [1] : vector<8x8xf32> to vector<8xf32>
    %133 = vector.shape_cast %132 : vector<8xf32> to vector<8x1xf32>
    %134 = vector.broadcast %133 : vector<8x1xf32> to vector<8x8xf32>
    %135 = arith.subf %131, %134 : vector<8x8xf32>
    %136 = math.exp %135 : vector<8x8xf32>
    %cst_61 = arith.constant dense<0.000000e+00> : vector<8xf32>
    %137 = vector.multi_reduction <add>, %136, %cst_61 [1] : vector<8x8xf32> to vector<8xf32>
    %138 = vector.shape_cast %137 : vector<8xf32> to vector<8x1xf32>
    %139 = tpu.reciprocal %138 {approx = true} : vector<8x1xf32> -> vector<8x1xf32>
    %140 = vector.broadcast %139 : vector<8x1xf32> to vector<8x8xf32>
    %141 = arith.mulf %136, %140 : vector<8x8xf32>
    %cst_62 = arith.constant dense<0.000000e+00> : vector<8x8xf32>
    %142 = tpu.matmul %141, %126, %cst_62 {dimension_numbers = #tpu.dot_dimension_numbers<[1], [0], [0], [1], [0, 0, 1, 1], [], []>} : vector<8x8xf32>, vector<8x8xf32>, vector<8x8xf32> -> vector<8x8xf32>
    %cst_63 = arith.constant dense<0.000000e+00> : vector<8x32xf32>
    %143 = tpu.matmul %142, %114, %cst_63 {dimension_numbers = #tpu.dot_dimension_numbers<[1], [0], [0], [1], [0, 0, 1, 1], [], []>} : vector<8x8xf32>, vector<8x32xf32>, vector<8x32xf32> -> vector<8x32xf32>
    %144 = arith.addf %110, %143 : vector<8x32xf32>
    %c208 = arith.constant 208 : index
    %c0_64 = arith.constant 0 : index
    %145 = vector.load %arg2[%c208, %c0_64] : memref<680x128xf32, #tpu.memory_space<vmem>>, vector<8x32xf32>
    %c240 = arith.constant 240 : index
    %c0_65 = arith.constant 0 : index
    %146 = vector.load %arg2[%c240, %c0_65] : memref<680x128xf32, #tpu.memory_space<vmem>>, vector<8x32xf32>
    %c272 = arith.constant 272 : index
    %c0_66 = arith.constant 0 : index
    %147 = vector.load %arg2[%c272, %c0_66] : memref<680x128xf32, #tpu.memory_space<vmem>>, vector<8x32xf32>
    %c304 = arith.constant 304 : index
    %c0_67 = arith.constant 0 : index
    %148 = vector.load %arg2[%c304, %c0_67] : memref<680x128xf32, #tpu.memory_space<vmem>>, vector<8x32xf32>
    %cst_68 = arith.constant dense<0.000000e+00> : vector<8x8xf32>
    %149 = tpu.matmul %42, %145, %cst_68 {dimension_numbers = #tpu.dot_dimension_numbers<[1], [1], [0], [0], [0, 0, 1, 0], [], []>} : vector<8x32xf32>, vector<8x32xf32>, vector<8x8xf32> -> vector<8x8xf32>
    %c411 = arith.constant 411 : index
    %c0_69 = arith.constant 0 : index
    %150 = vector.load %arg2[%c411, %c0_69] : memref<680x128xf32, #tpu.memory_space<vmem>>, vector<1x8xf32>
    %151 = vector.broadcast %150 : vector<1x8xf32> to vector<8x8xf32>
    %152 = arith.addf %149, %151 : vector<8x8xf32>
    %cst_70 = arith.constant dense<0.000000e+00> : vector<8x8xf32>
    %153 = tpu.matmul %42, %146, %cst_70 {dimension_numbers = #tpu.dot_dimension_numbers<[1], [1], [0], [0], [0, 0, 1, 0], [], []>} : vector<8x32xf32>, vector<8x32xf32>, vector<8x8xf32> -> vector<8x8xf32>
    %c415 = arith.constant 415 : index
    %c0_71 = arith.constant 0 : index
    %154 = vector.load %arg2[%c415, %c0_71] : memref<680x128xf32, #tpu.memory_space<vmem>>, vector<1x8xf32>
    %155 = vector.broadcast %154 : vector<1x8xf32> to vector<8x8xf32>
    %156 = arith.addf %153, %155 : vector<8x8xf32>
    %cst_72 = arith.constant dense<0.000000e+00> : vector<8x8xf32>
    %157 = tpu.matmul %42, %147, %cst_72 {dimension_numbers = #tpu.dot_dimension_numbers<[1], [1], [0], [0], [0, 0, 1, 0], [], []>} : vector<8x32xf32>, vector<8x32xf32>, vector<8x8xf32> -> vector<8x8xf32>
    %c419 = arith.constant 419 : index
    %c0_73 = arith.constant 0 : index
    %158 = vector.load %arg2[%c419, %c0_73] : memref<680x128xf32, #tpu.memory_space<vmem>>, vector<1x8xf32>
    %159 = vector.broadcast %158 : vector<1x8xf32> to vector<8x8xf32>
    %160 = arith.addf %157, %159 : vector<8x8xf32>
    %cst_74 = arith.constant dense<0.000000e+00> : vector<8x8xf32>
    %161 = tpu.matmul %152, %156, %cst_74 {dimension_numbers = #tpu.dot_dimension_numbers<[1], [1], [0], [0], [0, 0, 1, 0], [], []>} : vector<8x8xf32>, vector<8x8xf32>, vector<8x8xf32> -> vector<8x8xf32>
    %cst_75 = arith.constant 0.353553385 : f32
    %162 = vector.broadcast %cst_75 : f32 to vector<8x8xf32>
    %163 = arith.mulf %161, %162 : vector<8x8xf32>
    %164 = vector.broadcast %43 : vector<1x8xf32> to vector<8x8xf32>
    %165 = arith.addf %163, %164 : vector<8x8xf32>
    %cst_76 = arith.constant dense<0xFF800000> : vector<8xf32>
    %166 = vector.multi_reduction <maximumf>, %165, %cst_76 [1] : vector<8x8xf32> to vector<8xf32>
    %167 = vector.shape_cast %166 : vector<8xf32> to vector<8x1xf32>
    %168 = vector.broadcast %167 : vector<8x1xf32> to vector<8x8xf32>
    %169 = arith.subf %165, %168 : vector<8x8xf32>
    %170 = math.exp %169 : vector<8x8xf32>
    %cst_77 = arith.constant dense<0.000000e+00> : vector<8xf32>
    %171 = vector.multi_reduction <add>, %170, %cst_77 [1] : vector<8x8xf32> to vector<8xf32>
    %172 = vector.shape_cast %171 : vector<8xf32> to vector<8x1xf32>
    %173 = tpu.reciprocal %172 {approx = true} : vector<8x1xf32> -> vector<8x1xf32>
    %174 = vector.broadcast %173 : vector<8x1xf32> to vector<8x8xf32>
    %175 = arith.mulf %170, %174 : vector<8x8xf32>
    %cst_78 = arith.constant dense<0.000000e+00> : vector<8x8xf32>
    %176 = tpu.matmul %175, %160, %cst_78 {dimension_numbers = #tpu.dot_dimension_numbers<[1], [0], [0], [1], [0, 0, 1, 1], [], []>} : vector<8x8xf32>, vector<8x8xf32>, vector<8x8xf32> -> vector<8x8xf32>
    %cst_79 = arith.constant dense<0.000000e+00> : vector<8x32xf32>
    %177 = tpu.matmul %176, %148, %cst_79 {dimension_numbers = #tpu.dot_dimension_numbers<[1], [0], [0], [1], [0, 0, 1, 1], [], []>} : vector<8x8xf32>, vector<8x32xf32>, vector<8x32xf32> -> vector<8x32xf32>
    %178 = arith.addf %144, %177 : vector<8x32xf32>
    %c420 = arith.constant 420 : index
    %c0_80 = arith.constant 0 : index
    %179 = vector.load %arg2[%c420, %c0_80] : memref<680x128xf32, #tpu.memory_space<vmem>>, vector<1x32xf32>
    %180 = vector.broadcast %179 : vector<1x32xf32> to vector<8x32xf32>
    %181 = arith.addf %178, %180 : vector<8x32xf32>
    %182 = vector.extract_strided_slice %35 {offsets = [8, 0], sizes = [8, 32], strides = [1, 1]} : vector<16x32xf32> to vector<8x32xf32>
    %183 = vector.extract_strided_slice %41 {offsets = [1, 0], sizes = [1, 8], strides = [1, 1]} : vector<2x8xf32> to vector<1x8xf32>
    %c184_81 = arith.constant 184 : index
    %c0_82 = arith.constant 0 : index
    %184 = vector.load %arg2[%c184_81, %c0_82] : memref<680x128xf32, #tpu.memory_space<vmem>>, vector<8x32xf32>
    %c216_83 = arith.constant 216 : index
    %c0_84 = arith.constant 0 : index
    %185 = vector.load %arg2[%c216_83, %c0_84] : memref<680x128xf32, #tpu.memory_space<vmem>>, vector<8x32xf32>
    %c248_85 = arith.constant 248 : index
    %c0_86 = arith.constant 0 : index
    %186 = vector.load %arg2[%c248_85, %c0_86] : memref<680x128xf32, #tpu.memory_space<vmem>>, vector<8x32xf32>
    %c280_87 = arith.constant 280 : index
    %c0_88 = arith.constant 0 : index
    %187 = vector.load %arg2[%c280_87, %c0_88] : memref<680x128xf32, #tpu.memory_space<vmem>>, vector<8x32xf32>
    %cst_89 = arith.constant dense<0.000000e+00> : vector<8x8xf32>
    %188 = tpu.matmul %182, %184, %cst_89 {dimension_numbers = #tpu.dot_dimension_numbers<[1], [1], [0], [0], [0, 0, 1, 0], [], []>} : vector<8x32xf32>, vector<8x32xf32>, vector<8x8xf32> -> vector<8x8xf32>
    %c408_90 = arith.constant 408 : index
    %c0_91 = arith.constant 0 : index
    %189 = vector.load %arg2[%c408_90, %c0_91] : memref<680x128xf32, #tpu.memory_space<vmem>>, vector<1x8xf32>
    %190 = vector.broadcast %189 : vector<1x8xf32> to vector<8x8xf32>
    %191 = arith.addf %188, %190 : vector<8x8xf32>
    %cst_92 = arith.constant dense<0.000000e+00> : vector<8x8xf32>
    %192 = tpu.matmul %182, %185, %cst_92 {dimension_numbers = #tpu.dot_dimension_numbers<[1], [1], [0], [0], [0, 0, 1, 0], [], []>} : vector<8x32xf32>, vector<8x32xf32>, vector<8x8xf32> -> vector<8x8xf32>
    %c412_93 = arith.constant 412 : index
    %c0_94 = arith.constant 0 : index
    %193 = vector.load %arg2[%c412_93, %c0_94] : memref<680x128xf32, #tpu.memory_space<vmem>>, vector<1x8xf32>
    %194 = vector.broadcast %193 : vector<1x8xf32> to vector<8x8xf32>
    %195 = arith.addf %192, %194 : vector<8x8xf32>
    %cst_95 = arith.constant dense<0.000000e+00> : vector<8x8xf32>
    %196 = tpu.matmul %182, %186, %cst_95 {dimension_numbers = #tpu.dot_dimension_numbers<[1], [1], [0], [0], [0, 0, 1, 0], [], []>} : vector<8x32xf32>, vector<8x32xf32>, vector<8x8xf32> -> vector<8x8xf32>
    %c416_96 = arith.constant 416 : index
    %c0_97 = arith.constant 0 : index
    %197 = vector.load %arg2[%c416_96, %c0_97] : memref<680x128xf32, #tpu.memory_space<vmem>>, vector<1x8xf32>
    %198 = vector.broadcast %197 : vector<1x8xf32> to vector<8x8xf32>
    %199 = arith.addf %196, %198 : vector<8x8xf32>
    %cst_98 = arith.constant dense<0.000000e+00> : vector<8x8xf32>
    %200 = tpu.matmul %191, %195, %cst_98 {dimension_numbers = #tpu.dot_dimension_numbers<[1], [1], [0], [0], [0, 0, 1, 0], [], []>} : vector<8x8xf32>, vector<8x8xf32>, vector<8x8xf32> -> vector<8x8xf32>
    %cst_99 = arith.constant 0.353553385 : f32
    %201 = vector.broadcast %cst_99 : f32 to vector<8x8xf32>
    %202 = arith.mulf %200, %201 : vector<8x8xf32>
    %203 = vector.broadcast %183 : vector<1x8xf32> to vector<8x8xf32>
    %204 = arith.addf %202, %203 : vector<8x8xf32>
    %cst_100 = arith.constant dense<0xFF800000> : vector<8xf32>
    %205 = vector.multi_reduction <maximumf>, %204, %cst_100 [1] : vector<8x8xf32> to vector<8xf32>
    %206 = vector.shape_cast %205 : vector<8xf32> to vector<8x1xf32>
    %207 = vector.broadcast %206 : vector<8x1xf32> to vector<8x8xf32>
    %208 = arith.subf %204, %207 : vector<8x8xf32>
    %209 = math.exp %208 : vector<8x8xf32>
    %cst_101 = arith.constant dense<0.000000e+00> : vector<8xf32>
    %210 = vector.multi_reduction <add>, %209, %cst_101 [1] : vector<8x8xf32> to vector<8xf32>
    %211 = vector.shape_cast %210 : vector<8xf32> to vector<8x1xf32>
    %212 = tpu.reciprocal %211 {approx = true} : vector<8x1xf32> -> vector<8x1xf32>
    %213 = vector.broadcast %212 : vector<8x1xf32> to vector<8x8xf32>
    %214 = arith.mulf %209, %213 : vector<8x8xf32>
    %cst_102 = arith.constant dense<0.000000e+00> : vector<8x8xf32>
    %215 = tpu.matmul %214, %199, %cst_102 {dimension_numbers = #tpu.dot_dimension_numbers<[1], [0], [0], [1], [0, 0, 1, 1], [], []>} : vector<8x8xf32>, vector<8x8xf32>, vector<8x8xf32> -> vector<8x8xf32>
    %cst_103 = arith.constant dense<0.000000e+00> : vector<8x32xf32>
    %216 = tpu.matmul %215, %187, %cst_103 {dimension_numbers = #tpu.dot_dimension_numbers<[1], [0], [0], [1], [0, 0, 1, 1], [], []>} : vector<8x8xf32>, vector<8x32xf32>, vector<8x32xf32> -> vector<8x32xf32>
    %c192_104 = arith.constant 192 : index
    %c0_105 = arith.constant 0 : index
    %217 = vector.load %arg2[%c192_104, %c0_105] : memref<680x128xf32, #tpu.memory_space<vmem>>, vector<8x32xf32>
    %c224_106 = arith.constant 224 : index
    %c0_107 = arith.constant 0 : index
    %218 = vector.load %arg2[%c224_106, %c0_107] : memref<680x128xf32, #tpu.memory_space<vmem>>, vector<8x32xf32>
    %c256_108 = arith.constant 256 : index
    %c0_109 = arith.constant 0 : index
    %219 = vector.load %arg2[%c256_108, %c0_109] : memref<680x128xf32, #tpu.memory_space<vmem>>, vector<8x32xf32>
    %c288_110 = arith.constant 288 : index
    %c0_111 = arith.constant 0 : index
    %220 = vector.load %arg2[%c288_110, %c0_111] : memref<680x128xf32, #tpu.memory_space<vmem>>, vector<8x32xf32>
    %cst_112 = arith.constant dense<0.000000e+00> : vector<8x8xf32>
    %221 = tpu.matmul %182, %217, %cst_112 {dimension_numbers = #tpu.dot_dimension_numbers<[1], [1], [0], [0], [0, 0, 1, 0], [], []>} : vector<8x32xf32>, vector<8x32xf32>, vector<8x8xf32> -> vector<8x8xf32>
    %c409_113 = arith.constant 409 : index
    %c0_114 = arith.constant 0 : index
    %222 = vector.load %arg2[%c409_113, %c0_114] : memref<680x128xf32, #tpu.memory_space<vmem>>, vector<1x8xf32>
    %223 = vector.broadcast %222 : vector<1x8xf32> to vector<8x8xf32>
    %224 = arith.addf %221, %223 : vector<8x8xf32>
    %cst_115 = arith.constant dense<0.000000e+00> : vector<8x8xf32>
    %225 = tpu.matmul %182, %218, %cst_115 {dimension_numbers = #tpu.dot_dimension_numbers<[1], [1], [0], [0], [0, 0, 1, 0], [], []>} : vector<8x32xf32>, vector<8x32xf32>, vector<8x8xf32> -> vector<8x8xf32>
    %c413_116 = arith.constant 413 : index
    %c0_117 = arith.constant 0 : index
    %226 = vector.load %arg2[%c413_116, %c0_117] : memref<680x128xf32, #tpu.memory_space<vmem>>, vector<1x8xf32>
    %227 = vector.broadcast %226 : vector<1x8xf32> to vector<8x8xf32>
    %228 = arith.addf %225, %227 : vector<8x8xf32>
    %cst_118 = arith.constant dense<0.000000e+00> : vector<8x8xf32>
    %229 = tpu.matmul %182, %219, %cst_118 {dimension_numbers = #tpu.dot_dimension_numbers<[1], [1], [0], [0], [0, 0, 1, 0], [], []>} : vector<8x32xf32>, vector<8x32xf32>, vector<8x8xf32> -> vector<8x8xf32>
    %c417_119 = arith.constant 417 : index
    %c0_120 = arith.constant 0 : index
    %230 = vector.load %arg2[%c417_119, %c0_120] : memref<680x128xf32, #tpu.memory_space<vmem>>, vector<1x8xf32>
    %231 = vector.broadcast %230 : vector<1x8xf32> to vector<8x8xf32>
    %232 = arith.addf %229, %231 : vector<8x8xf32>
    %cst_121 = arith.constant dense<0.000000e+00> : vector<8x8xf32>
    %233 = tpu.matmul %224, %228, %cst_121 {dimension_numbers = #tpu.dot_dimension_numbers<[1], [1], [0], [0], [0, 0, 1, 0], [], []>} : vector<8x8xf32>, vector<8x8xf32>, vector<8x8xf32> -> vector<8x8xf32>
    %cst_122 = arith.constant 0.353553385 : f32
    %234 = vector.broadcast %cst_122 : f32 to vector<8x8xf32>
    %235 = arith.mulf %233, %234 : vector<8x8xf32>
    %236 = vector.broadcast %183 : vector<1x8xf32> to vector<8x8xf32>
    %237 = arith.addf %235, %236 : vector<8x8xf32>
    %cst_123 = arith.constant dense<0xFF800000> : vector<8xf32>
    %238 = vector.multi_reduction <maximumf>, %237, %cst_123 [1] : vector<8x8xf32> to vector<8xf32>
    %239 = vector.shape_cast %238 : vector<8xf32> to vector<8x1xf32>
    %240 = vector.broadcast %239 : vector<8x1xf32> to vector<8x8xf32>
    %241 = arith.subf %237, %240 : vector<8x8xf32>
    %242 = math.exp %241 : vector<8x8xf32>
    %cst_124 = arith.constant dense<0.000000e+00> : vector<8xf32>
    %243 = vector.multi_reduction <add>, %242, %cst_124 [1] : vector<8x8xf32> to vector<8xf32>
    %244 = vector.shape_cast %243 : vector<8xf32> to vector<8x1xf32>
    %245 = tpu.reciprocal %244 {approx = true} : vector<8x1xf32> -> vector<8x1xf32>
    %246 = vector.broadcast %245 : vector<8x1xf32> to vector<8x8xf32>
    %247 = arith.mulf %242, %246 : vector<8x8xf32>
    %cst_125 = arith.constant dense<0.000000e+00> : vector<8x8xf32>
    %248 = tpu.matmul %247, %232, %cst_125 {dimension_numbers = #tpu.dot_dimension_numbers<[1], [0], [0], [1], [0, 0, 1, 1], [], []>} : vector<8x8xf32>, vector<8x8xf32>, vector<8x8xf32> -> vector<8x8xf32>
    %cst_126 = arith.constant dense<0.000000e+00> : vector<8x32xf32>
    %249 = tpu.matmul %248, %220, %cst_126 {dimension_numbers = #tpu.dot_dimension_numbers<[1], [0], [0], [1], [0, 0, 1, 1], [], []>} : vector<8x8xf32>, vector<8x32xf32>, vector<8x32xf32> -> vector<8x32xf32>
    %250 = arith.addf %216, %249 : vector<8x32xf32>
    %c200_127 = arith.constant 200 : index
    %c0_128 = arith.constant 0 : index
    %251 = vector.load %arg2[%c200_127, %c0_128] : memref<680x128xf32, #tpu.memory_space<vmem>>, vector<8x32xf32>
    %c232_129 = arith.constant 232 : index
    %c0_130 = arith.constant 0 : index
    %252 = vector.load %arg2[%c232_129, %c0_130] : memref<680x128xf32, #tpu.memory_space<vmem>>, vector<8x32xf32>
    %c264_131 = arith.constant 264 : index
    %c0_132 = arith.constant 0 : index
    %253 = vector.load %arg2[%c264_131, %c0_132] : memref<680x128xf32, #tpu.memory_space<vmem>>, vector<8x32xf32>
    %c296_133 = arith.constant 296 : index
    %c0_134 = arith.constant 0 : index
    %254 = vector.load %arg2[%c296_133, %c0_134] : memref<680x128xf32, #tpu.memory_space<vmem>>, vector<8x32xf32>
    %cst_135 = arith.constant dense<0.000000e+00> : vector<8x8xf32>
    %255 = tpu.matmul %182, %251, %cst_135 {dimension_numbers = #tpu.dot_dimension_numbers<[1], [1], [0], [0], [0, 0, 1, 0], [], []>} : vector<8x32xf32>, vector<8x32xf32>, vector<8x8xf32> -> vector<8x8xf32>
    %c410_136 = arith.constant 410 : index
    %c0_137 = arith.constant 0 : index
    %256 = vector.load %arg2[%c410_136, %c0_137] : memref<680x128xf32, #tpu.memory_space<vmem>>, vector<1x8xf32>
    %257 = vector.broadcast %256 : vector<1x8xf32> to vector<8x8xf32>
    %258 = arith.addf %255, %257 : vector<8x8xf32>
    %cst_138 = arith.constant dense<0.000000e+00> : vector<8x8xf32>
    %259 = tpu.matmul %182, %252, %cst_138 {dimension_numbers = #tpu.dot_dimension_numbers<[1], [1], [0], [0], [0, 0, 1, 0], [], []>} : vector<8x32xf32>, vector<8x32xf32>, vector<8x8xf32> -> vector<8x8xf32>
    %c414_139 = arith.constant 414 : index
    %c0_140 = arith.constant 0 : index
    %260 = vector.load %arg2[%c414_139, %c0_140] : memref<680x128xf32, #tpu.memory_space<vmem>>, vector<1x8xf32>
    %261 = vector.broadcast %260 : vector<1x8xf32> to vector<8x8xf32>
    %262 = arith.addf %259, %261 : vector<8x8xf32>
    %cst_141 = arith.constant dense<0.000000e+00> : vector<8x8xf32>
    %263 = tpu.matmul %182, %253, %cst_141 {dimension_numbers = #tpu.dot_dimension_numbers<[1], [1], [0], [0], [0, 0, 1, 0], [], []>} : vector<8x32xf32>, vector<8x32xf32>, vector<8x8xf32> -> vector<8x8xf32>
    %c418_142 = arith.constant 418 : index
    %c0_143 = arith.constant 0 : index
    %264 = vector.load %arg2[%c418_142, %c0_143] : memref<680x128xf32, #tpu.memory_space<vmem>>, vector<1x8xf32>
    %265 = vector.broadcast %264 : vector<1x8xf32> to vector<8x8xf32>
    %266 = arith.addf %263, %265 : vector<8x8xf32>
    %cst_144 = arith.constant dense<0.000000e+00> : vector<8x8xf32>
    %267 = tpu.matmul %258, %262, %cst_144 {dimension_numbers = #tpu.dot_dimension_numbers<[1], [1], [0], [0], [0, 0, 1, 0], [], []>} : vector<8x8xf32>, vector<8x8xf32>, vector<8x8xf32> -> vector<8x8xf32>
    %cst_145 = arith.constant 0.353553385 : f32
    %268 = vector.broadcast %cst_145 : f32 to vector<8x8xf32>
    %269 = arith.mulf %267, %268 : vector<8x8xf32>
    %270 = vector.broadcast %183 : vector<1x8xf32> to vector<8x8xf32>
    %271 = arith.addf %269, %270 : vector<8x8xf32>
    %cst_146 = arith.constant dense<0xFF800000> : vector<8xf32>
    %272 = vector.multi_reduction <maximumf>, %271, %cst_146 [1] : vector<8x8xf32> to vector<8xf32>
    %273 = vector.shape_cast %272 : vector<8xf32> to vector<8x1xf32>
    %274 = vector.broadcast %273 : vector<8x1xf32> to vector<8x8xf32>
    %275 = arith.subf %271, %274 : vector<8x8xf32>
    %276 = math.exp %275 : vector<8x8xf32>
    %cst_147 = arith.constant dense<0.000000e+00> : vector<8xf32>
    %277 = vector.multi_reduction <add>, %276, %cst_147 [1] : vector<8x8xf32> to vector<8xf32>
    %278 = vector.shape_cast %277 : vector<8xf32> to vector<8x1xf32>
    %279 = tpu.reciprocal %278 {approx = true} : vector<8x1xf32> -> vector<8x1xf32>
    %280 = vector.broadcast %279 : vector<8x1xf32> to vector<8x8xf32>
    %281 = arith.mulf %276, %280 : vector<8x8xf32>
    %cst_148 = arith.constant dense<0.000000e+00> : vector<8x8xf32>
    %282 = tpu.matmul %281, %266, %cst_148 {dimension_numbers = #tpu.dot_dimension_numbers<[1], [0], [0], [1], [0, 0, 1, 1], [], []>} : vector<8x8xf32>, vector<8x8xf32>, vector<8x8xf32> -> vector<8x8xf32>
    %cst_149 = arith.constant dense<0.000000e+00> : vector<8x32xf32>
    %283 = tpu.matmul %282, %254, %cst_149 {dimension_numbers = #tpu.dot_dimension_numbers<[1], [0], [0], [1], [0, 0, 1, 1], [], []>} : vector<8x8xf32>, vector<8x32xf32>, vector<8x32xf32> -> vector<8x32xf32>
    %284 = arith.addf %250, %283 : vector<8x32xf32>
    %c208_150 = arith.constant 208 : index
    %c0_151 = arith.constant 0 : index
    %285 = vector.load %arg2[%c208_150, %c0_151] : memref<680x128xf32, #tpu.memory_space<vmem>>, vector<8x32xf32>
    %c240_152 = arith.constant 240 : index
    %c0_153 = arith.constant 0 : index
    %286 = vector.load %arg2[%c240_152, %c0_153] : memref<680x128xf32, #tpu.memory_space<vmem>>, vector<8x32xf32>
    %c272_154 = arith.constant 272 : index
    %c0_155 = arith.constant 0 : index
    %287 = vector.load %arg2[%c272_154, %c0_155] : memref<680x128xf32, #tpu.memory_space<vmem>>, vector<8x32xf32>
    %c304_156 = arith.constant 304 : index
    %c0_157 = arith.constant 0 : index
    %288 = vector.load %arg2[%c304_156, %c0_157] : memref<680x128xf32, #tpu.memory_space<vmem>>, vector<8x32xf32>
    %cst_158 = arith.constant dense<0.000000e+00> : vector<8x8xf32>
    %289 = tpu.matmul %182, %285, %cst_158 {dimension_numbers = #tpu.dot_dimension_numbers<[1], [1], [0], [0], [0, 0, 1, 0], [], []>} : vector<8x32xf32>, vector<8x32xf32>, vector<8x8xf32> -> vector<8x8xf32>
    %c411_159 = arith.constant 411 : index
    %c0_160 = arith.constant 0 : index
    %290 = vector.load %arg2[%c411_159, %c0_160] : memref<680x128xf32, #tpu.memory_space<vmem>>, vector<1x8xf32>
    %291 = vector.broadcast %290 : vector<1x8xf32> to vector<8x8xf32>
    %292 = arith.addf %289, %291 : vector<8x8xf32>
    %cst_161 = arith.constant dense<0.000000e+00> : vector<8x8xf32>
    %293 = tpu.matmul %182, %286, %cst_161 {dimension_numbers = #tpu.dot_dimension_numbers<[1], [1], [0], [0], [0, 0, 1, 0], [], []>} : vector<8x32xf32>, vector<8x32xf32>, vector<8x8xf32> -> vector<8x8xf32>
    %c415_162 = arith.constant 415 : index
    %c0_163 = arith.constant 0 : index
    %294 = vector.load %arg2[%c415_162, %c0_163] : memref<680x128xf32, #tpu.memory_space<vmem>>, vector<1x8xf32>
    %295 = vector.broadcast %294 : vector<1x8xf32> to vector<8x8xf32>
    %296 = arith.addf %293, %295 : vector<8x8xf32>
    %cst_164 = arith.constant dense<0.000000e+00> : vector<8x8xf32>
    %297 = tpu.matmul %182, %287, %cst_164 {dimension_numbers = #tpu.dot_dimension_numbers<[1], [1], [0], [0], [0, 0, 1, 0], [], []>} : vector<8x32xf32>, vector<8x32xf32>, vector<8x8xf32> -> vector<8x8xf32>
    %c419_165 = arith.constant 419 : index
    %c0_166 = arith.constant 0 : index
    %298 = vector.load %arg2[%c419_165, %c0_166] : memref<680x128xf32, #tpu.memory_space<vmem>>, vector<1x8xf32>
    %299 = vector.broadcast %298 : vector<1x8xf32> to vector<8x8xf32>
    %300 = arith.addf %297, %299 : vector<8x8xf32>
    %cst_167 = arith.constant dense<0.000000e+00> : vector<8x8xf32>
    %301 = tpu.matmul %292, %296, %cst_167 {dimension_numbers = #tpu.dot_dimension_numbers<[1], [1], [0], [0], [0, 0, 1, 0], [], []>} : vector<8x8xf32>, vector<8x8xf32>, vector<8x8xf32> -> vector<8x8xf32>
    %cst_168 = arith.constant 0.353553385 : f32
    %302 = vector.broadcast %cst_168 : f32 to vector<8x8xf32>
    %303 = arith.mulf %301, %302 : vector<8x8xf32>
    %304 = vector.broadcast %183 : vector<1x8xf32> to vector<8x8xf32>
    %305 = arith.addf %303, %304 : vector<8x8xf32>
    %cst_169 = arith.constant dense<0xFF800000> : vector<8xf32>
    %306 = vector.multi_reduction <maximumf>, %305, %cst_169 [1] : vector<8x8xf32> to vector<8xf32>
    %307 = vector.shape_cast %306 : vector<8xf32> to vector<8x1xf32>
    %308 = vector.broadcast %307 : vector<8x1xf32> to vector<8x8xf32>
    %309 = arith.subf %305, %308 : vector<8x8xf32>
    %310 = math.exp %309 : vector<8x8xf32>
    %cst_170 = arith.constant dense<0.000000e+00> : vector<8xf32>
    %311 = vector.multi_reduction <add>, %310, %cst_170 [1] : vector<8x8xf32> to vector<8xf32>
    %312 = vector.shape_cast %311 : vector<8xf32> to vector<8x1xf32>
    %313 = tpu.reciprocal %312 {approx = true} : vector<8x1xf32> -> vector<8x1xf32>
    %314 = vector.broadcast %313 : vector<8x1xf32> to vector<8x8xf32>
    %315 = arith.mulf %310, %314 : vector<8x8xf32>
    %cst_171 = arith.constant dense<0.000000e+00> : vector<8x8xf32>
    %316 = tpu.matmul %315, %300, %cst_171 {dimension_numbers = #tpu.dot_dimension_numbers<[1], [0], [0], [1], [0, 0, 1, 1], [], []>} : vector<8x8xf32>, vector<8x8xf32>, vector<8x8xf32> -> vector<8x8xf32>
    %cst_172 = arith.constant dense<0.000000e+00> : vector<8x32xf32>
    %317 = tpu.matmul %316, %288, %cst_172 {dimension_numbers = #tpu.dot_dimension_numbers<[1], [0], [0], [1], [0, 0, 1, 1], [], []>} : vector<8x8xf32>, vector<8x32xf32>, vector<8x32xf32> -> vector<8x32xf32>
    %318 = arith.addf %284, %317 : vector<8x32xf32>
    %c420_173 = arith.constant 420 : index
    %c0_174 = arith.constant 0 : index
    %319 = vector.load %arg2[%c420_173, %c0_174] : memref<680x128xf32, #tpu.memory_space<vmem>>, vector<1x32xf32>
    %320 = vector.broadcast %319 : vector<1x32xf32> to vector<8x32xf32>
    %321 = arith.addf %318, %320 : vector<8x32xf32>
    %322 = tpu.concatenate %181, %321 in 0 : vector<8x32xf32>, vector<8x32xf32> -> vector<16x32xf32>
    %323 = arith.addf %322, %35 : vector<16x32xf32>
    %cst_175 = arith.constant dense<0.000000e+00> : vector<16xf32>
    %324 = vector.multi_reduction <add>, %323, %cst_175 [1] : vector<16x32xf32> to vector<16xf32>
    %325 = vector.shape_cast %324 : vector<16xf32> to vector<16x1xf32>
    %cst_176 = arith.constant 3.200000e+01 : f32
    %326 = vector.broadcast %cst_176 : f32 to vector<16x1xf32>
    %327 = arith.divf %325, %326 : vector<16x1xf32>
    %328 = vector.broadcast %327 : vector<16x1xf32> to vector<16x32xf32>
    %329 = arith.subf %323, %328 : vector<16x32xf32>
    %330 = arith.mulf %329, %329 : vector<16x32xf32>
    %cst_177 = arith.constant dense<0.000000e+00> : vector<16xf32>
    %331 = vector.multi_reduction <add>, %330, %cst_177 [1] : vector<16x32xf32> to vector<16xf32>
    %332 = vector.shape_cast %331 : vector<16xf32> to vector<16x1xf32>
    %cst_178 = arith.constant 3.200000e+01 : f32
    %333 = vector.broadcast %cst_178 : f32 to vector<16x1xf32>
    %334 = arith.divf %332, %333 : vector<16x1xf32>
    %cst_179 = arith.constant 9.99999974E-6 : f32
    %335 = vector.broadcast %cst_179 : f32 to vector<16x1xf32>
    %336 = arith.addf %334, %335 : vector<16x1xf32>
    %337 = math.rsqrt %336 : vector<16x1xf32>
    %338 = vector.broadcast %337 : vector<16x1xf32> to vector<16x32xf32>
    %339 = arith.mulf %329, %338 : vector<16x32xf32>
    %c421 = arith.constant 421 : index
    %c0_180 = arith.constant 0 : index
    %340 = vector.load %arg2[%c421, %c0_180] : memref<680x128xf32, #tpu.memory_space<vmem>>, vector<1x32xf32>
    %341 = vector.broadcast %340 : vector<1x32xf32> to vector<16x32xf32>
    %342 = arith.mulf %339, %341 : vector<16x32xf32>
    %c422 = arith.constant 422 : index
    %c0_181 = arith.constant 0 : index
    %343 = vector.load %arg2[%c422, %c0_181] : memref<680x128xf32, #tpu.memory_space<vmem>>, vector<1x32xf32>
    %344 = vector.broadcast %343 : vector<1x32xf32> to vector<16x32xf32>
    %345 = arith.addf %342, %344 : vector<16x32xf32>
    %c312 = arith.constant 312 : index
    %c0_182 = arith.constant 0 : index
    %346 = vector.load %arg2[%c312, %c0_182] : memref<680x128xf32, #tpu.memory_space<vmem>>, vector<32x64xf32>
    %cst_183 = arith.constant dense<0.000000e+00> : vector<16x64xf32>
    %347 = tpu.matmul %345, %346, %cst_183 {dimension_numbers = #tpu.dot_dimension_numbers<[1], [0], [0], [1], [0, 0, 1, 1], [], []>} : vector<16x32xf32>, vector<32x64xf32>, vector<16x64xf32> -> vector<16x64xf32>
    %c423 = arith.constant 423 : index
    %c0_184 = arith.constant 0 : index
    %348 = vector.load %arg2[%c423, %c0_184] : memref<680x128xf32, #tpu.memory_space<vmem>>, vector<1x64xf32>
    %349 = vector.broadcast %348 : vector<1x64xf32> to vector<16x64xf32>
    %350 = arith.addf %347, %349 : vector<16x64xf32>
    %cst_185 = arith.constant 0.000000e+00 : f32
    %351 = vector.broadcast %cst_185 : f32 to vector<16x64xf32>
    %352 = arith.maximumf %350, %351 : vector<16x64xf32>
    %c344 = arith.constant 344 : index
    %c0_186 = arith.constant 0 : index
    %353 = vector.load %arg2[%c344, %c0_186] : memref<680x128xf32, #tpu.memory_space<vmem>>, vector<64x32xf32>
    %cst_187 = arith.constant dense<0.000000e+00> : vector<16x32xf32>
    %354 = tpu.matmul %352, %353, %cst_187 {dimension_numbers = #tpu.dot_dimension_numbers<[1], [0], [0], [1], [0, 0, 1, 1], [], []>} : vector<16x64xf32>, vector<64x32xf32>, vector<16x32xf32> -> vector<16x32xf32>
    %c424 = arith.constant 424 : index
    %c0_188 = arith.constant 0 : index
    %355 = vector.load %arg2[%c424, %c0_188] : memref<680x128xf32, #tpu.memory_space<vmem>>, vector<1x32xf32>
    %356 = vector.broadcast %355 : vector<1x32xf32> to vector<16x32xf32>
    %357 = arith.addf %354, %356 : vector<16x32xf32>
    %358 = arith.addf %357, %345 : vector<16x32xf32>
    %cst_189 = arith.constant dense<0.000000e+00> : vector<16xf32>
    %359 = vector.multi_reduction <add>, %358, %cst_189 [1] : vector<16x32xf32> to vector<16xf32>
    %360 = vector.shape_cast %359 : vector<16xf32> to vector<16x1xf32>
    %cst_190 = arith.constant 3.200000e+01 : f32
    %361 = vector.broadcast %cst_190 : f32 to vector<16x1xf32>
    %362 = arith.divf %360, %361 : vector<16x1xf32>
    %363 = vector.broadcast %362 : vector<16x1xf32> to vector<16x32xf32>
    %364 = arith.subf %358, %363 : vector<16x32xf32>
    %365 = arith.mulf %364, %364 : vector<16x32xf32>
    %cst_191 = arith.constant dense<0.000000e+00> : vector<16xf32>
    %366 = vector.multi_reduction <add>, %365, %cst_191 [1] : vector<16x32xf32> to vector<16xf32>
    %367 = vector.shape_cast %366 : vector<16xf32> to vector<16x1xf32>
    %cst_192 = arith.constant 3.200000e+01 : f32
    %368 = vector.broadcast %cst_192 : f32 to vector<16x1xf32>
    %369 = arith.divf %367, %368 : vector<16x1xf32>
    %cst_193 = arith.constant 9.99999974E-6 : f32
    %370 = vector.broadcast %cst_193 : f32 to vector<16x1xf32>
    %371 = arith.addf %369, %370 : vector<16x1xf32>
    %372 = math.rsqrt %371 : vector<16x1xf32>
    %373 = vector.broadcast %372 : vector<16x1xf32> to vector<16x32xf32>
    %374 = arith.mulf %364, %373 : vector<16x32xf32>
    %c425 = arith.constant 425 : index
    %c0_194 = arith.constant 0 : index
    %375 = vector.load %arg2[%c425, %c0_194] : memref<680x128xf32, #tpu.memory_space<vmem>>, vector<1x32xf32>
    %376 = vector.broadcast %375 : vector<1x32xf32> to vector<16x32xf32>
    %377 = arith.mulf %374, %376 : vector<16x32xf32>
    %c426 = arith.constant 426 : index
    %c0_195 = arith.constant 0 : index
    %378 = vector.load %arg2[%c426, %c0_195] : memref<680x128xf32, #tpu.memory_space<vmem>>, vector<1x32xf32>
    %379 = vector.broadcast %378 : vector<1x32xf32> to vector<16x32xf32>
    %380 = arith.addf %377, %379 : vector<16x32xf32>
    %381 = vector.extract_strided_slice %380 {offsets = [0, 0], sizes = [8, 32], strides = [1, 1]} : vector<16x32xf32> to vector<8x32xf32>
    %382 = vector.extract_strided_slice %41 {offsets = [0, 0], sizes = [1, 8], strides = [1, 1]} : vector<2x8xf32> to vector<1x8xf32>
    %c432 = arith.constant 432 : index
    %c0_196 = arith.constant 0 : index
    %383 = vector.load %arg2[%c432, %c0_196] : memref<680x128xf32, #tpu.memory_space<vmem>>, vector<8x32xf32>
    %c464 = arith.constant 464 : index
    %c0_197 = arith.constant 0 : index
    %384 = vector.load %arg2[%c464, %c0_197] : memref<680x128xf32, #tpu.memory_space<vmem>>, vector<8x32xf32>
    %c496 = arith.constant 496 : index
    %c0_198 = arith.constant 0 : index
    %385 = vector.load %arg2[%c496, %c0_198] : memref<680x128xf32, #tpu.memory_space<vmem>>, vector<8x32xf32>
    %c528 = arith.constant 528 : index
    %c0_199 = arith.constant 0 : index
    %386 = vector.load %arg2[%c528, %c0_199] : memref<680x128xf32, #tpu.memory_space<vmem>>, vector<8x32xf32>
    %cst_200 = arith.constant dense<0.000000e+00> : vector<8x8xf32>
    %387 = tpu.matmul %381, %383, %cst_200 {dimension_numbers = #tpu.dot_dimension_numbers<[1], [1], [0], [0], [0, 0, 1, 0], [], []>} : vector<8x32xf32>, vector<8x32xf32>, vector<8x8xf32> -> vector<8x8xf32>
    %c656 = arith.constant 656 : index
    %c0_201 = arith.constant 0 : index
    %388 = vector.load %arg2[%c656, %c0_201] : memref<680x128xf32, #tpu.memory_space<vmem>>, vector<1x8xf32>
    %389 = vector.broadcast %388 : vector<1x8xf32> to vector<8x8xf32>
    %390 = arith.addf %387, %389 : vector<8x8xf32>
    %cst_202 = arith.constant dense<0.000000e+00> : vector<8x8xf32>
    %391 = tpu.matmul %381, %384, %cst_202 {dimension_numbers = #tpu.dot_dimension_numbers<[1], [1], [0], [0], [0, 0, 1, 0], [], []>} : vector<8x32xf32>, vector<8x32xf32>, vector<8x8xf32> -> vector<8x8xf32>
    %c660 = arith.constant 660 : index
    %c0_203 = arith.constant 0 : index
    %392 = vector.load %arg2[%c660, %c0_203] : memref<680x128xf32, #tpu.memory_space<vmem>>, vector<1x8xf32>
    %393 = vector.broadcast %392 : vector<1x8xf32> to vector<8x8xf32>
    %394 = arith.addf %391, %393 : vector<8x8xf32>
    %cst_204 = arith.constant dense<0.000000e+00> : vector<8x8xf32>
    %395 = tpu.matmul %381, %385, %cst_204 {dimension_numbers = #tpu.dot_dimension_numbers<[1], [1], [0], [0], [0, 0, 1, 0], [], []>} : vector<8x32xf32>, vector<8x32xf32>, vector<8x8xf32> -> vector<8x8xf32>
    %c664 = arith.constant 664 : index
    %c0_205 = arith.constant 0 : index
    %396 = vector.load %arg2[%c664, %c0_205] : memref<680x128xf32, #tpu.memory_space<vmem>>, vector<1x8xf32>
    %397 = vector.broadcast %396 : vector<1x8xf32> to vector<8x8xf32>
    %398 = arith.addf %395, %397 : vector<8x8xf32>
    %cst_206 = arith.constant dense<0.000000e+00> : vector<8x8xf32>
    %399 = tpu.matmul %390, %394, %cst_206 {dimension_numbers = #tpu.dot_dimension_numbers<[1], [1], [0], [0], [0, 0, 1, 0], [], []>} : vector<8x8xf32>, vector<8x8xf32>, vector<8x8xf32> -> vector<8x8xf32>
    %cst_207 = arith.constant 0.353553385 : f32
    %400 = vector.broadcast %cst_207 : f32 to vector<8x8xf32>
    %401 = arith.mulf %399, %400 : vector<8x8xf32>
    %402 = vector.broadcast %382 : vector<1x8xf32> to vector<8x8xf32>
    %403 = arith.addf %401, %402 : vector<8x8xf32>
    %cst_208 = arith.constant dense<0xFF800000> : vector<8xf32>
    %404 = vector.multi_reduction <maximumf>, %403, %cst_208 [1] : vector<8x8xf32> to vector<8xf32>
    %405 = vector.shape_cast %404 : vector<8xf32> to vector<8x1xf32>
    %406 = vector.broadcast %405 : vector<8x1xf32> to vector<8x8xf32>
    %407 = arith.subf %403, %406 : vector<8x8xf32>
    %408 = math.exp %407 : vector<8x8xf32>
    %cst_209 = arith.constant dense<0.000000e+00> : vector<8xf32>
    %409 = vector.multi_reduction <add>, %408, %cst_209 [1] : vector<8x8xf32> to vector<8xf32>
    %410 = vector.shape_cast %409 : vector<8xf32> to vector<8x1xf32>
    %411 = tpu.reciprocal %410 {approx = true} : vector<8x1xf32> -> vector<8x1xf32>
    %412 = vector.broadcast %411 : vector<8x1xf32> to vector<8x8xf32>
    %413 = arith.mulf %408, %412 : vector<8x8xf32>
    %cst_210 = arith.constant dense<0.000000e+00> : vector<8x8xf32>
    %414 = tpu.matmul %413, %398, %cst_210 {dimension_numbers = #tpu.dot_dimension_numbers<[1], [0], [0], [1], [0, 0, 1, 1], [], []>} : vector<8x8xf32>, vector<8x8xf32>, vector<8x8xf32> -> vector<8x8xf32>
    %cst_211 = arith.constant dense<0.000000e+00> : vector<8x32xf32>
    %415 = tpu.matmul %414, %386, %cst_211 {dimension_numbers = #tpu.dot_dimension_numbers<[1], [0], [0], [1], [0, 0, 1, 1], [], []>} : vector<8x8xf32>, vector<8x32xf32>, vector<8x32xf32> -> vector<8x32xf32>
    %c440 = arith.constant 440 : index
    %c0_212 = arith.constant 0 : index
    %416 = vector.load %arg2[%c440, %c0_212] : memref<680x128xf32, #tpu.memory_space<vmem>>, vector<8x32xf32>
    %c472 = arith.constant 472 : index
    %c0_213 = arith.constant 0 : index
    %417 = vector.load %arg2[%c472, %c0_213] : memref<680x128xf32, #tpu.memory_space<vmem>>, vector<8x32xf32>
    %c504 = arith.constant 504 : index
    %c0_214 = arith.constant 0 : index
    %418 = vector.load %arg2[%c504, %c0_214] : memref<680x128xf32, #tpu.memory_space<vmem>>, vector<8x32xf32>
    %c536 = arith.constant 536 : index
    %c0_215 = arith.constant 0 : index
    %419 = vector.load %arg2[%c536, %c0_215] : memref<680x128xf32, #tpu.memory_space<vmem>>, vector<8x32xf32>
    %cst_216 = arith.constant dense<0.000000e+00> : vector<8x8xf32>
    %420 = tpu.matmul %381, %416, %cst_216 {dimension_numbers = #tpu.dot_dimension_numbers<[1], [1], [0], [0], [0, 0, 1, 0], [], []>} : vector<8x32xf32>, vector<8x32xf32>, vector<8x8xf32> -> vector<8x8xf32>
    %c657 = arith.constant 657 : index
    %c0_217 = arith.constant 0 : index
    %421 = vector.load %arg2[%c657, %c0_217] : memref<680x128xf32, #tpu.memory_space<vmem>>, vector<1x8xf32>
    %422 = vector.broadcast %421 : vector<1x8xf32> to vector<8x8xf32>
    %423 = arith.addf %420, %422 : vector<8x8xf32>
    %cst_218 = arith.constant dense<0.000000e+00> : vector<8x8xf32>
    %424 = tpu.matmul %381, %417, %cst_218 {dimension_numbers = #tpu.dot_dimension_numbers<[1], [1], [0], [0], [0, 0, 1, 0], [], []>} : vector<8x32xf32>, vector<8x32xf32>, vector<8x8xf32> -> vector<8x8xf32>
    %c661 = arith.constant 661 : index
    %c0_219 = arith.constant 0 : index
    %425 = vector.load %arg2[%c661, %c0_219] : memref<680x128xf32, #tpu.memory_space<vmem>>, vector<1x8xf32>
    %426 = vector.broadcast %425 : vector<1x8xf32> to vector<8x8xf32>
    %427 = arith.addf %424, %426 : vector<8x8xf32>
    %cst_220 = arith.constant dense<0.000000e+00> : vector<8x8xf32>
    %428 = tpu.matmul %381, %418, %cst_220 {dimension_numbers = #tpu.dot_dimension_numbers<[1], [1], [0], [0], [0, 0, 1, 0], [], []>} : vector<8x32xf32>, vector<8x32xf32>, vector<8x8xf32> -> vector<8x8xf32>
    %c665 = arith.constant 665 : index
    %c0_221 = arith.constant 0 : index
    %429 = vector.load %arg2[%c665, %c0_221] : memref<680x128xf32, #tpu.memory_space<vmem>>, vector<1x8xf32>
    %430 = vector.broadcast %429 : vector<1x8xf32> to vector<8x8xf32>
    %431 = arith.addf %428, %430 : vector<8x8xf32>
    %cst_222 = arith.constant dense<0.000000e+00> : vector<8x8xf32>
    %432 = tpu.matmul %423, %427, %cst_222 {dimension_numbers = #tpu.dot_dimension_numbers<[1], [1], [0], [0], [0, 0, 1, 0], [], []>} : vector<8x8xf32>, vector<8x8xf32>, vector<8x8xf32> -> vector<8x8xf32>
    %cst_223 = arith.constant 0.353553385 : f32
    %433 = vector.broadcast %cst_223 : f32 to vector<8x8xf32>
    %434 = arith.mulf %432, %433 : vector<8x8xf32>
    %435 = vector.broadcast %382 : vector<1x8xf32> to vector<8x8xf32>
    %436 = arith.addf %434, %435 : vector<8x8xf32>
    %cst_224 = arith.constant dense<0xFF800000> : vector<8xf32>
    %437 = vector.multi_reduction <maximumf>, %436, %cst_224 [1] : vector<8x8xf32> to vector<8xf32>
    %438 = vector.shape_cast %437 : vector<8xf32> to vector<8x1xf32>
    %439 = vector.broadcast %438 : vector<8x1xf32> to vector<8x8xf32>
    %440 = arith.subf %436, %439 : vector<8x8xf32>
    %441 = math.exp %440 : vector<8x8xf32>
    %cst_225 = arith.constant dense<0.000000e+00> : vector<8xf32>
    %442 = vector.multi_reduction <add>, %441, %cst_225 [1] : vector<8x8xf32> to vector<8xf32>
    %443 = vector.shape_cast %442 : vector<8xf32> to vector<8x1xf32>
    %444 = tpu.reciprocal %443 {approx = true} : vector<8x1xf32> -> vector<8x1xf32>
    %445 = vector.broadcast %444 : vector<8x1xf32> to vector<8x8xf32>
    %446 = arith.mulf %441, %445 : vector<8x8xf32>
    %cst_226 = arith.constant dense<0.000000e+00> : vector<8x8xf32>
    %447 = tpu.matmul %446, %431, %cst_226 {dimension_numbers = #tpu.dot_dimension_numbers<[1], [0], [0], [1], [0, 0, 1, 1], [], []>} : vector<8x8xf32>, vector<8x8xf32>, vector<8x8xf32> -> vector<8x8xf32>
    %cst_227 = arith.constant dense<0.000000e+00> : vector<8x32xf32>
    %448 = tpu.matmul %447, %419, %cst_227 {dimension_numbers = #tpu.dot_dimension_numbers<[1], [0], [0], [1], [0, 0, 1, 1], [], []>} : vector<8x8xf32>, vector<8x32xf32>, vector<8x32xf32> -> vector<8x32xf32>
    %449 = arith.addf %415, %448 : vector<8x32xf32>
    %c448 = arith.constant 448 : index
    %c0_228 = arith.constant 0 : index
    %450 = vector.load %arg2[%c448, %c0_228] : memref<680x128xf32, #tpu.memory_space<vmem>>, vector<8x32xf32>
    %c480 = arith.constant 480 : index
    %c0_229 = arith.constant 0 : index
    %451 = vector.load %arg2[%c480, %c0_229] : memref<680x128xf32, #tpu.memory_space<vmem>>, vector<8x32xf32>
    %c512 = arith.constant 512 : index
    %c0_230 = arith.constant 0 : index
    %452 = vector.load %arg2[%c512, %c0_230] : memref<680x128xf32, #tpu.memory_space<vmem>>, vector<8x32xf32>
    %c544 = arith.constant 544 : index
    %c0_231 = arith.constant 0 : index
    %453 = vector.load %arg2[%c544, %c0_231] : memref<680x128xf32, #tpu.memory_space<vmem>>, vector<8x32xf32>
    %cst_232 = arith.constant dense<0.000000e+00> : vector<8x8xf32>
    %454 = tpu.matmul %381, %450, %cst_232 {dimension_numbers = #tpu.dot_dimension_numbers<[1], [1], [0], [0], [0, 0, 1, 0], [], []>} : vector<8x32xf32>, vector<8x32xf32>, vector<8x8xf32> -> vector<8x8xf32>
    %c658 = arith.constant 658 : index
    %c0_233 = arith.constant 0 : index
    %455 = vector.load %arg2[%c658, %c0_233] : memref<680x128xf32, #tpu.memory_space<vmem>>, vector<1x8xf32>
    %456 = vector.broadcast %455 : vector<1x8xf32> to vector<8x8xf32>
    %457 = arith.addf %454, %456 : vector<8x8xf32>
    %cst_234 = arith.constant dense<0.000000e+00> : vector<8x8xf32>
    %458 = tpu.matmul %381, %451, %cst_234 {dimension_numbers = #tpu.dot_dimension_numbers<[1], [1], [0], [0], [0, 0, 1, 0], [], []>} : vector<8x32xf32>, vector<8x32xf32>, vector<8x8xf32> -> vector<8x8xf32>
    %c662 = arith.constant 662 : index
    %c0_235 = arith.constant 0 : index
    %459 = vector.load %arg2[%c662, %c0_235] : memref<680x128xf32, #tpu.memory_space<vmem>>, vector<1x8xf32>
    %460 = vector.broadcast %459 : vector<1x8xf32> to vector<8x8xf32>
    %461 = arith.addf %458, %460 : vector<8x8xf32>
    %cst_236 = arith.constant dense<0.000000e+00> : vector<8x8xf32>
    %462 = tpu.matmul %381, %452, %cst_236 {dimension_numbers = #tpu.dot_dimension_numbers<[1], [1], [0], [0], [0, 0, 1, 0], [], []>} : vector<8x32xf32>, vector<8x32xf32>, vector<8x8xf32> -> vector<8x8xf32>
    %c666 = arith.constant 666 : index
    %c0_237 = arith.constant 0 : index
    %463 = vector.load %arg2[%c666, %c0_237] : memref<680x128xf32, #tpu.memory_space<vmem>>, vector<1x8xf32>
    %464 = vector.broadcast %463 : vector<1x8xf32> to vector<8x8xf32>
    %465 = arith.addf %462, %464 : vector<8x8xf32>
    %cst_238 = arith.constant dense<0.000000e+00> : vector<8x8xf32>
    %466 = tpu.matmul %457, %461, %cst_238 {dimension_numbers = #tpu.dot_dimension_numbers<[1], [1], [0], [0], [0, 0, 1, 0], [], []>} : vector<8x8xf32>, vector<8x8xf32>, vector<8x8xf32> -> vector<8x8xf32>
    %cst_239 = arith.constant 0.353553385 : f32
    %467 = vector.broadcast %cst_239 : f32 to vector<8x8xf32>
    %468 = arith.mulf %466, %467 : vector<8x8xf32>
    %469 = vector.broadcast %382 : vector<1x8xf32> to vector<8x8xf32>
    %470 = arith.addf %468, %469 : vector<8x8xf32>
    %cst_240 = arith.constant dense<0xFF800000> : vector<8xf32>
    %471 = vector.multi_reduction <maximumf>, %470, %cst_240 [1] : vector<8x8xf32> to vector<8xf32>
    %472 = vector.shape_cast %471 : vector<8xf32> to vector<8x1xf32>
    %473 = vector.broadcast %472 : vector<8x1xf32> to vector<8x8xf32>
    %474 = arith.subf %470, %473 : vector<8x8xf32>
    %475 = math.exp %474 : vector<8x8xf32>
    %cst_241 = arith.constant dense<0.000000e+00> : vector<8xf32>
    %476 = vector.multi_reduction <add>, %475, %cst_241 [1] : vector<8x8xf32> to vector<8xf32>
    %477 = vector.shape_cast %476 : vector<8xf32> to vector<8x1xf32>
    %478 = tpu.reciprocal %477 {approx = true} : vector<8x1xf32> -> vector<8x1xf32>
    %479 = vector.broadcast %478 : vector<8x1xf32> to vector<8x8xf32>
    %480 = arith.mulf %475, %479 : vector<8x8xf32>
    %cst_242 = arith.constant dense<0.000000e+00> : vector<8x8xf32>
    %481 = tpu.matmul %480, %465, %cst_242 {dimension_numbers = #tpu.dot_dimension_numbers<[1], [0], [0], [1], [0, 0, 1, 1], [], []>} : vector<8x8xf32>, vector<8x8xf32>, vector<8x8xf32> -> vector<8x8xf32>
    %cst_243 = arith.constant dense<0.000000e+00> : vector<8x32xf32>
    %482 = tpu.matmul %481, %453, %cst_243 {dimension_numbers = #tpu.dot_dimension_numbers<[1], [0], [0], [1], [0, 0, 1, 1], [], []>} : vector<8x8xf32>, vector<8x32xf32>, vector<8x32xf32> -> vector<8x32xf32>
    %483 = arith.addf %449, %482 : vector<8x32xf32>
    %c456 = arith.constant 456 : index
    %c0_244 = arith.constant 0 : index
    %484 = vector.load %arg2[%c456, %c0_244] : memref<680x128xf32, #tpu.memory_space<vmem>>, vector<8x32xf32>
    %c488 = arith.constant 488 : index
    %c0_245 = arith.constant 0 : index
    %485 = vector.load %arg2[%c488, %c0_245] : memref<680x128xf32, #tpu.memory_space<vmem>>, vector<8x32xf32>
    %c520 = arith.constant 520 : index
    %c0_246 = arith.constant 0 : index
    %486 = vector.load %arg2[%c520, %c0_246] : memref<680x128xf32, #tpu.memory_space<vmem>>, vector<8x32xf32>
    %c552 = arith.constant 552 : index
    %c0_247 = arith.constant 0 : index
    %487 = vector.load %arg2[%c552, %c0_247] : memref<680x128xf32, #tpu.memory_space<vmem>>, vector<8x32xf32>
    %cst_248 = arith.constant dense<0.000000e+00> : vector<8x8xf32>
    %488 = tpu.matmul %381, %484, %cst_248 {dimension_numbers = #tpu.dot_dimension_numbers<[1], [1], [0], [0], [0, 0, 1, 0], [], []>} : vector<8x32xf32>, vector<8x32xf32>, vector<8x8xf32> -> vector<8x8xf32>
    %c659 = arith.constant 659 : index
    %c0_249 = arith.constant 0 : index
    %489 = vector.load %arg2[%c659, %c0_249] : memref<680x128xf32, #tpu.memory_space<vmem>>, vector<1x8xf32>
    %490 = vector.broadcast %489 : vector<1x8xf32> to vector<8x8xf32>
    %491 = arith.addf %488, %490 : vector<8x8xf32>
    %cst_250 = arith.constant dense<0.000000e+00> : vector<8x8xf32>
    %492 = tpu.matmul %381, %485, %cst_250 {dimension_numbers = #tpu.dot_dimension_numbers<[1], [1], [0], [0], [0, 0, 1, 0], [], []>} : vector<8x32xf32>, vector<8x32xf32>, vector<8x8xf32> -> vector<8x8xf32>
    %c663 = arith.constant 663 : index
    %c0_251 = arith.constant 0 : index
    %493 = vector.load %arg2[%c663, %c0_251] : memref<680x128xf32, #tpu.memory_space<vmem>>, vector<1x8xf32>
    %494 = vector.broadcast %493 : vector<1x8xf32> to vector<8x8xf32>
    %495 = arith.addf %492, %494 : vector<8x8xf32>
    %cst_252 = arith.constant dense<0.000000e+00> : vector<8x8xf32>
    %496 = tpu.matmul %381, %486, %cst_252 {dimension_numbers = #tpu.dot_dimension_numbers<[1], [1], [0], [0], [0, 0, 1, 0], [], []>} : vector<8x32xf32>, vector<8x32xf32>, vector<8x8xf32> -> vector<8x8xf32>
    %c667 = arith.constant 667 : index
    %c0_253 = arith.constant 0 : index
    %497 = vector.load %arg2[%c667, %c0_253] : memref<680x128xf32, #tpu.memory_space<vmem>>, vector<1x8xf32>
    %498 = vector.broadcast %497 : vector<1x8xf32> to vector<8x8xf32>
    %499 = arith.addf %496, %498 : vector<8x8xf32>
    %cst_254 = arith.constant dense<0.000000e+00> : vector<8x8xf32>
    %500 = tpu.matmul %491, %495, %cst_254 {dimension_numbers = #tpu.dot_dimension_numbers<[1], [1], [0], [0], [0, 0, 1, 0], [], []>} : vector<8x8xf32>, vector<8x8xf32>, vector<8x8xf32> -> vector<8x8xf32>
    %cst_255 = arith.constant 0.353553385 : f32
    %501 = vector.broadcast %cst_255 : f32 to vector<8x8xf32>
    %502 = arith.mulf %500, %501 : vector<8x8xf32>
    %503 = vector.broadcast %382 : vector<1x8xf32> to vector<8x8xf32>
    %504 = arith.addf %502, %503 : vector<8x8xf32>
    %cst_256 = arith.constant dense<0xFF800000> : vector<8xf32>
    %505 = vector.multi_reduction <maximumf>, %504, %cst_256 [1] : vector<8x8xf32> to vector<8xf32>
    %506 = vector.shape_cast %505 : vector<8xf32> to vector<8x1xf32>
    %507 = vector.broadcast %506 : vector<8x1xf32> to vector<8x8xf32>
    %508 = arith.subf %504, %507 : vector<8x8xf32>
    %509 = math.exp %508 : vector<8x8xf32>
    %cst_257 = arith.constant dense<0.000000e+00> : vector<8xf32>
    %510 = vector.multi_reduction <add>, %509, %cst_257 [1] : vector<8x8xf32> to vector<8xf32>
    %511 = vector.shape_cast %510 : vector<8xf32> to vector<8x1xf32>
    %512 = tpu.reciprocal %511 {approx = true} : vector<8x1xf32> -> vector<8x1xf32>
    %513 = vector.broadcast %512 : vector<8x1xf32> to vector<8x8xf32>
    %514 = arith.mulf %509, %513 : vector<8x8xf32>
    %cst_258 = arith.constant dense<0.000000e+00> : vector<8x8xf32>
    %515 = tpu.matmul %514, %499, %cst_258 {dimension_numbers = #tpu.dot_dimension_numbers<[1], [0], [0], [1], [0, 0, 1, 1], [], []>} : vector<8x8xf32>, vector<8x8xf32>, vector<8x8xf32> -> vector<8x8xf32>
    %cst_259 = arith.constant dense<0.000000e+00> : vector<8x32xf32>
    %516 = tpu.matmul %515, %487, %cst_259 {dimension_numbers = #tpu.dot_dimension_numbers<[1], [0], [0], [1], [0, 0, 1, 1], [], []>} : vector<8x8xf32>, vector<8x32xf32>, vector<8x32xf32> -> vector<8x32xf32>
    %517 = arith.addf %483, %516 : vector<8x32xf32>
    %c668 = arith.constant 668 : index
    %c0_260 = arith.constant 0 : index
    %518 = vector.load %arg2[%c668, %c0_260] : memref<680x128xf32, #tpu.memory_space<vmem>>, vector<1x32xf32>
    %519 = vector.broadcast %518 : vector<1x32xf32> to vector<8x32xf32>
    %520 = arith.addf %517, %519 : vector<8x32xf32>
    %521 = vector.extract_strided_slice %380 {offsets = [8, 0], sizes = [8, 32], strides = [1, 1]} : vector<16x32xf32> to vector<8x32xf32>
    %522 = vector.extract_strided_slice %41 {offsets = [1, 0], sizes = [1, 8], strides = [1, 1]} : vector<2x8xf32> to vector<1x8xf32>
    %c432_261 = arith.constant 432 : index
    %c0_262 = arith.constant 0 : index
    %523 = vector.load %arg2[%c432_261, %c0_262] : memref<680x128xf32, #tpu.memory_space<vmem>>, vector<8x32xf32>
    %c464_263 = arith.constant 464 : index
    %c0_264 = arith.constant 0 : index
    %524 = vector.load %arg2[%c464_263, %c0_264] : memref<680x128xf32, #tpu.memory_space<vmem>>, vector<8x32xf32>
    %c496_265 = arith.constant 496 : index
    %c0_266 = arith.constant 0 : index
    %525 = vector.load %arg2[%c496_265, %c0_266] : memref<680x128xf32, #tpu.memory_space<vmem>>, vector<8x32xf32>
    %c528_267 = arith.constant 528 : index
    %c0_268 = arith.constant 0 : index
    %526 = vector.load %arg2[%c528_267, %c0_268] : memref<680x128xf32, #tpu.memory_space<vmem>>, vector<8x32xf32>
    %cst_269 = arith.constant dense<0.000000e+00> : vector<8x8xf32>
    %527 = tpu.matmul %521, %523, %cst_269 {dimension_numbers = #tpu.dot_dimension_numbers<[1], [1], [0], [0], [0, 0, 1, 0], [], []>} : vector<8x32xf32>, vector<8x32xf32>, vector<8x8xf32> -> vector<8x8xf32>
    %c656_270 = arith.constant 656 : index
    %c0_271 = arith.constant 0 : index
    %528 = vector.load %arg2[%c656_270, %c0_271] : memref<680x128xf32, #tpu.memory_space<vmem>>, vector<1x8xf32>
    %529 = vector.broadcast %528 : vector<1x8xf32> to vector<8x8xf32>
    %530 = arith.addf %527, %529 : vector<8x8xf32>
    %cst_272 = arith.constant dense<0.000000e+00> : vector<8x8xf32>
    %531 = tpu.matmul %521, %524, %cst_272 {dimension_numbers = #tpu.dot_dimension_numbers<[1], [1], [0], [0], [0, 0, 1, 0], [], []>} : vector<8x32xf32>, vector<8x32xf32>, vector<8x8xf32> -> vector<8x8xf32>
    %c660_273 = arith.constant 660 : index
    %c0_274 = arith.constant 0 : index
    %532 = vector.load %arg2[%c660_273, %c0_274] : memref<680x128xf32, #tpu.memory_space<vmem>>, vector<1x8xf32>
    %533 = vector.broadcast %532 : vector<1x8xf32> to vector<8x8xf32>
    %534 = arith.addf %531, %533 : vector<8x8xf32>
    %cst_275 = arith.constant dense<0.000000e+00> : vector<8x8xf32>
    %535 = tpu.matmul %521, %525, %cst_275 {dimension_numbers = #tpu.dot_dimension_numbers<[1], [1], [0], [0], [0, 0, 1, 0], [], []>} : vector<8x32xf32>, vector<8x32xf32>, vector<8x8xf32> -> vector<8x8xf32>
    %c664_276 = arith.constant 664 : index
    %c0_277 = arith.constant 0 : index
    %536 = vector.load %arg2[%c664_276, %c0_277] : memref<680x128xf32, #tpu.memory_space<vmem>>, vector<1x8xf32>
    %537 = vector.broadcast %536 : vector<1x8xf32> to vector<8x8xf32>
    %538 = arith.addf %535, %537 : vector<8x8xf32>
    %cst_278 = arith.constant dense<0.000000e+00> : vector<8x8xf32>
    %539 = tpu.matmul %530, %534, %cst_278 {dimension_numbers = #tpu.dot_dimension_numbers<[1], [1], [0], [0], [0, 0, 1, 0], [], []>} : vector<8x8xf32>, vector<8x8xf32>, vector<8x8xf32> -> vector<8x8xf32>
    %cst_279 = arith.constant 0.353553385 : f32
    %540 = vector.broadcast %cst_279 : f32 to vector<8x8xf32>
    %541 = arith.mulf %539, %540 : vector<8x8xf32>
    %542 = vector.broadcast %522 : vector<1x8xf32> to vector<8x8xf32>
    %543 = arith.addf %541, %542 : vector<8x8xf32>
    %cst_280 = arith.constant dense<0xFF800000> : vector<8xf32>
    %544 = vector.multi_reduction <maximumf>, %543, %cst_280 [1] : vector<8x8xf32> to vector<8xf32>
    %545 = vector.shape_cast %544 : vector<8xf32> to vector<8x1xf32>
    %546 = vector.broadcast %545 : vector<8x1xf32> to vector<8x8xf32>
    %547 = arith.subf %543, %546 : vector<8x8xf32>
    %548 = math.exp %547 : vector<8x8xf32>
    %cst_281 = arith.constant dense<0.000000e+00> : vector<8xf32>
    %549 = vector.multi_reduction <add>, %548, %cst_281 [1] : vector<8x8xf32> to vector<8xf32>
    %550 = vector.shape_cast %549 : vector<8xf32> to vector<8x1xf32>
    %551 = tpu.reciprocal %550 {approx = true} : vector<8x1xf32> -> vector<8x1xf32>
    %552 = vector.broadcast %551 : vector<8x1xf32> to vector<8x8xf32>
    %553 = arith.mulf %548, %552 : vector<8x8xf32>
    %cst_282 = arith.constant dense<0.000000e+00> : vector<8x8xf32>
    %554 = tpu.matmul %553, %538, %cst_282 {dimension_numbers = #tpu.dot_dimension_numbers<[1], [0], [0], [1], [0, 0, 1, 1], [], []>} : vector<8x8xf32>, vector<8x8xf32>, vector<8x8xf32> -> vector<8x8xf32>
    %cst_283 = arith.constant dense<0.000000e+00> : vector<8x32xf32>
    %555 = tpu.matmul %554, %526, %cst_283 {dimension_numbers = #tpu.dot_dimension_numbers<[1], [0], [0], [1], [0, 0, 1, 1], [], []>} : vector<8x8xf32>, vector<8x32xf32>, vector<8x32xf32> -> vector<8x32xf32>
    %c440_284 = arith.constant 440 : index
    %c0_285 = arith.constant 0 : index
    %556 = vector.load %arg2[%c440_284, %c0_285] : memref<680x128xf32, #tpu.memory_space<vmem>>, vector<8x32xf32>
    %c472_286 = arith.constant 472 : index
    %c0_287 = arith.constant 0 : index
    %557 = vector.load %arg2[%c472_286, %c0_287] : memref<680x128xf32, #tpu.memory_space<vmem>>, vector<8x32xf32>
    %c504_288 = arith.constant 504 : index
    %c0_289 = arith.constant 0 : index
    %558 = vector.load %arg2[%c504_288, %c0_289] : memref<680x128xf32, #tpu.memory_space<vmem>>, vector<8x32xf32>
    %c536_290 = arith.constant 536 : index
    %c0_291 = arith.constant 0 : index
    %559 = vector.load %arg2[%c536_290, %c0_291] : memref<680x128xf32, #tpu.memory_space<vmem>>, vector<8x32xf32>
    %cst_292 = arith.constant dense<0.000000e+00> : vector<8x8xf32>
    %560 = tpu.matmul %521, %556, %cst_292 {dimension_numbers = #tpu.dot_dimension_numbers<[1], [1], [0], [0], [0, 0, 1, 0], [], []>} : vector<8x32xf32>, vector<8x32xf32>, vector<8x8xf32> -> vector<8x8xf32>
    %c657_293 = arith.constant 657 : index
    %c0_294 = arith.constant 0 : index
    %561 = vector.load %arg2[%c657_293, %c0_294] : memref<680x128xf32, #tpu.memory_space<vmem>>, vector<1x8xf32>
    %562 = vector.broadcast %561 : vector<1x8xf32> to vector<8x8xf32>
    %563 = arith.addf %560, %562 : vector<8x8xf32>
    %cst_295 = arith.constant dense<0.000000e+00> : vector<8x8xf32>
    %564 = tpu.matmul %521, %557, %cst_295 {dimension_numbers = #tpu.dot_dimension_numbers<[1], [1], [0], [0], [0, 0, 1, 0], [], []>} : vector<8x32xf32>, vector<8x32xf32>, vector<8x8xf32> -> vector<8x8xf32>
    %c661_296 = arith.constant 661 : index
    %c0_297 = arith.constant 0 : index
    %565 = vector.load %arg2[%c661_296, %c0_297] : memref<680x128xf32, #tpu.memory_space<vmem>>, vector<1x8xf32>
    %566 = vector.broadcast %565 : vector<1x8xf32> to vector<8x8xf32>
    %567 = arith.addf %564, %566 : vector<8x8xf32>
    %cst_298 = arith.constant dense<0.000000e+00> : vector<8x8xf32>
    %568 = tpu.matmul %521, %558, %cst_298 {dimension_numbers = #tpu.dot_dimension_numbers<[1], [1], [0], [0], [0, 0, 1, 0], [], []>} : vector<8x32xf32>, vector<8x32xf32>, vector<8x8xf32> -> vector<8x8xf32>
    %c665_299 = arith.constant 665 : index
    %c0_300 = arith.constant 0 : index
    %569 = vector.load %arg2[%c665_299, %c0_300] : memref<680x128xf32, #tpu.memory_space<vmem>>, vector<1x8xf32>
    %570 = vector.broadcast %569 : vector<1x8xf32> to vector<8x8xf32>
    %571 = arith.addf %568, %570 : vector<8x8xf32>
    %cst_301 = arith.constant dense<0.000000e+00> : vector<8x8xf32>
    %572 = tpu.matmul %563, %567, %cst_301 {dimension_numbers = #tpu.dot_dimension_numbers<[1], [1], [0], [0], [0, 0, 1, 0], [], []>} : vector<8x8xf32>, vector<8x8xf32>, vector<8x8xf32> -> vector<8x8xf32>
    %cst_302 = arith.constant 0.353553385 : f32
    %573 = vector.broadcast %cst_302 : f32 to vector<8x8xf32>
    %574 = arith.mulf %572, %573 : vector<8x8xf32>
    %575 = vector.broadcast %522 : vector<1x8xf32> to vector<8x8xf32>
    %576 = arith.addf %574, %575 : vector<8x8xf32>
    %cst_303 = arith.constant dense<0xFF800000> : vector<8xf32>
    %577 = vector.multi_reduction <maximumf>, %576, %cst_303 [1] : vector<8x8xf32> to vector<8xf32>
    %578 = vector.shape_cast %577 : vector<8xf32> to vector<8x1xf32>
    %579 = vector.broadcast %578 : vector<8x1xf32> to vector<8x8xf32>
    %580 = arith.subf %576, %579 : vector<8x8xf32>
    %581 = math.exp %580 : vector<8x8xf32>
    %cst_304 = arith.constant dense<0.000000e+00> : vector<8xf32>
    %582 = vector.multi_reduction <add>, %581, %cst_304 [1] : vector<8x8xf32> to vector<8xf32>
    %583 = vector.shape_cast %582 : vector<8xf32> to vector<8x1xf32>
    %584 = tpu.reciprocal %583 {approx = true} : vector<8x1xf32> -> vector<8x1xf32>
    %585 = vector.broadcast %584 : vector<8x1xf32> to vector<8x8xf32>
    %586 = arith.mulf %581, %585 : vector<8x8xf32>
    %cst_305 = arith.constant dense<0.000000e+00> : vector<8x8xf32>
    %587 = tpu.matmul %586, %571, %cst_305 {dimension_numbers = #tpu.dot_dimension_numbers<[1], [0], [0], [1], [0, 0, 1, 1], [], []>} : vector<8x8xf32>, vector<8x8xf32>, vector<8x8xf32> -> vector<8x8xf32>
    %cst_306 = arith.constant dense<0.000000e+00> : vector<8x32xf32>
    %588 = tpu.matmul %587, %559, %cst_306 {dimension_numbers = #tpu.dot_dimension_numbers<[1], [0], [0], [1], [0, 0, 1, 1], [], []>} : vector<8x8xf32>, vector<8x32xf32>, vector<8x32xf32> -> vector<8x32xf32>
    %589 = arith.addf %555, %588 : vector<8x32xf32>
    %c448_307 = arith.constant 448 : index
    %c0_308 = arith.constant 0 : index
    %590 = vector.load %arg2[%c448_307, %c0_308] : memref<680x128xf32, #tpu.memory_space<vmem>>, vector<8x32xf32>
    %c480_309 = arith.constant 480 : index
    %c0_310 = arith.constant 0 : index
    %591 = vector.load %arg2[%c480_309, %c0_310] : memref<680x128xf32, #tpu.memory_space<vmem>>, vector<8x32xf32>
    %c512_311 = arith.constant 512 : index
    %c0_312 = arith.constant 0 : index
    %592 = vector.load %arg2[%c512_311, %c0_312] : memref<680x128xf32, #tpu.memory_space<vmem>>, vector<8x32xf32>
    %c544_313 = arith.constant 544 : index
    %c0_314 = arith.constant 0 : index
    %593 = vector.load %arg2[%c544_313, %c0_314] : memref<680x128xf32, #tpu.memory_space<vmem>>, vector<8x32xf32>
    %cst_315 = arith.constant dense<0.000000e+00> : vector<8x8xf32>
    %594 = tpu.matmul %521, %590, %cst_315 {dimension_numbers = #tpu.dot_dimension_numbers<[1], [1], [0], [0], [0, 0, 1, 0], [], []>} : vector<8x32xf32>, vector<8x32xf32>, vector<8x8xf32> -> vector<8x8xf32>
    %c658_316 = arith.constant 658 : index
    %c0_317 = arith.constant 0 : index
    %595 = vector.load %arg2[%c658_316, %c0_317] : memref<680x128xf32, #tpu.memory_space<vmem>>, vector<1x8xf32>
    %596 = vector.broadcast %595 : vector<1x8xf32> to vector<8x8xf32>
    %597 = arith.addf %594, %596 : vector<8x8xf32>
    %cst_318 = arith.constant dense<0.000000e+00> : vector<8x8xf32>
    %598 = tpu.matmul %521, %591, %cst_318 {dimension_numbers = #tpu.dot_dimension_numbers<[1], [1], [0], [0], [0, 0, 1, 0], [], []>} : vector<8x32xf32>, vector<8x32xf32>, vector<8x8xf32> -> vector<8x8xf32>
    %c662_319 = arith.constant 662 : index
    %c0_320 = arith.constant 0 : index
    %599 = vector.load %arg2[%c662_319, %c0_320] : memref<680x128xf32, #tpu.memory_space<vmem>>, vector<1x8xf32>
    %600 = vector.broadcast %599 : vector<1x8xf32> to vector<8x8xf32>
    %601 = arith.addf %598, %600 : vector<8x8xf32>
    %cst_321 = arith.constant dense<0.000000e+00> : vector<8x8xf32>
    %602 = tpu.matmul %521, %592, %cst_321 {dimension_numbers = #tpu.dot_dimension_numbers<[1], [1], [0], [0], [0, 0, 1, 0], [], []>} : vector<8x32xf32>, vector<8x32xf32>, vector<8x8xf32> -> vector<8x8xf32>
    %c666_322 = arith.constant 666 : index
    %c0_323 = arith.constant 0 : index
    %603 = vector.load %arg2[%c666_322, %c0_323] : memref<680x128xf32, #tpu.memory_space<vmem>>, vector<1x8xf32>
    %604 = vector.broadcast %603 : vector<1x8xf32> to vector<8x8xf32>
    %605 = arith.addf %602, %604 : vector<8x8xf32>
    %cst_324 = arith.constant dense<0.000000e+00> : vector<8x8xf32>
    %606 = tpu.matmul %597, %601, %cst_324 {dimension_numbers = #tpu.dot_dimension_numbers<[1], [1], [0], [0], [0, 0, 1, 0], [], []>} : vector<8x8xf32>, vector<8x8xf32>, vector<8x8xf32> -> vector<8x8xf32>
    %cst_325 = arith.constant 0.353553385 : f32
    %607 = vector.broadcast %cst_325 : f32 to vector<8x8xf32>
    %608 = arith.mulf %606, %607 : vector<8x8xf32>
    %609 = vector.broadcast %522 : vector<1x8xf32> to vector<8x8xf32>
    %610 = arith.addf %608, %609 : vector<8x8xf32>
    %cst_326 = arith.constant dense<0xFF800000> : vector<8xf32>
    %611 = vector.multi_reduction <maximumf>, %610, %cst_326 [1] : vector<8x8xf32> to vector<8xf32>
    %612 = vector.shape_cast %611 : vector<8xf32> to vector<8x1xf32>
    %613 = vector.broadcast %612 : vector<8x1xf32> to vector<8x8xf32>
    %614 = arith.subf %610, %613 : vector<8x8xf32>
    %615 = math.exp %614 : vector<8x8xf32>
    %cst_327 = arith.constant dense<0.000000e+00> : vector<8xf32>
    %616 = vector.multi_reduction <add>, %615, %cst_327 [1] : vector<8x8xf32> to vector<8xf32>
    %617 = vector.shape_cast %616 : vector<8xf32> to vector<8x1xf32>
    %618 = tpu.reciprocal %617 {approx = true} : vector<8x1xf32> -> vector<8x1xf32>
    %619 = vector.broadcast %618 : vector<8x1xf32> to vector<8x8xf32>
    %620 = arith.mulf %615, %619 : vector<8x8xf32>
    %cst_328 = arith.constant dense<0.000000e+00> : vector<8x8xf32>
    %621 = tpu.matmul %620, %605, %cst_328 {dimension_numbers = #tpu.dot_dimension_numbers<[1], [0], [0], [1], [0, 0, 1, 1], [], []>} : vector<8x8xf32>, vector<8x8xf32>, vector<8x8xf32> -> vector<8x8xf32>
    %cst_329 = arith.constant dense<0.000000e+00> : vector<8x32xf32>
    %622 = tpu.matmul %621, %593, %cst_329 {dimension_numbers = #tpu.dot_dimension_numbers<[1], [0], [0], [1], [0, 0, 1, 1], [], []>} : vector<8x8xf32>, vector<8x32xf32>, vector<8x32xf32> -> vector<8x32xf32>
    %623 = arith.addf %589, %622 : vector<8x32xf32>
    %c456_330 = arith.constant 456 : index
    %c0_331 = arith.constant 0 : index
    %624 = vector.load %arg2[%c456_330, %c0_331] : memref<680x128xf32, #tpu.memory_space<vmem>>, vector<8x32xf32>
    %c488_332 = arith.constant 488 : index
    %c0_333 = arith.constant 0 : index
    %625 = vector.load %arg2[%c488_332, %c0_333] : memref<680x128xf32, #tpu.memory_space<vmem>>, vector<8x32xf32>
    %c520_334 = arith.constant 520 : index
    %c0_335 = arith.constant 0 : index
    %626 = vector.load %arg2[%c520_334, %c0_335] : memref<680x128xf32, #tpu.memory_space<vmem>>, vector<8x32xf32>
    %c552_336 = arith.constant 552 : index
    %c0_337 = arith.constant 0 : index
    %627 = vector.load %arg2[%c552_336, %c0_337] : memref<680x128xf32, #tpu.memory_space<vmem>>, vector<8x32xf32>
    %cst_338 = arith.constant dense<0.000000e+00> : vector<8x8xf32>
    %628 = tpu.matmul %521, %624, %cst_338 {dimension_numbers = #tpu.dot_dimension_numbers<[1], [1], [0], [0], [0, 0, 1, 0], [], []>} : vector<8x32xf32>, vector<8x32xf32>, vector<8x8xf32> -> vector<8x8xf32>
    %c659_339 = arith.constant 659 : index
    %c0_340 = arith.constant 0 : index
    %629 = vector.load %arg2[%c659_339, %c0_340] : memref<680x128xf32, #tpu.memory_space<vmem>>, vector<1x8xf32>
    %630 = vector.broadcast %629 : vector<1x8xf32> to vector<8x8xf32>
    %631 = arith.addf %628, %630 : vector<8x8xf32>
    %cst_341 = arith.constant dense<0.000000e+00> : vector<8x8xf32>
    %632 = tpu.matmul %521, %625, %cst_341 {dimension_numbers = #tpu.dot_dimension_numbers<[1], [1], [0], [0], [0, 0, 1, 0], [], []>} : vector<8x32xf32>, vector<8x32xf32>, vector<8x8xf32> -> vector<8x8xf32>
    %c663_342 = arith.constant 663 : index
    %c0_343 = arith.constant 0 : index
    %633 = vector.load %arg2[%c663_342, %c0_343] : memref<680x128xf32, #tpu.memory_space<vmem>>, vector<1x8xf32>
    %634 = vector.broadcast %633 : vector<1x8xf32> to vector<8x8xf32>
    %635 = arith.addf %632, %634 : vector<8x8xf32>
    %cst_344 = arith.constant dense<0.000000e+00> : vector<8x8xf32>
    %636 = tpu.matmul %521, %626, %cst_344 {dimension_numbers = #tpu.dot_dimension_numbers<[1], [1], [0], [0], [0, 0, 1, 0], [], []>} : vector<8x32xf32>, vector<8x32xf32>, vector<8x8xf32> -> vector<8x8xf32>
    %c667_345 = arith.constant 667 : index
    %c0_346 = arith.constant 0 : index
    %637 = vector.load %arg2[%c667_345, %c0_346] : memref<680x128xf32, #tpu.memory_space<vmem>>, vector<1x8xf32>
    %638 = vector.broadcast %637 : vector<1x8xf32> to vector<8x8xf32>
    %639 = arith.addf %636, %638 : vector<8x8xf32>
    %cst_347 = arith.constant dense<0.000000e+00> : vector<8x8xf32>
    %640 = tpu.matmul %631, %635, %cst_347 {dimension_numbers = #tpu.dot_dimension_numbers<[1], [1], [0], [0], [0, 0, 1, 0], [], []>} : vector<8x8xf32>, vector<8x8xf32>, vector<8x8xf32> -> vector<8x8xf32>
    %cst_348 = arith.constant 0.353553385 : f32
    %641 = vector.broadcast %cst_348 : f32 to vector<8x8xf32>
    %642 = arith.mulf %640, %641 : vector<8x8xf32>
    %643 = vector.broadcast %522 : vector<1x8xf32> to vector<8x8xf32>
    %644 = arith.addf %642, %643 : vector<8x8xf32>
    %cst_349 = arith.constant dense<0xFF800000> : vector<8xf32>
    %645 = vector.multi_reduction <maximumf>, %644, %cst_349 [1] : vector<8x8xf32> to vector<8xf32>
    %646 = vector.shape_cast %645 : vector<8xf32> to vector<8x1xf32>
    %647 = vector.broadcast %646 : vector<8x1xf32> to vector<8x8xf32>
    %648 = arith.subf %644, %647 : vector<8x8xf32>
    %649 = math.exp %648 : vector<8x8xf32>
    %cst_350 = arith.constant dense<0.000000e+00> : vector<8xf32>
    %650 = vector.multi_reduction <add>, %649, %cst_350 [1] : vector<8x8xf32> to vector<8xf32>
    %651 = vector.shape_cast %650 : vector<8xf32> to vector<8x1xf32>
    %652 = tpu.reciprocal %651 {approx = true} : vector<8x1xf32> -> vector<8x1xf32>
    %653 = vector.broadcast %652 : vector<8x1xf32> to vector<8x8xf32>
    %654 = arith.mulf %649, %653 : vector<8x8xf32>
    %cst_351 = arith.constant dense<0.000000e+00> : vector<8x8xf32>
    %655 = tpu.matmul %654, %639, %cst_351 {dimension_numbers = #tpu.dot_dimension_numbers<[1], [0], [0], [1], [0, 0, 1, 1], [], []>} : vector<8x8xf32>, vector<8x8xf32>, vector<8x8xf32> -> vector<8x8xf32>
    %cst_352 = arith.constant dense<0.000000e+00> : vector<8x32xf32>
    %656 = tpu.matmul %655, %627, %cst_352 {dimension_numbers = #tpu.dot_dimension_numbers<[1], [0], [0], [1], [0, 0, 1, 1], [], []>} : vector<8x8xf32>, vector<8x32xf32>, vector<8x32xf32> -> vector<8x32xf32>
    %657 = arith.addf %623, %656 : vector<8x32xf32>
    %c668_353 = arith.constant 668 : index
    %c0_354 = arith.constant 0 : index
    %658 = vector.load %arg2[%c668_353, %c0_354] : memref<680x128xf32, #tpu.memory_space<vmem>>, vector<1x32xf32>
    %659 = vector.broadcast %658 : vector<1x32xf32> to vector<8x32xf32>
    %660 = arith.addf %657, %659 : vector<8x32xf32>
    %661 = tpu.concatenate %520, %660 in 0 : vector<8x32xf32>, vector<8x32xf32> -> vector<16x32xf32>
    %662 = arith.addf %661, %380 : vector<16x32xf32>
    %cst_355 = arith.constant dense<0.000000e+00> : vector<16xf32>
    %663 = vector.multi_reduction <add>, %662, %cst_355 [1] : vector<16x32xf32> to vector<16xf32>
    %664 = vector.shape_cast %663 : vector<16xf32> to vector<16x1xf32>
    %cst_356 = arith.constant 3.200000e+01 : f32
    %665 = vector.broadcast %cst_356 : f32 to vector<16x1xf32>
    %666 = arith.divf %664, %665 : vector<16x1xf32>
    %667 = vector.broadcast %666 : vector<16x1xf32> to vector<16x32xf32>
    %668 = arith.subf %662, %667 : vector<16x32xf32>
    %669 = arith.mulf %668, %668 : vector<16x32xf32>
    %cst_357 = arith.constant dense<0.000000e+00> : vector<16xf32>
    %670 = vector.multi_reduction <add>, %669, %cst_357 [1] : vector<16x32xf32> to vector<16xf32>
    %671 = vector.shape_cast %670 : vector<16xf32> to vector<16x1xf32>
    %cst_358 = arith.constant 3.200000e+01 : f32
    %672 = vector.broadcast %cst_358 : f32 to vector<16x1xf32>
    %673 = arith.divf %671, %672 : vector<16x1xf32>
    %cst_359 = arith.constant 9.99999974E-6 : f32
    %674 = vector.broadcast %cst_359 : f32 to vector<16x1xf32>
    %675 = arith.addf %673, %674 : vector<16x1xf32>
    %676 = math.rsqrt %675 : vector<16x1xf32>
    %677 = vector.broadcast %676 : vector<16x1xf32> to vector<16x32xf32>
    %678 = arith.mulf %668, %677 : vector<16x32xf32>
    %c669 = arith.constant 669 : index
    %c0_360 = arith.constant 0 : index
    %679 = vector.load %arg2[%c669, %c0_360] : memref<680x128xf32, #tpu.memory_space<vmem>>, vector<1x32xf32>
    %680 = vector.broadcast %679 : vector<1x32xf32> to vector<16x32xf32>
    %681 = arith.mulf %678, %680 : vector<16x32xf32>
    %c670 = arith.constant 670 : index
    %c0_361 = arith.constant 0 : index
    %682 = vector.load %arg2[%c670, %c0_361] : memref<680x128xf32, #tpu.memory_space<vmem>>, vector<1x32xf32>
    %683 = vector.broadcast %682 : vector<1x32xf32> to vector<16x32xf32>
    %684 = arith.addf %681, %683 : vector<16x32xf32>
    %c560 = arith.constant 560 : index
    %c0_362 = arith.constant 0 : index
    %685 = vector.load %arg2[%c560, %c0_362] : memref<680x128xf32, #tpu.memory_space<vmem>>, vector<32x64xf32>
    %cst_363 = arith.constant dense<0.000000e+00> : vector<16x64xf32>
    %686 = tpu.matmul %684, %685, %cst_363 {dimension_numbers = #tpu.dot_dimension_numbers<[1], [0], [0], [1], [0, 0, 1, 1], [], []>} : vector<16x32xf32>, vector<32x64xf32>, vector<16x64xf32> -> vector<16x64xf32>
    %c671 = arith.constant 671 : index
    %c0_364 = arith.constant 0 : index
    %687 = vector.load %arg2[%c671, %c0_364] : memref<680x128xf32, #tpu.memory_space<vmem>>, vector<1x64xf32>
    %688 = vector.broadcast %687 : vector<1x64xf32> to vector<16x64xf32>
    %689 = arith.addf %686, %688 : vector<16x64xf32>
    %cst_365 = arith.constant 0.000000e+00 : f32
    %690 = vector.broadcast %cst_365 : f32 to vector<16x64xf32>
    %691 = arith.maximumf %689, %690 : vector<16x64xf32>
    %c592 = arith.constant 592 : index
    %c0_366 = arith.constant 0 : index
    %692 = vector.load %arg2[%c592, %c0_366] : memref<680x128xf32, #tpu.memory_space<vmem>>, vector<64x32xf32>
    %cst_367 = arith.constant dense<0.000000e+00> : vector<16x32xf32>
    %693 = tpu.matmul %691, %692, %cst_367 {dimension_numbers = #tpu.dot_dimension_numbers<[1], [0], [0], [1], [0, 0, 1, 1], [], []>} : vector<16x64xf32>, vector<64x32xf32>, vector<16x32xf32> -> vector<16x32xf32>
    %c672 = arith.constant 672 : index
    %c0_368 = arith.constant 0 : index
    %694 = vector.load %arg2[%c672, %c0_368] : memref<680x128xf32, #tpu.memory_space<vmem>>, vector<1x32xf32>
    %695 = vector.broadcast %694 : vector<1x32xf32> to vector<16x32xf32>
    %696 = arith.addf %693, %695 : vector<16x32xf32>
    %697 = arith.addf %696, %684 : vector<16x32xf32>
    %cst_369 = arith.constant dense<0.000000e+00> : vector<16xf32>
    %698 = vector.multi_reduction <add>, %697, %cst_369 [1] : vector<16x32xf32> to vector<16xf32>
    %699 = vector.shape_cast %698 : vector<16xf32> to vector<16x1xf32>
    %cst_370 = arith.constant 3.200000e+01 : f32
    %700 = vector.broadcast %cst_370 : f32 to vector<16x1xf32>
    %701 = arith.divf %699, %700 : vector<16x1xf32>
    %702 = vector.broadcast %701 : vector<16x1xf32> to vector<16x32xf32>
    %703 = arith.subf %697, %702 : vector<16x32xf32>
    %704 = arith.mulf %703, %703 : vector<16x32xf32>
    %cst_371 = arith.constant dense<0.000000e+00> : vector<16xf32>
    %705 = vector.multi_reduction <add>, %704, %cst_371 [1] : vector<16x32xf32> to vector<16xf32>
    %706 = vector.shape_cast %705 : vector<16xf32> to vector<16x1xf32>
    %cst_372 = arith.constant 3.200000e+01 : f32
    %707 = vector.broadcast %cst_372 : f32 to vector<16x1xf32>
    %708 = arith.divf %706, %707 : vector<16x1xf32>
    %cst_373 = arith.constant 9.99999974E-6 : f32
    %709 = vector.broadcast %cst_373 : f32 to vector<16x1xf32>
    %710 = arith.addf %708, %709 : vector<16x1xf32>
    %711 = math.rsqrt %710 : vector<16x1xf32>
    %712 = vector.broadcast %711 : vector<16x1xf32> to vector<16x32xf32>
    %713 = arith.mulf %703, %712 : vector<16x32xf32>
    %c673 = arith.constant 673 : index
    %c0_374 = arith.constant 0 : index
    %714 = vector.load %arg2[%c673, %c0_374] : memref<680x128xf32, #tpu.memory_space<vmem>>, vector<1x32xf32>
    %715 = vector.broadcast %714 : vector<1x32xf32> to vector<16x32xf32>
    %716 = arith.mulf %713, %715 : vector<16x32xf32>
    %c674 = arith.constant 674 : index
    %c0_375 = arith.constant 0 : index
    %717 = vector.load %arg2[%c674, %c0_375] : memref<680x128xf32, #tpu.memory_space<vmem>>, vector<1x32xf32>
    %718 = vector.broadcast %717 : vector<1x32xf32> to vector<16x32xf32>
    %719 = arith.addf %716, %718 : vector<16x32xf32>
    %720 = vector.extract_strided_slice %719 {offsets = [0, 0], sizes = [1, 32], strides = [1, 1]} : vector<16x32xf32> to vector<1x32xf32>
    %721 = vector.extract_strided_slice %719 {offsets = [8, 0], sizes = [1, 32], strides = [1, 1]} : vector<16x32xf32> to vector<1x32xf32>
    %722 = tpu.concatenate %720, %721 in 0 : vector<1x32xf32>, vector<1x32xf32> -> vector<2x32xf32>
    %c120 = arith.constant 120 : index
    %c0_376 = arith.constant 0 : index
    %723 = vector.load %arg2[%c120, %c0_376] : memref<680x128xf32, #tpu.memory_space<vmem>>, vector<32x32xf32>
    %cst_377 = arith.constant dense<0.000000e+00> : vector<2x32xf32>
    %724 = tpu.matmul %722, %723, %cst_377 {dimension_numbers = #tpu.dot_dimension_numbers<[1], [0], [0], [1], [0, 0, 1, 1], [], []>} : vector<2x32xf32>, vector<32x32xf32>, vector<2x32xf32> -> vector<2x32xf32>
    %c115 = arith.constant 115 : index
    %c0_378 = arith.constant 0 : index
    %725 = vector.load %arg2[%c115, %c0_378] : memref<680x128xf32, #tpu.memory_space<vmem>>, vector<1x32xf32>
    %726 = vector.broadcast %725 : vector<1x32xf32> to vector<2x32xf32>
    %727 = arith.addf %724, %726 : vector<2x32xf32>
    %728 = math.tanh %727 : vector<2x32xf32>
    %c152 = arith.constant 152 : index
    %c0_379 = arith.constant 0 : index
    %729 = vector.load %arg2[%c152, %c0_379] : memref<680x128xf32, #tpu.memory_space<vmem>>, vector<32x3xf32>
    %cst_380 = arith.constant dense<0.000000e+00> : vector<2x3xf32>
    %730 = tpu.matmul %728, %729, %cst_380 {dimension_numbers = #tpu.dot_dimension_numbers<[1], [0], [0], [1], [0, 0, 1, 1], [], []>} : vector<2x32xf32>, vector<32x3xf32>, vector<2x3xf32> -> vector<2x3xf32>
    %c116 = arith.constant 116 : index
    %c0_381 = arith.constant 0 : index
    %731 = vector.load %arg2[%c116, %c0_381] : memref<680x128xf32, #tpu.memory_space<vmem>>, vector<1x3xf32>
    %732 = vector.broadcast %731 : vector<1x3xf32> to vector<2x3xf32>
    %733 = arith.addf %730, %732 : vector<2x3xf32>
    %c0_382 = arith.constant 0 : index
    %c0_383 = arith.constant 0 : index
    %734 = vector.load %arg3[%c0_382, %c0_383] : memref<2x3xf32, #tpu.memory_space<vmem>>, vector<2x3xf32>
    tpu.vector_store %arg3[%c0_382, %c0_383], %733 {strides = array<i32>} : memref<2x3xf32, #tpu.memory_space<vmem>>, vector<2x3xf32>,
    return
  }
}

</mosaic_0001>

<bundles_post_ra>
// kernel: tpu_custom_call.1
= control target key start
LH: loop header
LB: loop body
LE: loop exit
PB: predicated region body
PF: predicated region fallthrough
CT: control target
= control target key end

     0   :  { %8 = vsyncpa [#allocation3], 0  ;;  %s10540_s0 = inlined_call_operand.vmem [shape: s32[16,1], index: 0, kind: input, shape index: {}]   ;;  %s10541_s1 = inlined_call_operand.vmem [shape: s32[2,8], index: 1, kind: input, shape index: {}]   ;;  %s10542_s2 = inlined_call_operand.hbm [shape: f32[680,128], index: 2, kind: input, shape index: {}]   ;;  %s10543_s3 = inlined_call_operand.hbm [shape: f32[2,3], index: 3, kind: output, shape index: {}]  }
   0x1   :  { %9 = vsyncpa [#allocation4], 0  ;;  %s9597_s12 = smov [#allocation2]   ;;  %s9549_s16 = scalar_lea.hbm %s10542_s2, 10880 }
   0x2   :  { %s19_s13 = sshll.u32 %s9597_s12, 4  ;;  %p9550_p0 = scmp.ne.s32.totalorder %s10542_s2, %s9549_s16  ;;  %s20_s13 = int_to_ptr.vmem [resolvable:$true] %s19_s13 }
   0x3   :  { %p9553_p1 = scmp.lt.u32.totalorder %s9549_s16, %s10542_s2 }
   0x5   :  { %p9555_p2 = pnand %p9553_p1, %p9550_p0 }
   0x7   :  { %9558 = shalt.err (!%p9555_p2)
}
   0x8   :  { %s9559_s21 = scalar_lea.vmem %s20_s13, 10880  ;;  %p9564_p4 = scmp.lt.s32.totalorder %s20_s13, %s20_s13 }
   0x9   :  { %p9560_p3 = scmp.ne.s32.totalorder %s20_s13, %s9559_s21  ;;  %p9565_p5 = scmp.lt.s32.totalorder %s9559_s21, %s9559_s21 }
   0xb   :  { %p9566_p6 = por %p9565_p5, %p9564_p4 }
   0xd   :  { %p9567_p7 = pnand %p9566_p6, %p9560_p3 }
   0xf   :  { %9570 = shalt.err (!%p9567_p7)
}
  0x10   :  { %s9598_s22 = smov 128   ;;  %s9599_s23 = smov 8  }
  0x11   :  { %25 = dma.hbm_to_vmem [thread:$0]  %s10542_s2, 10880, %s20_s13, [#allocation3], %s9598_s22, %s9598_s22, %s9599_s23  }
  0x12   :  { %9593 = dma.done.wait [#allocation3], 10880  }
  0x13   :  { %9594 = vsyncadd [#allocation3], 4294956416  ;;  %v9600_v0 = vmov 0   ;;  %v9601_v1 = vmov 0.0   ;;  %v31_v2 = vlaneseq  ;;  %v29_v3 = vld [vmem:[%s10540_s0] sm:$0xff]  ;;  %v45_v4 = vld [vmem:[#allocation2] sm:$0xff] }
  0x14   :  { %9462 = vset.pattern.permute.xlu0 %v9600_v0  ;;  %8813 = vmatprep.subr.mxu1 %v9601_v1  ;;  %v46_v5 = vld [vmem:[#allocation2 + $0x8] sm:$0xff]  ;;  %v47_v6 = vld [vmem:[#allocation2 + $0x10] sm:$0xff]  ;;  %v48_v7 = vld [vmem:[#allocation2 + $0x18] sm:$0xff]  ;;  %vm66_vm1 = vcmask 1043456   ;;  %vm59_vm2 = vcmask 818176   ;;  %vm152_vm5 = vcmask 261120  }
  0x15   :  { %34 = vperm.xlu0 %9462, %v29_v3   ;;  %v9641_v8 = vshrl.u32 %v31_v2, 7  ;;  %v30_v9 = vld [vmem:[%s10540_s0 + $0x8] sm:$0xff]  ;;  %v9370_v10 = vpack.c.bf16 %v46_v5, %v45_v4  ;;  %v9374_v11 = vpack.c.bf16 %v48_v7, %v47_v6  ;;  %v49_v12 = vld [vmem:[#allocation2 + $0x20] sm:$0xff]  ;;  %v50_v13 = vld [vmem:[#allocation2 + $0x28] sm:$0xff]  ;;  %v32_v29 = vand.u32 127, %v31_v2  ;;  %s9604_s0 = smov [#allocation5]  }
  0x16   :  { %v194_v15 = vld [vmem:[%s10541_s1] sm:$0x3]  ;;  %v9378_v16 = vpack.c.bf16 %v50_v13, %v49_v12  ;;  %v51_v18 = vld [vmem:[#allocation2 + $0x30] sm:$0xff]  ;;  %v52_v19 = vld [vmem:[#allocation2 + $0x38] sm:$0xff]  ;;  %vm9602_vm6 = vmmov 0   ;;  %vm438_vm7 = vcmask 64512  }
  0x17   :  { %v2397_v14 = vsub.s32 1, %v9641_v8  ;;  %9371 = vmatprep.subr.bf16.mxu0 %v9370_v10  ;;  %vm195_vm0 = vcmp.eq.s32.totalorder %v194_v15, 0  ;;  %v9382_v21 = vpack.c.bf16 %v52_v19, %v51_v18  ;;  %v53_v22 = vld [vmem:[#allocation2 + $0x40] sm:$0xff]  ;;  %v54_v23 = vld [vmem:[#allocation2 + $0x48] sm:$0xff]  ;;  %v55_v25 = vld [vmem:[#allocation2 + $0x50] sm:$0xff]  ;;  %8815 = vmatprep.mubr.msk.f32.mxu1 %vm9602_vm6, %v9601_v1  ;;  %v518_v15 = vsub.s32 0, %v9641_v8 }
  0x18   :  { %9373 = vmatpush3.bf16.msra.mxu0 %v9370_v10  ;;  %v9651_v17 = vsel %vm195_vm0, -10000.0, %v9601_v1  ;;  %v9386_v24 = vpack.c.bf16 %v54_v23, %v53_v22  ;;  %v56_v26 = vld [vmem:[#allocation2 + $0x58] sm:$0xff]  ;;  %v57_v28 = vld [vmem:[#allocation2 + $0x60] sm:$0xf]  ;;  %v58_v34 = vld [vmem:[#allocation2 + $0x68] sm:$0xff]  ;;  %vm4042_vm8 = vcmask 523264  }
  0x19   :  { %37 = vperm.xlu0 %9462, %v30_v9   ;;  %9375 = vmatprep.subr.bf16.mxu0 %v9374_v11  ;;  %v9654_v20 = vrot.slane %v9651_v17, %v2397_v14  ;;  %v9390_v27 = vpack.c.bf16 %v56_v26, %v55_v25  ;;  %v8317_v36 = vld [vmem:[#allocation2 + $0x70] ss:$0 sm:$0xff]  ;;  %v9663_v48 = vld [vmem:[#allocation2 + $0xb8] sm:$0xff]  ;;  %v9677_v54 = vld [vmem:[#allocation2 + $0x71] ss:$0 sm:$0xff]  ;;  %vm8128_vm9 = vcmask 1040384  }
  0x1a   :  { %v9665_v49 = vld [vmem:[#allocation2 + $0xd8] sm:$0xff]  ;;  %v9679_v56 = vld [vmem:[#allocation2 + $0x72] ss:$0 sm:$0xff]  ;;  %v9687_v60 = vld [vmem:[#allocation2 + $0x100] sm:$0xff]  ;;  %s8303_s1 = sshll.u32 %s9604_s0, 4  ;;  %vm8295_vm10 = vcmask 17408   ;;  %s8304_s1 = int_to_ptr.vmem [resolvable:$true] %s8303_s1 }
  0x1b   :  { %8814 = vmatpush3.xpose.msk.msra.mxu1 %vm152_vm5, %v9665_v49  ;;  %v9685_v59 = vld [vmem:[#allocation2 + $0xf8] sm:$0xff]  ;;  %v9716_v5 = vld [vmem:[#allocation2 + $0x1a0] ss:$0 sm:$0xff]  ;;  %v9718_v6 = vld [vmem:[#allocation2 + $0x1a1] ss:$0 sm:$0xff]  ;;  %s9571_s4 = scalar_lea.vmem %s8304_s1, 32  ;;  %p9576_p9 = scmp.lt.s32.totalorder %s8304_s1, %s8304_s1 }
  0x1c   :  { %9377 = vmatpush3.bf16.msra.mxu0 %v9374_v11  ;;  %8818 = vmatprep.subr.mxu1 %v9601_v1  ;;  %v9711_v61 = vld [vmem:[#allocation2 + $0x19c] ss:$0 sm:$0xff]  ;;  %v9713_v0 = vld [vmem:[#allocation2 + $0x198] ss:$0 sm:$0xff]  ;;  %p9572_p8 = scmp.ne.s32.totalorder %s8304_s1, %s9571_s4  ;;  %p9577_p10 = scmp.lt.s32.totalorder %s9571_s4, %s9571_s4 }
  0x1d   :  { %9379 = vmatprep.subr.bf16.mxu0 %v9378_v16 }
  0x1e   :  { %p9578_p11 = por %p9577_p10, %p9576_p9 }
  0x20   :  { %9381 = vmatpush3.bf16.msra.mxu0 %v9378_v16  ;;  %v9732_v16 = vrot.slane %v9651_v17, %v518_v15  ;;  %p9579_p12 = pnand %p9578_p11, %p9572_p8 }
  0x21   :  { %9383 = vmatprep.subr.bf16.mxu0 %v9382_v21 }
  0x24   :  { %9385 = vmatpush3.bf16.msra.mxu0 %v9382_v21 }
  0x25   :  { %9387 = vmatprep.subr.bf16.mxu0 %v9386_v24 }
  0x28   :  { %9389 = vmatpush3.bf16.msra.mxu0 %v9386_v24 }
  0x29   :  { %9391 = vmatprep.subr.bf16.mxu0 %v9390_v27 }
  0x2c   :  { %9393 = vmatpush3.bf16.msra.mxu0 %v9390_v27 }
  0x2d   :  { %8803 = vmatprep.subr.msk.mxu0 %vm66_vm1, %v57_v28 }
  0x30   :  { %8804 = vmatpush3.msk.msra.mxu0 %vm66_vm1, %v57_v28 }
  0x31   :  { %8808 = vmatprep.subr.mxu0 %v9601_v1 }
  0x94   :  { %v35_v30 = vpop.permute.xlu0 %34 }
  0x95   :  { %vm39_vm3 = vcmp.eq.s32.totalorder %v32_v29, %v35_v30  ;;  %v9737_v30 = vld [vmem:[#allocation2 + $0xc0] sm:$0xff] }
  0x96   :  { %v8312_v31 = vsel %vm39_vm3, 1.0, %v9601_v1 }
  0x97   :  { %8805 = vmatprep.mubr.msk.f32.mxu0 %vm59_vm2, %v8312_v31  ;;  %v9745_v31 = vld [vmem:[#allocation2 + $0xe0] sm:$0xff] }
  0x98   :  { %v38_v32 = vpop.permute.xlu0 %37 }
  0x99   :  { %vm40_vm4 = vcmp.eq.s32.totalorder %v32_v29, %v38_v32 }
  0x9a   :  { %v8313_v33 = vsel %vm40_vm4, 1.0, %v9601_v1 }
  0x9b   :  { %8806 = vmatmul.mubr.msk.f32.vlgmr.msra.gmra.mrb[0].mxu0 %vm59_vm2, %v8313_v33 }
  0x9c   :  { %8809 = vmatpush3.xpose.msk.msra.mxu0 %vm152_vm5, %v9663_v48  ;;  %8810 = vmatprep.mubr.msk.f32.mxu0 %vm9602_vm6, %v9601_v1 }
  0x9d   :  { %8843 = vmatprep.subr.mxu0 %v9601_v1 }
 0x16e   :  { %v8807_v35 = vpop.f32.mrb[0].mxu0 }
 0x16f   :  { %v142_v37 = vadd.f32 %v8807_v35, %v58_v34  ;;  %v136_v38 = vpop.f32.mrb[1].mxu0 }
 0x170   :  { %v137_v39 = vadd.f32 %v136_v38, %v58_v34  ;;  %v9760_v38 = vld [vmem:[#allocation2 + $0x199] ss:$0 sm:$0xff] }
 0x171   :  { %v9659_v40 = vadd.f32 %v8317_v36, %v142_v37 }
 0x172   :  { %v150_v41 = vadd.f32 %v8317_v36, %v137_v39  ;;  %v9758_v36 = vld [vmem:[#allocation2 + $0x19d] ss:$0 sm:$0xff] }
 0x174   :  { %v153_v42 = vsel %vm152_vm5, %v150_v41, 0.0 }
 0x175   :  { %154 = vadd.xlane.f32.xlu1 %v153_v42 }
 0x202   :  { %v155_v43 = vpop.xlane.xlu1 %154 }
 0x203   :  { %v160_v44 = vmul.f32 0.03125, %v155_v43 }
 0x205   :  { %v162_v45 = vsub.f32 %v150_v41, %v160_v44 }
 0x207   :  { %v164_v46 = vmul.f32 %v162_v45, %v162_v45 }
 0x209   :  { %v166_v47 = vsel %vm152_vm5, %v164_v46, 0.0 }
 0x20a   :  { %167 = vadd.xlane.f32.xlu1 %v166_v47 }
 0x297   :  { %v168_v50 = vpop.xlane.xlu1 %167 }
 0x298   :  { %v172_v51 = vmul.f32 0.03125, %v168_v50 }
 0x29a   :  { %v174_v52 = vadd.f32 1e-05, %v172_v51 }
 0x29c   :  { %9463 = vrsqrt.f32 %v174_v52 }
 0x2a6   :  { %v9464_v53 = vpop.eup %9463 }
 0x2a7   :  { %v178_v55 = vmul.f32 %v9464_v53, %v162_v45 }
 0x2a9   :  { %v185_v57 = vmul.f32 %v9677_v54, %v178_v55 }
 0x2ab   :  { %v9683_v58 = vadd.f32 %v9679_v56, %v185_v57  ;;  %v9772_v57 = vld [vmem:[#allocation2 + $0x120] sm:$0xff] }
 0x2ad   :  { %8811 = vmatmul.mubr.msk.f32.vlgmr.msra.gmra.mrb[2].mxu0 %vm152_vm5, %v9683_v58  ;;  %8816 = vmatmul.mubr.msk.f32.vlgmr.msra.gmra.mrb[0].mxu1 %vm152_vm5, %v9683_v58 }
 0x2ae   :  { %8819 = vmatpush3.xpose.msk.msra.mxu1 %vm152_vm5, %v9685_v59  ;;  %8844 = vmatpush3.xpose.msk.msra.mxu0 %vm152_vm5, %v9687_v60 }
 0x2af   :  { %8820 = vmatprep.mubr.msk.f32.mxu1 %vm9602_vm6, %v9601_v1  ;;  %8845 = vmatprep.mubr.msk.f32.mxu0 %vm9602_vm6, %v9601_v1 }
 0x2b0   :  { %8823 = vmatprep.subr.mxu1 %v9601_v1  ;;  %8853 = vmatprep.subr.mxu0 %v9601_v1 }
 0x2b1   :  { %8821 = vmatmul.mubr.msk.f32.vlgmr.msra.gmra.mrb[2].mxu1 %vm152_vm5, %v9683_v58  ;;  %8846 = vmatmul.mubr.msk.f32.vlgmr.msra.gmra.mrb[4].mxu0 %vm152_vm5, %v9683_v58 }
 0x2b2   :  { %8825 = vmatprep.mubr.msk.f32.mxu1 %vm9602_vm6, %v9601_v1  ;;  %8855 = vmatprep.mubr.msk.f32.mxu0 %vm9602_vm6, %v9601_v1 }
 0x380   :  { %v278_v62 = vpop.f32.mrb[2].mxu0  ;;  %v356_v63 = vpop.f32.mrb[0].mxu1 }
 0x381   :  { %v357_v2 = vadd.f32 %v9711_v61, %v356_v63  ;;  %v8812_v3 = vpop.f32.mrb[3].mxu0  ;;  %v8817_v4 = vpop.f32.mrb[1].mxu1  ;;  %v279_v7 = vadd.f32 %v9713_v0, %v278_v62 }
 0x382   :  { %v9776_v3 = vld [vmem:[#allocation2 + $0x118] sm:$0xff]  ;;  %v9784_v4 = vld [vmem:[#allocation2 + $0xe8] sm:$0xff] }
 0x383   :  { %8824 = vmatpush3.xpose.msk.msra.mxu1 %vm438_vm7, %v357_v2 }
 0x384   :  { %v434_v9 = vpop.f32.mrb[2].mxu1  ;;  %v839_v10 = vpop.f32.mrb[4].mxu0  ;;  %8828 = vmatprep.subr.mxu1 %v9601_v1 }
 0x385   :  { %v435_v11 = vadd.f32 %v9716_v5, %v434_v9  ;;  %v840_v12 = vadd.f32 %v9718_v6, %v839_v10  ;;  %v8822_v13 = vpop.f32.mrb[3].mxu1  ;;  %v8847_v14 = vpop.f32.mrb[5].mxu0 }
 0x386   :  { %8826 = vmatmul.mubr.msk.f32.vlgmr.msra.gmra.mrb[4].mxu1 %vm438_vm7, %v279_v7  ;;  %v9795_v7 = vld [vmem:[#allocation2 + $0xc8] sm:$0xff]  ;;  %v9814_v14 = vld [vmem:[#allocation2 + $0x19e] ss:$0 sm:$0xff] }
 0x387   :  { %8829 = vmatpush3.msra.mxu1 %v435_v11  ;;  %8854 = vmatpush3.msra.mxu0 %v840_v12  ;;  %v9803_v11 = vld [vmem:[#allocation2 + $0x108] sm:$0xff] }
 0x388   :  { %8830 = vmatprep.mubr.msk.f32.mxu1 %vm9602_vm6, %v9601_v1  ;;  %8833 = vmatprep.subr.mxu1 %v9601_v1 }
 0x389   :  { %8863 = vmatprep.subr.mxu0 %v9601_v1 }
 0x459   :  { %v511_v18 = vpop.f32.mrb[4].mxu1 }
 0x45a   :  { %v515_v19 = vmul.f32 0.35355338, %v511_v18  ;;  %v8827_v21 = vpop.f32.mrb[5].mxu1 }
 0x45c   :  { %v520_v22 = vadd.f32 %v9732_v16, %v515_v19 }
 0x45e   :  { %v521_v23 = vsel %vm438_vm7, %v520_v22, -inf }
 0x45f   :  { %522 = vmax.xlane.f32.xlu0 %v521_v23 }
 0x4ec   :  { %v523_v24 = vpop.xlane.xlu0 %522 }
 0x4ed   :  { %v524_v25 = vsub.f32 %v520_v22, %v523_v24  ;;  %v9823_v24 = vld [vmem:[#allocation2 + $0x19a] ss:$0 sm:$0xff] }
 0x4ef   :  { %v525_v26 = vmul.f32 1.442695, %v524_v25 }
 0x4f1   :  { %9465 = vpow2.f32 %v525_v26 }
 0x4fb   :  { %v9466_v27 = vpop.eup %9465 }
 0x4fc   :  { %v527_v28 = vsel %vm438_vm7, %v9466_v27, 0.0 }
 0x4fd   :  { %528 = vadd.xlane.f32.xlu1 %v527_v28  ;;  %v9826_v28 = vld [vmem:[#allocation2 + $0x1a2] ss:$0 sm:$0xff] }
 0x58a   :  { %v529_v8 = vpop.xlane.xlu1 %528 }
 0x58b   :  { %9467 = vrcp.f32 %v529_v8 }
 0x595   :  { %v9468_v17 = vpop.eup %9467 }
 0x596   :  { %v531_v29 = vmul.f32 %v9468_v17, %v9466_v27 }
 0x598   :  { %8831 = vmatmul.mubr.msk.f32.vlgmr.msra.gmra.mrb[6].mxu1 %vm438_vm7, %v531_v29 }
 0x599   :  { %8834 = vmatpush3.xpose.msk.msra.mxu1 %vm152_vm5, %v9737_v30  ;;  %8835 = vmatprep.mubr.msk.f32.mxu1 %vm9602_vm6, %v9601_v1 }
 0x59a   :  { %8838 = vmatprep.subr.mxu1 %v9601_v1 }
 0x59c   :  { %8836 = vmatmul.mubr.msk.f32.vlgmr.msra.gmra.mrb[8].mxu1 %vm152_vm5, %v9683_v58 }
 0x59d   :  { %8839 = vmatpush3.xpose.msk.msra.mxu1 %vm152_vm5, %v9745_v31  ;;  %8840 = vmatprep.mubr.msk.f32.mxu1 %vm9602_vm6, %v9601_v1 }
 0x59e   :  { %8848 = vmatprep.subr.mxu1 %v9601_v1 }
 0x5a0   :  { %8841 = vmatmul.mubr.msk.f32.vlgmr.msra.gmra.mrb[10].mxu1 %vm152_vm5, %v9683_v58 }
 0x5a1   :  { %8850 = vmatprep.mubr.msk.f32.mxu1 %vm9602_vm6, %v9601_v1 }
 0x66b   :  { %v601_v32 = vpop.f32.mrb[6].mxu1 }
 0x66c   :  { %v8832_v33 = vpop.f32.mrb[7].mxu1 }
 0x66f   :  { %v683_v34 = vpop.f32.mrb[8].mxu1 }
 0x670   :  { %v8837_v35 = vpop.f32.mrb[9].mxu1  ;;  %v684_v42 = vadd.f32 %v9760_v38, %v683_v34 }
 0x673   :  { %v761_v37 = vpop.f32.mrb[10].mxu1 }
 0x674   :  { %v762_v39 = vadd.f32 %v9758_v36, %v761_v37  ;;  %v8842_v41 = vpop.f32.mrb[11].mxu1 }
 0x676   :  { %8849 = vmatpush3.xpose.msk.msra.mxu1 %vm438_vm7, %v762_v39 }
 0x677   :  { %8858 = vmatprep.subr.mxu1 %v9601_v1 }
 0x679   :  { %8851 = vmatmul.mubr.msk.f32.vlgmr.msra.gmra.mrb[12].mxu1 %vm438_vm7, %v684_v42 }
 0x67a   :  { %8860 = vmatprep.mubr.msk.f32.mxu1 %vm9602_vm6, %v9601_v1  ;;  %8859 = vmatpush3.msra.mxu1 %v9772_v57 }
 0x67b   :  { %8868 = vmatprep.subr.mxu1 %v9601_v1 }
 0x74c   :  { %v915_v43 = vpop.f32.mrb[12].mxu1 }
 0x74d   :  { %v919_v44 = vmul.f32 0.35355338, %v915_v43  ;;  %v8852_v45 = vpop.f32.mrb[13].mxu1 }
 0x74e   :  { %v9836_v45 = vld [vmem:[#allocation2 + $0x128] sm:$0xff] }
 0x74f   :  { %v920_v46 = vadd.f32 %v919_v44, %v9732_v16 }
 0x751   :  { %v921_v47 = vsel %vm438_vm7, %v920_v46, -inf }
 0x752   :  { %922 = vmax.xlane.f32.xlu1 %v921_v47 }
 0x7df   :  { %v923_v50 = vpop.xlane.xlu1 %922 }
 0x7e0   :  { %v924_v51 = vsub.f32 %v920_v46, %v923_v50 }
 0x7e2   :  { %v925_v52 = vmul.f32 1.442695, %v924_v51  ;;  %v9840_v51 = vld [vmem:[#allocation2 + $0xd0] sm:$0xff] }
 0x7e4   :  { %9469 = vpow2.f32 %v925_v52  ;;  %v9848_v52 = vld [vmem:[#allocation2 + $0x110] sm:$0xff] }
 0x7ee   :  { %v9470_v53 = vpop.eup %9469 }
 0x7ef   :  { %v927_v55 = vsel %vm438_vm7, %v9470_v53, 0.0 }
 0x7f0   :  { %928 = vadd.xlane.f32.xlu1 %v927_v55 }
 0x87d   :  { %v929_v62 = vpop.xlane.xlu1 %928 }
 0x87e   :  { %9471 = vrcp.f32 %v929_v62 }
 0x888   :  { %v9472_v63 = vpop.eup %9471 }
 0x889   :  { %v931_v2 = vmul.f32 %v9472_v63, %v9470_v53  ;;  %v9861_v53 = vld [vmem:[#allocation2 + $0xf0] sm:$0xff] }
 0x88b   :  { %8856 = vmatmul.mubr.msk.f32.vlgmr.msra.gmra.mrb[6].mxu0 %vm438_vm7, %v931_v2 }
 0x88c   :  { %8864 = vmatpush3.msra.mxu0 %v9776_v3  ;;  %8865 = vmatprep.mubr.msk.f32.mxu0 %vm9602_vm6, %v9601_v1 }
 0x88d   :  { %8873 = vmatprep.subr.mxu0 %v9601_v1 }
 0x88f   :  { %8866 = vmatmul.mubr.msk.f32.vlgmr.msra.gmra.mrb[8].mxu0 %vm438_vm7, %v601_v32 }
 0x890   :  { %8875 = vmatprep.mubr.msk.f32.mxu0 %vm9602_vm6, %v9601_v1 }
 0x893   :  { %8874 = vmatpush3.xpose.msk.msra.mxu0 %vm152_vm5, %v9784_v4 }
 0x894   :  { %8883 = vmatprep.subr.mxu0 %v9601_v1 }
 0x896   :  { %8876 = vmatmul.mubr.msk.f32.vlgmr.msra.gmra.mrb[10].mxu0 %vm152_vm5, %v9683_v58 }
 0x897   :  { %8885 = vmatprep.mubr.msk.f32.mxu0 %vm9602_vm6, %v9601_v1 }
 0x95e   :  { %v1001_v9 = vpop.f32.mrb[6].mxu0 }
 0x95f   :  { %v8857_v10 = vpop.f32.mrb[7].mxu0  ;;  %8861 = vmatmul.mubr.msk.f32.vlgmr.msra.gmra.mrb[14].mxu1 %vm438_vm7, %v1001_v9  ;;  %v9871_v9 = vld [vmem:[#allocation2 + $0x1a3] ss:$0 sm:$0xff] }
 0x960   :  { %8869 = vmatpush3.xpose.msk.msra.mxu1 %vm152_vm5, %v9795_v7  ;;  %8870 = vmatprep.mubr.msk.f32.mxu1 %vm9602_vm6, %v9601_v1 }
 0x961   :  { %8878 = vmatprep.subr.mxu1 %v9601_v1 }
 0x962   :  { %v1147_v12 = vpop.f32.mrb[8].mxu0 }
 0x963   :  { %v8867_v13 = vpop.f32.mrb[9].mxu0  ;;  %8871 = vmatmul.mubr.msk.f32.vlgmr.msra.gmra.mrb[16].mxu1 %vm152_vm5, %v9683_v58 }
 0x964   :  { %8879 = vmatpush3.xpose.msk.msra.mxu1 %vm152_vm5, %v9803_v11  ;;  %8880 = vmatprep.mubr.msk.f32.mxu1 %vm9602_vm6, %v9601_v1 }
 0x965   :  { %8888 = vmatprep.subr.mxu1 %v9601_v1 }
 0x967   :  { %8881 = vmatmul.mubr.msk.f32.vlgmr.msra.gmra.mrb[18].mxu1 %vm152_vm5, %v9683_v58 }
 0x968   :  { %8890 = vmatprep.mubr.msk.f32.mxu1 %vm9602_vm6, %v9601_v1 }
 0x969   :  { %v1307_v15 = vpop.f32.mrb[10].mxu0 }
 0x96a   :  { %v1308_v18 = vadd.f32 %v9814_v14, %v1307_v15  ;;  %v8877_v19 = vpop.f32.mrb[11].mxu0 }
 0x96c   :  { %8884 = vmatpush3.xpose.msk.msra.mxu0 %vm438_vm7, %v1308_v18 }
 0x96d   :  { %8893 = vmatprep.subr.mxu0 %v9601_v1 }
 0xa32   :  { %v1074_v21 = vpop.f32.mrb[14].mxu1 }
 0xa33   :  { %v9821_v22 = vadd.f32 %v1147_v12, %v1074_v21  ;;  %v8862_v23 = vpop.f32.mrb[15].mxu1  ;;  %v9880_v21 = vld [vmem:[#allocation2 + $0x19f] ss:$0 sm:$0xff] }
 0xa36   :  { %v1229_v25 = vpop.f32.mrb[16].mxu1 }
 0xa37   :  { %v1230_v26 = vadd.f32 %v9823_v24, %v1229_v25  ;;  %v8872_v27 = vpop.f32.mrb[17].mxu1  ;;  %v9882_v25 = vld [vmem:[#allocation2 + $0x19b] ss:$0 sm:$0xff] }
 0xa39   :  { %8886 = vmatmul.mubr.msk.f32.vlgmr.msra.gmra.mrb[12].mxu0 %vm438_vm7, %v1230_v26 }
 0xa3a   :  { %v1385_v8 = vpop.f32.mrb[18].mxu1  ;;  %8895 = vmatprep.mubr.msk.f32.mxu0 %vm9602_vm6, %v9601_v1  ;;  %8894 = vmatpush3.msra.mxu0 %v9836_v45 }
 0xa3b   :  { %v1386_v17 = vadd.f32 %v9826_v28, %v1385_v8  ;;  %v8882_v29 = vpop.f32.mrb[19].mxu1  ;;  %8903 = vmatprep.subr.mxu0 %v9601_v1 }
 0xa3d   :  { %8889 = vmatpush3.msra.mxu1 %v1386_v17 }
 0xa3e   :  { %8898 = vmatprep.subr.mxu1 %v9601_v1 }
 0xb0c   :  { %v1461_v32 = vpop.f32.mrb[12].mxu0 }
 0xb0d   :  { %v1465_v33 = vmul.f32 0.35355338, %v1461_v32  ;;  %v8887_v34 = vpop.f32.mrb[13].mxu0 }
 0xb0f   :  { %v1466_v35 = vadd.f32 %v1465_v33, %v9732_v16 }
 0xb11   :  { %v1467_v37 = vsel %vm438_vm7, %v1466_v35, -inf }
 0xb12   :  { %1468 = vmax.xlane.f32.xlu1 %v1467_v37 }
 0xb9f   :  { %v1469_v39 = vpop.xlane.xlu1 %1468 }
 0xba0   :  { %v1470_v41 = vsub.f32 %v1466_v35, %v1469_v39 }
 0xba2   :  { %v1471_v42 = vmul.f32 1.442695, %v1470_v41 }
 0xba4   :  { %9473 = vpow2.f32 %v1471_v42  ;;  %v156_v42 = vsel %vm152_vm5, %v9659_v40, 0.0 }
 0xbae   :  { %v9474_v43 = vpop.eup %9473 }
 0xbaf   :  { %v1473_v44 = vsel %vm438_vm7, %v9474_v43, 0.0 }
 0xbb0   :  { %1474 = vadd.xlane.f32.xlu1 %v1473_v44 }
 0xc3d   :  { %v1475_v46 = vpop.xlane.xlu1 %1474 }
 0xc3e   :  { %9475 = vrcp.f32 %v1475_v46 }
 0xc48   :  { %v9476_v47 = vpop.eup %9475 }
 0xc49   :  { %v1477_v50 = vmul.f32 %v9476_v47, %v9474_v43 }
 0xc4b   :  { %8891 = vmatmul.mubr.msk.f32.vlgmr.msra.gmra.mrb[20].mxu1 %vm438_vm7, %v1477_v50 }
 0xc4c   :  { %8899 = vmatpush3.xpose.msk.msra.mxu1 %vm152_vm5, %v9840_v51  ;;  %8900 = vmatprep.mubr.msk.f32.mxu1 %vm9602_vm6, %v9601_v1 }
 0xc4d   :  { %8908 = vmatprep.subr.mxu1 %v9601_v1 }
 0xc4f   :  { %8901 = vmatmul.mubr.msk.f32.vlgmr.msra.gmra.mrb[22].mxu1 %vm152_vm5, %v9683_v58 }
 0xc50   :  { %8909 = vmatpush3.xpose.msk.msra.mxu1 %vm152_vm5, %v9848_v52  ;;  %8910 = vmatprep.mubr.msk.f32.mxu1 %vm9602_vm6, %v9601_v1 }
 0xc51   :  { %8918 = vmatprep.subr.mxu1 %v9601_v1 }
 0xc53   :  { %8911 = vmatmul.mubr.msk.f32.vlgmr.msra.gmra.mrb[24].mxu1 %vm152_vm5, %v9683_v58 }
 0xc54   :  { %8920 = vmatprep.mubr.msk.f32.mxu1 %vm9602_vm6, %v9601_v1 }
 0xd1e   :  { %v1547_v55 = vpop.f32.mrb[20].mxu1 }
 0xd1f   :  { %v8892_v62 = vpop.f32.mrb[21].mxu1  ;;  %8896 = vmatmul.mubr.msk.f32.vlgmr.msra.gmra.mrb[14].mxu0 %vm438_vm7, %v1547_v55 }
 0xd20   :  { %8904 = vmatpush3.xpose.msk.msra.mxu0 %vm152_vm5, %v9861_v53  ;;  %8905 = vmatprep.mubr.msk.f32.mxu0 %vm9602_vm6, %v9601_v1 }
 0xd21   :  { %8913 = vmatprep.subr.mxu0 %v9601_v1 }
 0xd22   :  { %v1703_v63 = vpop.f32.mrb[22].mxu1 }
 0xd23   :  { %v8902_v2 = vpop.f32.mrb[23].mxu1  ;;  %8906 = vmatmul.mubr.msk.f32.vlgmr.msra.gmra.mrb[16].mxu0 %vm152_vm5, %v9683_v58  ;;  %v1704_v8 = vadd.f32 %v9882_v25, %v1703_v63 }
 0xd24   :  { %8915 = vmatprep.mubr.msk.f32.mxu0 %vm9602_vm6, %v9601_v1  ;;  %v9904_v2 = vld [vmem:[#allocation2 + $0x130] sm:$0xff] }
 0xd26   :  { %v1859_v10 = vpop.f32.mrb[24].mxu1 }
 0xd27   :  { %v1860_v12 = vadd.f32 %v9871_v9, %v1859_v10  ;;  %v8912_v13 = vpop.f32.mrb[25].mxu1 }
 0xd29   :  { %8919 = vmatpush3.msra.mxu1 %v1860_v12 }
 0xd2a   :  { %8928 = vmatprep.subr.mxu1 %v9601_v1 }
 0xdf2   :  { %v1620_v15 = vpop.f32.mrb[14].mxu0 }
 0xdf3   :  { %v9878_v18 = vadd.f32 %v1620_v15, %v9821_v22  ;;  %v8897_v19 = vpop.f32.mrb[15].mxu0 }
 0xdf6   :  { %v1781_v23 = vpop.f32.mrb[16].mxu0 }
 0xdf7   :  { %v1782_v26 = vadd.f32 %v9880_v21, %v1781_v23  ;;  %v8907_v27 = vpop.f32.mrb[17].mxu0 }
 0xdf9   :  { %8914 = vmatpush3.xpose.msk.msra.mxu0 %vm438_vm7, %v1782_v26 }
 0xdfa   :  { %8923 = vmatprep.subr.mxu0 %v9601_v1 }
 0xdfc   :  { %8916 = vmatmul.mubr.msk.f32.vlgmr.msra.gmra.mrb[18].mxu0 %vm438_vm7, %v1704_v8 }
 0xdfd   :  { %8925 = vmatprep.mubr.msk.f32.mxu0 %vm9602_vm6, %v9601_v1  ;;  %8924 = vmatpush3.msra.mxu0 %v9904_v2 }
 0xdfe   :  { %8933 = vmatprep.subr.mxu0 %v9601_v1 }
 0xecf   :  { %v1935_v22 = vpop.f32.mrb[18].mxu0 }
 0xed0   :  { %v1939_v17 = vmul.f32 0.35355338, %v1935_v22  ;;  %v8917_v29 = vpop.f32.mrb[19].mxu0 }
 0xed2   :  { %v1940_v32 = vadd.f32 %v1939_v17, %v9732_v16 }
 0xed4   :  { %v1941_v33 = vsel %vm438_vm7, %v1940_v32, -inf }
 0xed5   :  { %1942 = vmax.xlane.f32.xlu1 %v1941_v33 }
 0xf62   :  { %v1943_v34 = vpop.xlane.xlu1 %1942 }
 0xf63   :  { %v1944_v35 = vsub.f32 %v1940_v32, %v1943_v34 }
 0xf65   :  { %v1945_v37 = vmul.f32 1.442695, %v1944_v35 }
 0xf67   :  { %9477 = vpow2.f32 %v1945_v37 }
 0xf71   :  { %v9478_v39 = vpop.eup %9477 }
 0xf72   :  { %v1947_v41 = vsel %vm438_vm7, %v9478_v39, 0.0 }
 0xf73   :  { %1948 = vadd.xlane.f32.xlu1 %v1947_v41 }
 0xf77   :  { %157 = vadd.xlane.f32.xlu1 %v156_v42 }
0x1000   :  { %v1949_v43 = vpop.xlane.xlu1 %1948 }
0x1001   :  { %9479 = vrcp.f32 %v1949_v43 }
0x1004   :  { %v158_v44 = vpop.xlane.xlu1 %157 }
0x1005   :  { %v161_v46 = vmul.f32 0.03125, %v158_v44 }
0x1007   :  { %v163_v47 = vsub.f32 %v9659_v40, %v161_v46 }
0x1009   :  { %v165_v50 = vmul.f32 %v163_v47, %v163_v47 }
0x100b   :  { %v9480_v55 = vpop.eup %9479  ;;  %v169_v62 = vsel %vm152_vm5, %v165_v50, 0.0 }
0x100c   :  { %v1951_v63 = vmul.f32 %v9480_v55, %v9478_v39  ;;  %170 = vadd.xlane.f32.xlu0 %v169_v62 }
0x100e   :  { %8921 = vmatmul.mubr.msk.f32.vlgmr.msra.gmra.mrb[26].mxu1 %vm438_vm7, %v1951_v63 }
0x100f   :  { %8929 = vmatpush3.xpose.msk.msra.mxu1 %vm152_vm5, %v9663_v48  ;;  %8930 = vmatprep.mubr.msk.f32.mxu1 %vm9602_vm6, %v9601_v1 }
0x1010   :  { %8938 = vmatprep.subr.mxu1 %v9601_v1 }
0x1099   :  { %v171_v40 = vpop.xlane.xlu0 %170 }
0x109a   :  { %v173_v10 = vmul.f32 0.03125, %v171_v40 }
0x109c   :  { %v175_v12 = vadd.f32 1e-05, %v173_v10 }
0x109e   :  { %9481 = vrsqrt.f32 %v175_v12 }
0x10a8   :  { %v9482_v13 = vpop.eup %9481 }
0x10a9   :  { %v179_v15 = vmul.f32 %v9482_v13, %v163_v47 }
0x10ab   :  { %v186_v19 = vmul.f32 %v9677_v54, %v179_v15 }
0x10ad   :  { %v9910_v48 = vadd.f32 %v9679_v56, %v186_v19 }
0x10af   :  { %8931 = vmatmul.mubr.msk.f32.vlgmr.msra.gmra.mrb[28].mxu1 %vm152_vm5, %v9910_v48 }
0x10b0   :  { %8939 = vmatpush3.xpose.msk.msra.mxu1 %vm152_vm5, %v9685_v59  ;;  %8940 = vmatprep.mubr.msk.f32.mxu1 %vm9602_vm6, %v9601_v1 }
0x10b1   :  { %8948 = vmatprep.subr.mxu1 %v9601_v1 }
0x10b3   :  { %8941 = vmatmul.mubr.msk.f32.vlgmr.msra.gmra.mrb[30].mxu1 %vm152_vm5, %v9910_v48 }
0x10b4   :  { %8950 = vmatprep.mubr.msk.f32.mxu1 %vm9602_vm6, %v9601_v1 }
0x10e1   :  { %v2021_v54 = vpop.f32.mrb[26].mxu1 }
0x10e2   :  { %v8922_v56 = vpop.f32.mrb[27].mxu1  ;;  %8926 = vmatmul.mubr.msk.f32.vlgmr.msra.gmra.mrb[20].mxu0 %vm438_vm7, %v2021_v54 }
0x10e3   :  { %8934 = vmatpush3.xpose.msk.msra.mxu0 %vm152_vm5, %v9665_v49  ;;  %8935 = vmatprep.mubr.msk.f32.mxu0 %vm9602_vm6, %v9601_v1 }
0x10e4   :  { %8943 = vmatprep.subr.mxu0 %v9601_v1 }
0x10e6   :  { %8936 = vmatmul.mubr.msk.f32.vlgmr.msra.gmra.mrb[22].mxu0 %vm152_vm5, %v9910_v48 }
0x10e7   :  { %8945 = vmatprep.mubr.msk.f32.mxu0 %vm9602_vm6, %v9601_v1 }
0x1182   :  { %v2174_v59 = vpop.f32.mrb[28].mxu1 }
0x1183   :  { %v8932_v23 = vpop.f32.mrb[29].mxu1  ;;  %v2175_v34 = vadd.f32 %v9713_v0, %v2174_v59 }
0x1186   :  { %v2314_v26 = vpop.f32.mrb[30].mxu1 }
0x1187   :  { %v2315_v27 = vadd.f32 %v9716_v5, %v2314_v26  ;;  %v8942_v8 = vpop.f32.mrb[31].mxu1 }
0x1189   :  { %8949 = vmatpush3.msra.mxu1 %v2315_v27 }
0x118a   :  { %8958 = vmatprep.subr.mxu1 %v9601_v1 }
0x11b5   :  { %v2094_v49 = vpop.f32.mrb[20].mxu0 }
0x11b6   :  { %v9936_v22 = vadd.f32 %v2094_v49, %v9878_v18  ;;  %v8927_v17 = vpop.f32.mrb[21].mxu0 }
0x11b9   :  { %v2244_v29 = vpop.f32.mrb[22].mxu0 }
0x11ba   :  { %v2245_v32 = vadd.f32 %v9711_v61, %v2244_v29  ;;  %v8937_v33 = vpop.f32.mrb[23].mxu0 }
0x11bc   :  { %8944 = vmatpush3.xpose.msk.msra.mxu0 %vm438_vm7, %v2245_v32 }
0x11bd   :  { %8953 = vmatprep.subr.mxu0 %v9601_v1 }
0x11bf   :  { %8946 = vmatmul.mubr.msk.f32.vlgmr.msra.gmra.mrb[24].mxu0 %vm438_vm7, %v2175_v34 }
0x11c0   :  { %8954 = vmatpush3.xpose.msk.msra.mxu0 %vm152_vm5, %v9737_v30  ;;  %8955 = vmatprep.mubr.msk.f32.mxu0 %vm9602_vm6, %v9601_v1 }
0x11c1   :  { %8963 = vmatprep.subr.mxu0 %v9601_v1 }
0x11c3   :  { %8956 = vmatmul.mubr.msk.f32.vlgmr.msra.gmra.mrb[26].mxu0 %vm152_vm5, %v9910_v48 }
0x11c4   :  { %8964 = vmatpush3.xpose.msk.msra.mxu0 %vm152_vm5, %v9687_v60  ;;  %8965 = vmatprep.mubr.msk.f32.mxu0 %vm9602_vm6, %v9601_v1 }
0x11c5   :  { %8973 = vmatprep.subr.mxu0 %v9601_v1 }
0x11c7   :  { %8966 = vmatmul.mubr.msk.f32.vlgmr.msra.gmra.mrb[28].mxu0 %vm152_vm5, %v9910_v48 }
0x11c8   :  { %8975 = vmatprep.mubr.msk.f32.mxu0 %vm9602_vm6, %v9601_v1 }
0x1292   :  { %v2390_v61 = vpop.f32.mrb[24].mxu0 }
0x1293   :  { %v2394_v0 = vmul.f32 0.35355338, %v2390_v61  ;;  %v8947_v5 = vpop.f32.mrb[25].mxu0 }
0x1295   :  { %v2399_v30 = vadd.f32 %v9654_v20, %v2394_v0 }
0x1296   :  { %v2550_v18 = vpop.f32.mrb[26].mxu0 }
0x1297   :  { %v8957_v35 = vpop.f32.mrb[27].mxu0  ;;  %v2400_v60 = vsel %vm438_vm7, %v2399_v30, -inf }
0x1298   :  { %2401 = vmax.xlane.f32.xlu1 %v2400_v60 }
0x129a   :  { %v2690_v37 = vpop.f32.mrb[28].mxu0 }
0x129b   :  { %v2691_v39 = vadd.f32 %v9718_v6, %v2690_v37  ;;  %v8967_v41 = vpop.f32.mrb[29].mxu0 }
0x129d   :  { %8974 = vmatpush3.msra.mxu0 %v2691_v39 }
0x129e   :  { %8983 = vmatprep.subr.mxu0 %v9601_v1 }
0x1325   :  { %v2402_v42 = vpop.xlane.xlu1 %2401 }
0x1326   :  { %v2403_v43 = vsub.f32 %v2399_v30, %v2402_v42 }
0x1328   :  { %v2404_v44 = vmul.f32 1.442695, %v2403_v43 }
0x132a   :  { %9483 = vpow2.f32 %v2404_v44 }
0x1334   :  { %v9484_v46 = vpop.eup %9483 }
0x1335   :  { %v2406_v47 = vsel %vm438_vm7, %v9484_v46, 0.0 }
0x1336   :  { %2407 = vadd.xlane.f32.xlu0 %v2406_v47 }
0x13c3   :  { %v2408_v50 = vpop.xlane.xlu0 %2407 }
0x13c4   :  { %9485 = vrcp.f32 %v2408_v50 }
0x13ce   :  { %v9486_v55 = vpop.eup %9485 }
0x13cf   :  { %v2410_v62 = vmul.f32 %v9486_v55, %v9484_v46 }
0x13d1   :  { %8951 = vmatmul.mubr.msk.f32.vlgmr.msra.gmra.mrb[32].mxu1 %vm438_vm7, %v2410_v62 }
0x13d2   :  { %8959 = vmatpush3.xpose.msk.msra.mxu1 %vm152_vm5, %v9745_v31  ;;  %8960 = vmatprep.mubr.msk.f32.mxu1 %vm9602_vm6, %v9601_v1  ;;  %v2551_v31 = vadd.f32 %v9760_v38, %v2550_v18 }
0x13d3   :  { %8968 = vmatprep.subr.mxu1 %v9601_v1 }
0x13d5   :  { %8961 = vmatmul.mubr.msk.f32.vlgmr.msra.gmra.mrb[34].mxu1 %vm152_vm5, %v9910_v48 }
0x13d6   :  { %8970 = vmatprep.mubr.msk.f32.mxu1 %vm9602_vm6, %v9601_v1 }
0x14a4   :  { %v2480_v6 = vpop.f32.mrb[32].mxu1 }
0x14a5   :  { %v8952_v63 = vpop.f32.mrb[33].mxu1 }
0x14a8   :  { %v2620_v40 = vpop.f32.mrb[34].mxu1 }
0x14a9   :  { %v2621_v10 = vadd.f32 %v9758_v36, %v2620_v40  ;;  %v8962_v12 = vpop.f32.mrb[35].mxu1 }
0x14ab   :  { %8969 = vmatpush3.xpose.msk.msra.mxu1 %vm438_vm7, %v2621_v10 }
0x14ac   :  { %8978 = vmatprep.subr.mxu1 %v9601_v1 }
0x14ae   :  { %8971 = vmatmul.mubr.msk.f32.vlgmr.msra.gmra.mrb[36].mxu1 %vm438_vm7, %v2551_v31 }
0x14af   :  { %8979 = vmatpush3.msra.mxu1 %v9772_v57  ;;  %8980 = vmatprep.mubr.msk.f32.mxu1 %vm9602_vm6, %v9601_v1 }
0x14b0   :  { %8988 = vmatprep.subr.mxu1 %v9601_v1 }
0x1581   :  { %v2766_v13 = vpop.f32.mrb[36].mxu1 }
0x1582   :  { %v2770_v15 = vmul.f32 0.35355338, %v2766_v13  ;;  %v8972_v19 = vpop.f32.mrb[37].mxu1 }
0x1584   :  { %v2771_v36 = vadd.f32 %v2770_v15, %v9654_v20 }
0x1586   :  { %v2772_v54 = vsel %vm438_vm7, %v2771_v36, -inf }
0x1587   :  { %2773 = vmax.xlane.f32.xlu1 %v2772_v54 }
0x1614   :  { %v2774_v38 = vpop.xlane.xlu1 %2773 }
0x1615   :  { %v2775_v56 = vsub.f32 %v2771_v36, %v2774_v38 }
0x1617   :  { %v2776_v59 = vmul.f32 1.442695, %v2775_v56 }
0x1619   :  { %9487 = vpow2.f32 %v2776_v59 }
0x1623   :  { %v9488_v23 = vpop.eup %9487 }
0x1624   :  { %v2778_v57 = vsel %vm438_vm7, %v9488_v23, 0.0 }
0x1625   :  { %2779 = vadd.xlane.f32.xlu0 %v2778_v57 }
0x16b2   :  { %v2780_v26 = vpop.xlane.xlu0 %2779 }
0x16b3   :  { %9489 = vrcp.f32 %v2780_v26 }
0x16bd   :  { %v9490_v27 = vpop.eup %9489 }
0x16be   :  { %v2782_v8 = vmul.f32 %v9490_v27, %v9488_v23 }
0x16c0   :  { %8976 = vmatmul.mubr.msk.f32.vlgmr.msra.gmra.mrb[30].mxu0 %vm438_vm7, %v2782_v8 }
0x16c1   :  { %8984 = vmatpush3.msra.mxu0 %v9776_v3  ;;  %8985 = vmatprep.mubr.msk.f32.mxu0 %vm9602_vm6, %v9601_v1 }
0x16c2   :  { %8993 = vmatprep.subr.mxu0 %v9601_v1 }
0x16c4   :  { %8986 = vmatmul.mubr.msk.f32.vlgmr.msra.gmra.mrb[32].mxu0 %vm438_vm7, %v2480_v6 }
0x16c5   :  { %8995 = vmatprep.mubr.msk.f32.mxu0 %vm9602_vm6, %v9601_v1 }
0x16c8   :  { %8994 = vmatpush3.xpose.msk.msra.mxu0 %vm152_vm5, %v9784_v4 }
0x16c9   :  { %9003 = vmatprep.subr.mxu0 %v9601_v1 }
0x16cb   :  { %8996 = vmatmul.mubr.msk.f32.vlgmr.msra.gmra.mrb[34].mxu0 %vm152_vm5, %v9910_v48 }
0x16cc   :  { %9005 = vmatprep.mubr.msk.f32.mxu0 %vm9602_vm6, %v9601_v1 }
0x1793   :  { %v2852_v3 = vpop.f32.mrb[30].mxu0 }
0x1794   :  { %v8977_v49 = vpop.f32.mrb[31].mxu0  ;;  %8981 = vmatmul.mubr.msk.f32.vlgmr.msra.gmra.mrb[38].mxu1 %vm438_vm7, %v2852_v3 }
0x1795   :  { %8989 = vmatpush3.xpose.msk.msra.mxu1 %vm152_vm5, %v9795_v7  ;;  %8990 = vmatprep.mubr.msk.f32.mxu1 %vm9602_vm6, %v9601_v1 }
0x1796   :  { %8998 = vmatprep.subr.mxu1 %v9601_v1 }
0x1797   :  { %v2998_v4 = vpop.f32.mrb[32].mxu0 }
0x1798   :  { %v8987_v17 = vpop.f32.mrb[33].mxu0  ;;  %8991 = vmatmul.mubr.msk.f32.vlgmr.msra.gmra.mrb[40].mxu1 %vm152_vm5, %v9910_v48 }
0x1799   :  { %8999 = vmatpush3.xpose.msk.msra.mxu1 %vm152_vm5, %v9803_v11  ;;  %9000 = vmatprep.mubr.msk.f32.mxu1 %vm9602_vm6, %v9601_v1 }
0x179a   :  { %9008 = vmatprep.subr.mxu1 %v9601_v1 }
0x179c   :  { %9001 = vmatmul.mubr.msk.f32.vlgmr.msra.gmra.mrb[42].mxu1 %vm152_vm5, %v9910_v48 }
0x179d   :  { %9010 = vmatprep.mubr.msk.f32.mxu1 %vm9602_vm6, %v9601_v1 }
0x179e   :  { %v3138_v7 = vpop.f32.mrb[34].mxu0 }
0x179f   :  { %v3139_v29 = vadd.f32 %v9814_v14, %v3138_v7  ;;  %v8997_v32 = vpop.f32.mrb[35].mxu0 }
0x17a1   :  { %9004 = vmatpush3.xpose.msk.msra.mxu0 %vm438_vm7, %v3139_v29 }
0x17a2   :  { %9013 = vmatprep.subr.mxu0 %v9601_v1 }
0x1867   :  { %v2925_v11 = vpop.f32.mrb[38].mxu1 }
0x1868   :  { %v2999_v33 = vadd.f32 %v2998_v4, %v2925_v11  ;;  %v8982_v34 = vpop.f32.mrb[39].mxu1  ;;  %v8413_v11 = vld [vmem:[#allocation2 + $0x1a5] ss:$0 sm:$0xff] }
0x186b   :  { %v3068_v61 = vpop.f32.mrb[40].mxu1 }
0x186c   :  { %v3069_v0 = vadd.f32 %v9823_v24, %v3068_v61  ;;  %v8992_v5 = vpop.f32.mrb[41].mxu1 }
0x186e   :  { %9006 = vmatmul.mubr.msk.f32.vlgmr.msra.gmra.mrb[36].mxu0 %vm438_vm7, %v3069_v0  ;;  %v8414_v0 = vld [vmem:[#allocation2 + $0x1a6] ss:$0 sm:$0xff] }
0x186f   :  { %v3208_v30 = vpop.f32.mrb[42].mxu1  ;;  %9014 = vmatpush3.msra.mxu0 %v9836_v45  ;;  %9015 = vmatprep.mubr.msk.f32.mxu0 %vm9602_vm6, %v9601_v1 }
0x1870   :  { %v3209_v14 = vadd.f32 %v9826_v28, %v3208_v30  ;;  %v9002_v18 = vpop.f32.mrb[43].mxu1  ;;  %9023 = vmatprep.subr.mxu0 %v9601_v1 }
0x1872   :  { %9009 = vmatpush3.msra.mxu1 %v3209_v14 }
0x1873   :  { %9018 = vmatprep.subr.mxu1 %v9601_v1 }
0x1941   :  { %v3284_v35 = vpop.f32.mrb[36].mxu0 }
0x1942   :  { %v3288_v60 = vmul.f32 0.35355338, %v3284_v35  ;;  %v9007_v24 = vpop.f32.mrb[37].mxu0 }
0x1944   :  { %v3289_v37 = vadd.f32 %v3288_v60, %v9654_v20 }
0x1946   :  { %v3290_v39 = vsel %vm438_vm7, %v3289_v37, -inf }
0x1947   :  { %3291 = vmax.xlane.f32.xlu1 %v3290_v39 }
0x19d4   :  { %v3292_v45 = vpop.xlane.xlu1 %3291 }
0x19d5   :  { %v3293_v41 = vsub.f32 %v3289_v37, %v3292_v45 }
0x19d7   :  { %v3294_v42 = vmul.f32 1.442695, %v3293_v41 }
0x19d9   :  { %9491 = vpow2.f32 %v3294_v42 }
0x19e3   :  { %v9492_v43 = vpop.eup %9491 }
0x19e4   :  { %v3296_v28 = vsel %vm438_vm7, %v9492_v43, 0.0 }
0x19e5   :  { %3297 = vadd.xlane.f32.xlu0 %v3296_v28 }
0x1a72   :  { %v3298_v44 = vpop.xlane.xlu0 %3297 }
0x1a73   :  { %9493 = vrcp.f32 %v3298_v44 }
0x1a7d   :  { %v9494_v46 = vpop.eup %9493 }
0x1a7e   :  { %v3300_v47 = vmul.f32 %v9494_v46, %v9492_v43  ;;  %v3937_v46 = vld [vmem:[#allocation2 + $0x138] sm:$0xff] }
0x1a80   :  { %9011 = vmatmul.mubr.msk.f32.vlgmr.msra.gmra.mrb[44].mxu1 %vm438_vm7, %v3300_v47  ;;  %v3938_v47 = vld [vmem:[#allocation2 + $0x140] sm:$0xff] }
0x1a81   :  { %9019 = vmatpush3.xpose.msk.msra.mxu1 %vm152_vm5, %v9840_v51  ;;  %9020 = vmatprep.mubr.msk.f32.mxu1 %vm9602_vm6, %v9601_v1 }
0x1a82   :  { %9028 = vmatprep.subr.mxu1 %v9601_v1 }
0x1a84   :  { %9021 = vmatmul.mubr.msk.f32.vlgmr.msra.gmra.mrb[46].mxu1 %vm152_vm5, %v9910_v48 }
0x1a85   :  { %9029 = vmatpush3.xpose.msk.msra.mxu1 %vm152_vm5, %v9848_v52  ;;  %9030 = vmatprep.mubr.msk.f32.mxu1 %vm9602_vm6, %v9601_v1 }
0x1a86   :  { %9038 = vmatprep.subr.mxu1 %v9601_v1 }
0x1a88   :  { %9031 = vmatmul.mubr.msk.f32.vlgmr.msra.gmra.mrb[48].mxu1 %vm152_vm5, %v9910_v48 }
0x1a89   :  { %9040 = vmatprep.mubr.msk.f32.mxu1 %vm9602_vm6, %v9601_v1 }
0x1b53   :  { %v3370_v51 = vpop.f32.mrb[44].mxu1 }
0x1b54   :  { %v9012_v50 = vpop.f32.mrb[45].mxu1  ;;  %9016 = vmatmul.mubr.msk.f32.vlgmr.msra.gmra.mrb[38].mxu0 %vm438_vm7, %v3370_v51  ;;  %v9394_v51 = vpack.c.bf16 %v3938_v47, %v3937_v46 }
0x1b55   :  { %9024 = vmatpush3.xpose.msk.msra.mxu0 %vm152_vm5, %v9861_v53  ;;  %9025 = vmatprep.mubr.msk.f32.mxu0 %vm9602_vm6, %v9601_v1  ;;  %v3939_v50 = vld [vmem:[#allocation2 + $0x148] sm:$0xff] }
0x1b56   :  { %9033 = vmatprep.subr.mxu0 %v9601_v1 }
0x1b57   :  { %v3514_v52 = vpop.f32.mrb[46].mxu1 }
0x1b58   :  { %v9022_v55 = vpop.f32.mrb[47].mxu1  ;;  %9026 = vmatmul.mubr.msk.f32.vlgmr.msra.gmra.mrb[40].mxu0 %vm152_vm5, %v9910_v48  ;;  %v3515_v15 = vadd.f32 %v9882_v25, %v3514_v52  ;;  %v3940_v52 = vld [vmem:[#allocation2 + $0x150] sm:$0xff] }
0x1b59   :  { %9035 = vmatprep.mubr.msk.f32.mxu0 %vm9602_vm6, %v9601_v1  ;;  %v9398_v55 = vpack.c.bf16 %v3940_v52, %v3939_v50 }
0x1b5b   :  { %v3654_v62 = vpop.f32.mrb[48].mxu1 }
0x1b5c   :  { %v3655_v6 = vadd.f32 %v9871_v9, %v3654_v62  ;;  %v9032_v63 = vpop.f32.mrb[49].mxu1  ;;  %v8372_v9 = vld [vmem:[#allocation2 + $0x1a4] ss:$0 sm:$0xff] }
0x1b5d   :  { %v2104_v36 = vadd.f32 %v8372_v9, %v9936_v22  ;;  %v4030_v62 = vld [vmem:[#allocation2 + $0x160] sm:$0xff] }
0x1b5e   :  { %9039 = vmatpush3.msra.mxu1 %v3655_v6  ;;  %v4031_v6 = vld [vmem:[#allocation2 + $0x168] sm:$0xff] }
0x1b5f   :  { %v3895_v25 = vadd.f32 %v2104_v36, %v9683_v58  ;;  %9395 = vmatprep.subr.bf16.mxu1 %v9394_v51 }
0x1b61   :  { %v3897_v59 = vsel %vm152_vm5, %v3895_v25, 0.0 }
0x1c27   :  { %v3443_v40 = vpop.f32.mrb[38].mxu0 }
0x1c28   :  { %v3447_v53 = vadd.f32 %v3443_v40, %v2999_v33  ;;  %v9017_v10 = vpop.f32.mrb[39].mxu0  ;;  %v4032_v40 = vld [vmem:[#allocation2 + $0x170] sm:$0xff] }
0x1c29   :  { %v4033_v10 = vld [vmem:[#allocation2 + $0x178] sm:$0xff] }
0x1c2b   :  { %v3584_v12 = vpop.f32.mrb[40].mxu0 }
0x1c2c   :  { %v3585_v31 = vadd.f32 %v9880_v21, %v3584_v12  ;;  %v9027_v13 = vpop.f32.mrb[41].mxu0  ;;  %v4034_v12 = vld [vmem:[#allocation2 + $0x180] sm:$0xff] }
0x1c2e   :  { %9034 = vmatpush3.xpose.msk.msra.mxu0 %vm438_vm7, %v3585_v31  ;;  %v9410_v31 = vpack.c.bf16 %v4034_v12, %v4033_v10 }
0x1c2f   :  { %9043 = vmatprep.subr.mxu0 %v9601_v1 }
0x1c31   :  { %9036 = vmatmul.mubr.msk.f32.vlgmr.msra.gmra.mrb[42].mxu0 %vm438_vm7, %v3515_v15 }
0x1c32   :  { %9044 = vmatpush3.msra.mxu0 %v9904_v2  ;;  %9045 = vmatprep.mubr.msk.f32.mxu0 %vm9602_vm6, %v9601_v1 }
0x1d04   :  { %v3730_v19 = vpop.f32.mrb[42].mxu0 }
0x1d05   :  { %v3734_v54 = vmul.f32 0.35355338, %v3730_v19  ;;  %v9037_v21 = vpop.f32.mrb[43].mxu0 }
0x1d07   :  { %v3735_v38 = vadd.f32 %v3734_v54, %v9654_v20 }
0x1d09   :  { %v3736_v56 = vsel %vm438_vm7, %v3735_v38, -inf }
0x1d0a   :  { %3737 = vmax.xlane.f32.xlu1 %v3736_v56  ;;  %v4036_v56 = vld [vmem:[#allocation2 + $0x190] sm:$0xff] }
0x1d0e   :  { %3898 = vadd.xlane.f32.xlu1 %v3897_v59  ;;  %v8415_v59 = vld [vmem:[#allocation2 + $0x1a7] ss:$0 sm:$0xff] }
0x1d97   :  { %v3738_v2 = vpop.xlane.xlu1 %3737 }
0x1d98   :  { %v3739_v23 = vsub.f32 %v3735_v38, %v3738_v2  ;;  %v4035_v38 = vld [vmem:[#allocation2 + $0x188] sm:$0xff] }
0x1d9a   :  { %v3740_v57 = vmul.f32 1.442695, %v3739_v23 }
0x1d9b   :  { %v3899_v26 = vpop.xlane.xlu1 %3898 }
0x1d9c   :  { %9495 = vpow2.f32 %v3740_v57  ;;  %v3903_v27 = vmul.f32 0.03125, %v3899_v26 }
0x1d9e   :  { %v3905_v8 = vsub.f32 %v3895_v25, %v3903_v27  ;;  %v9414_v25 = vpack.c.bf16 %v4036_v56, %v4035_v38 }
0x1da0   :  { %v3907_v22 = vmul.f32 %v3905_v8, %v3905_v8 }
0x1da2   :  { %v3909_v3 = vsel %vm152_vm5, %v3907_v22, 0.0  ;;  %v8418_v22 = vld [vmem:[#allocation2 + $0x1a8] ss:$0 sm:$0xff] }
0x1da3   :  { %3910 = vadd.xlane.f32.xlu1 %v3909_v3 }
0x1da6   :  { %v9496_v49 = vpop.eup %9495 }
0x1da7   :  { %v3742_v4 = vsel %vm438_vm7, %v9496_v49, 0.0 }
0x1da8   :  { %3743 = vadd.xlane.f32.xlu0 %v3742_v4 }
0x1e30   :  { %v3911_v58 = vpop.xlane.xlu1 %3910 }
0x1e31   :  { %v3915_v17 = vmul.f32 0.03125, %v3911_v58 }
0x1e33   :  { %v3917_v7 = vadd.f32 1e-05, %v3915_v17 }
0x1e35   :  { %9497 = vrsqrt.f32 %v3917_v7  ;;  %v3744_v29 = vpop.xlane.xlu0 %3743 }
0x1e36   :  { %9499 = vrcp.f32 %v3744_v29 }
0x1e3f   :  { %v9498_v32 = vpop.eup %9497 }
0x1e40   :  { %v9500_v33 = vpop.eup %9499  ;;  %v3921_v34 = vmul.f32 %v9498_v32, %v3905_v8 }
0x1e41   :  { %v3746_v61 = vmul.f32 %v9500_v33, %v9496_v49 }
0x1e42   :  { %v3928_v5 = vmul.f32 %v8413_v11, %v3921_v34 }
0x1e43   :  { %9041 = vmatmul.mubr.msk.f32.vlgmr.msra.gmra.mrb[50].mxu1 %vm438_vm7, %v3746_v61  ;;  %v10101_v61 = vld [vmem:[#allocation2 + $0x1b0] sm:$0xff] }
0x1e44   :  { %v10076_v30 = vadd.f32 %v8414_v0, %v3928_v5  ;;  %9397 = vmatpush3.bf16.msra.mxu1 %v9394_v51  ;;  %v10141_v51 = vld [vmem:[#allocation2 + $0x298] ss:$0 sm:$0xff] }
0x1e45   :  { %9399 = vmatprep.subr.bf16.mxu1 %v9398_v55 }
0x1e46   :  { %9056 = vmatprep.mubr.msk.f32.mxu1 %vm152_vm5, %v10076_v30 }
0x1e48   :  { %9401 = vmatpush3.bf16.msra.mxu1 %v9398_v55  ;;  %v10146_v55 = vld [vmem:[#allocation2 + $0x1b8] sm:$0xff] }
0x1e49   :  { %9078 = vmatprep.subr.mxu1 %v9601_v1 }
0x1f16   :  { %v3816_v14 = vpop.f32.mrb[50].mxu1 }
0x1f17   :  { %v9042_v18 = vpop.f32.mrb[51].mxu1  ;;  %9046 = vmatmul.mubr.msk.f32.vlgmr.msra.gmra.mrb[44].mxu0 %vm438_vm7, %v3816_v14 }
0x1f18   :  { %v10106_v18 = vld [vmem:[#allocation2 + $0x1a9] ss:$0 sm:$0xff] }
0x1fea   :  { %v3889_v35 = vpop.f32.mrb[44].mxu0 }
0x1feb   :  { %v3893_v60 = vadd.f32 %v3889_v35, %v3447_v53  ;;  %v9047_v24 = vpop.f32.mrb[45].mxu0  ;;  %v9406_v53 = vpack.c.bf16 %v4032_v40, %v4031_v6  ;;  %v10155_v6 = vld [vmem:[#allocation2 + $0x1f8] sm:$0xff] }
0x1fed   :  { %v3894_v37 = vadd.f32 %v8372_v9, %v3893_v60  ;;  %v10108_v60 = vld [vmem:[#allocation2 + $0x1aa] ss:$0 sm:$0xff] }
0x1fef   :  { %v3896_v39 = vadd.f32 %v3894_v37, %v9910_v48  ;;  %v4029_v48 = vld [vmem:[#allocation2 + $0x158] sm:$0xff] }
0x1ff0   :  { %v9402_v63 = vpack.c.bf16 %v4030_v62, %v4029_v48 }
0x1ff1   :  { %v3900_v45 = vsel %vm152_vm5, %v3896_v39, 0.0 }
0x1ff2   :  { %3901 = vadd.xlane.f32.xlu0 %v3900_v45  ;;  %9403 = vmatprep.subr.bf16.mxu0 %v9402_v63  ;;  %v10123_v45 = vld [vmem:[#allocation2 + $0x1f0] sm:$0xff] }
0x1ff3   :  { %9405 = vmatpush3.bf16.msra.mxu0 %v9402_v63 }
0x1ff4   :  { %9407 = vmatprep.subr.bf16.mxu0 %v9406_v53 }
0x1ff7   :  { %9409 = vmatpush3.bf16.msra.mxu0 %v9406_v53 }
0x1ff8   :  { %9411 = vmatprep.subr.bf16.mxu0 %v9410_v31 }
0x1ffb   :  { %9413 = vmatpush3.bf16.msra.mxu0 %v9410_v31 }
0x1ffc   :  { %9415 = vmatprep.subr.bf16.mxu0 %v9414_v25 }
0x1fff   :  { %9417 = vmatpush3.bf16.msra.mxu0 %v9414_v25 }
0x2000   :  { %9093 = vmatprep.subr.mxu0 %v9601_v1 }
0x207f   :  { %v3902_v41 = vpop.xlane.xlu0 %3901 }
0x2080   :  { %v3904_v42 = vmul.f32 0.03125, %v3902_v41 }
0x2082   :  { %v3906_v43 = vsub.f32 %v3896_v39, %v3904_v42  ;;  %v10114_v39 = vld [vmem:[#allocation2 + $0x1d0] sm:$0xff] }
0x2084   :  { %v3908_v28 = vmul.f32 %v3906_v43, %v3906_v43 }
0x2086   :  { %v3912_v44 = vsel %vm152_vm5, %v3908_v28, 0.0 }
0x2087   :  { %3913 = vadd.xlane.f32.xlu0 %v3912_v44  ;;  %v10138_v44 = vld [vmem:[#allocation2 + $0x290] ss:$0 sm:$0xff] }
0x2114   :  { %v3914_v13 = vpop.xlane.xlu0 %3913 }
0x2115   :  { %v3916_v15 = vmul.f32 0.03125, %v3914_v13 }
0x2117   :  { %v3918_v9 = vadd.f32 1e-05, %v3916_v15  ;;  %v10171_v15 = vld [vmem:[#allocation2 + $0x299] ss:$0 sm:$0xff] }
0x2119   :  { %9501 = vrsqrt.f32 %v3918_v9 }
0x2123   :  { %v9502_v19 = vpop.eup %9501 }
0x2124   :  { %v3922_v36 = vmul.f32 %v9502_v19, %v3906_v43  ;;  %v10136_v43 = vld [vmem:[#allocation2 + $0x294] ss:$0 sm:$0xff] }
0x2126   :  { %v3929_v54 = vmul.f32 %v8413_v11, %v3922_v36 }
0x2128   :  { %v10085_v21 = vadd.f32 %v8414_v0, %v3929_v54 }
0x212a   :  { %9057 = vmatmul.mubr.msk.f32.vlgmr.msra.gmra.mrb[52].mxu1 %vm152_vm5, %v10085_v21 }
0x212b   :  { %9080 = vmatprep.mubr.msk.f32.mxu1 %vm9602_vm6, %v9601_v1  ;;  %9079 = vmatpush3.xpose.msk.msra.mxu1 %vm152_vm5, %v10101_v61 }
0x212c   :  { %9083 = vmatprep.subr.mxu1 %v9601_v1 }
0x21fd   :  { %v9058_v2 = vpop.f32.mrb[52].mxu1 }
0x21fe   :  { %v4024_v23 = vadd.f32 %v9058_v2, %v8415_v59  ;;  %v4018_v57 = vpop.f32.mrb[53].mxu1 }
0x21ff   :  { %v4019_v26 = vadd.f32 %v8415_v59, %v4018_v57 }
0x2200   :  { %v4028_v8 = vmax.f32 %v4024_v23, 0.0 }
0x2201   :  { %v4027_v27 = vmax.f32 %v4019_v26, 0.0  ;;  %v10176_v26 = vld [vmem:[#allocation2 + $0x1d8] sm:$0xff] }
0x2203   :  { %9075 = vmatprep.mubr.msk.f32.mxu0 %vm4042_vm8, %v4027_v27 }
0x2204   :  { %9076 = vmatmul.mubr.msk.f32.vlgmr.msra.gmra.mrb[46].mxu0 %vm4042_vm8, %v4028_v8 }
0x2205   :  { %9095 = vmatprep.mubr.msk.f32.mxu0 %vm9602_vm6, %v9601_v1 }
0x22d7   :  { %v9077_v3 = vpop.f32.mrb[46].mxu0 }
0x22d8   :  { %v10096_v49 = vadd.f32 %v9077_v3, %v8418_v22  ;;  %v4115_v4 = vpop.f32.mrb[47].mxu0 }
0x22d9   :  { %v4116_v58 = vadd.f32 %v8418_v22, %v4115_v4  ;;  %v10188_v22 = vld [vmem:[#allocation2 + $0x295] ss:$0 sm:$0xff]  ;;  %v10190_v4 = vld [vmem:[#allocation2 + $0x291] ss:$0 sm:$0xff] }
0x22db   :  { %v4124_v17 = vadd.f32 %v4116_v58, %v10076_v30 }
0x22dd   :  { %v4126_v7 = vsel %vm152_vm5, %v4124_v17, 0.0 }
0x22de   :  { %4127 = vadd.xlane.f32.xlu1 %v4126_v7 }
0x236b   :  { %v4128_v29 = vpop.xlane.xlu1 %4127 }
0x236c   :  { %v4132_v32 = vmul.f32 0.03125, %v4128_v29 }
0x236e   :  { %v4134_v11 = vsub.f32 %v4124_v17, %v4132_v32 }
0x2370   :  { %v4136_v33 = vmul.f32 %v4134_v11, %v4134_v11 }
0x2372   :  { %v4138_v34 = vsel %vm152_vm5, %v4136_v33, 0.0 }
0x2373   :  { %4139 = vadd.xlane.f32.xlu0 %v4138_v34 }
0x2400   :  { %v4140_v0 = vpop.xlane.xlu0 %4139 }
0x2401   :  { %v4144_v5 = vmul.f32 0.03125, %v4140_v0 }
0x2403   :  { %v4146_v30 = vadd.f32 1e-05, %v4144_v5 }
0x2405   :  { %9503 = vrsqrt.f32 %v4146_v30 }
0x240f   :  { %v9504_v14 = vpop.eup %9503 }
0x2410   :  { %v4150_v35 = vmul.f32 %v9504_v14, %v4134_v11 }
0x2412   :  { %v4157_v24 = vmul.f32 %v10106_v18, %v4150_v35 }
0x2414   :  { %v10112_v37 = vadd.f32 %v10108_v60, %v4157_v24  ;;  %v10202_v24 = vld [vmem:[#allocation2 + $0x218] sm:$0xff] }
0x2416   :  { %9081 = vmatmul.mubr.msk.f32.vlgmr.msra.gmra.mrb[54].mxu1 %vm152_vm5, %v10112_v37 }
0x2417   :  { %9084 = vmatpush3.xpose.msk.msra.mxu1 %vm152_vm5, %v10114_v39  ;;  %9085 = vmatprep.mubr.msk.f32.mxu1 %vm9602_vm6, %v9601_v1 }
0x2418   :  { %9088 = vmatprep.subr.mxu1 %v9601_v1 }
0x241a   :  { %9086 = vmatmul.mubr.msk.f32.vlgmr.msra.gmra.mrb[56].mxu1 %vm152_vm5, %v10112_v37 }
0x241b   :  { %9089 = vmatpush3.xpose.msk.msra.mxu1 %vm152_vm5, %v10123_v45  ;;  %9090 = vmatprep.mubr.msk.f32.mxu1 %vm9602_vm6, %v9601_v1 }
0x241c   :  { %9098 = vmatprep.subr.mxu1 %v9601_v1 }
0x241e   :  { %9091 = vmatmul.mubr.msk.f32.vlgmr.msra.gmra.mrb[58].mxu1 %vm152_vm5, %v10112_v37 }
0x241f   :  { %9100 = vmatprep.mubr.msk.f32.mxu1 %vm9602_vm6, %v9601_v1 }
0x24e9   :  { %v4247_v41 = vpop.f32.mrb[54].mxu1 }
0x24ea   :  { %v9082_v42 = vpop.f32.mrb[55].mxu1  ;;  %v4248_v50 = vadd.f32 %v10138_v44, %v4247_v41 }
0x24ed   :  { %v4325_v28 = vpop.f32.mrb[56].mxu1 }
0x24ee   :  { %v4326_v46 = vadd.f32 %v10136_v43, %v4325_v28  ;;  %v9087_v47 = vpop.f32.mrb[57].mxu1 }
0x24ef   :  { %v10214_v47 = vld [vmem:[#allocation2 + $0x1e0] sm:$0xff] }
0x24f0   :  { %9094 = vmatpush3.xpose.msk.msra.mxu0 %vm438_vm7, %v4326_v46  ;;  %v10206_v46 = vld [vmem:[#allocation2 + $0x210] sm:$0xff] }
0x24f1   :  { %v4403_v52 = vpop.f32.mrb[58].mxu1  ;;  %9103 = vmatprep.subr.mxu0 %v9601_v1 }
0x24f2   :  { %v4404_v48 = vadd.f32 %v10141_v51, %v4403_v52  ;;  %v9092_v62 = vpop.f32.mrb[59].mxu1 }
0x24f3   :  { %9096 = vmatmul.mubr.msk.f32.vlgmr.msra.gmra.mrb[48].mxu0 %vm438_vm7, %v4248_v50  ;;  %v10225_v50 = vld [vmem:[#allocation2 + $0x1c0] sm:$0xff] }
0x24f4   :  { %9099 = vmatpush3.msra.mxu1 %v4404_v48  ;;  %9104 = vmatpush3.xpose.msk.msra.mxu0 %vm152_vm5, %v10146_v55  ;;  %v10233_v62 = vld [vmem:[#allocation2 + $0x200] sm:$0xff] }
0x24f5   :  { %9105 = vmatprep.mubr.msk.f32.mxu0 %vm9602_vm6, %v9601_v1  ;;  %9113 = vmatprep.subr.mxu0 %v9601_v1 }
0x24f6   :  { %9108 = vmatprep.subr.mxu1 %v9601_v1 }
0x24f7   :  { %9106 = vmatmul.mubr.msk.f32.vlgmr.msra.gmra.mrb[50].mxu0 %vm152_vm5, %v10112_v37 }
0x24f8   :  { %9114 = vmatpush3.xpose.msk.msra.mxu0 %vm152_vm5, %v10155_v6  ;;  %9115 = vmatprep.mubr.msk.f32.mxu0 %vm9602_vm6, %v9601_v1 }
0x24f9   :  { %9123 = vmatprep.subr.mxu0 %v9601_v1 }
0x24fb   :  { %9116 = vmatmul.mubr.msk.f32.vlgmr.msra.gmra.mrb[52].mxu0 %vm152_vm5, %v10112_v37 }
0x24fc   :  { %9125 = vmatprep.mubr.msk.f32.mxu0 %vm9602_vm6, %v9601_v1 }
0x25c6   :  { %v4479_v63 = vpop.f32.mrb[48].mxu0 }
0x25c7   :  { %v4483_v40 = vmul.f32 0.35355338, %v4479_v63  ;;  %v9097_v53 = vpop.f32.mrb[49].mxu0 }
0x25c8   :  { %v10244_v53 = vld [vmem:[#allocation2 + $0x296] ss:$0 sm:$0xff] }
0x25c9   :  { %v4484_v10 = vadd.f32 %v4483_v40, %v9732_v16 }
0x25ca   :  { %v4647_v12 = vpop.f32.mrb[50].mxu0 }
0x25cb   :  { %v9107_v31 = vpop.f32.mrb[51].mxu0  ;;  %v4485_v13 = vsel %vm438_vm7, %v4484_v10, -inf  ;;  %v4648_v7 = vadd.f32 %v10190_v4, %v4647_v12 }
0x25cc   :  { %4486 = vmax.xlane.f32.xlu1 %v4485_v13 }
0x25ce   :  { %v4803_v9 = vpop.f32.mrb[52].mxu0 }
0x25cf   :  { %v4804_v19 = vadd.f32 %v10171_v15, %v4803_v9  ;;  %v9117_v36 = vpop.f32.mrb[53].mxu0 }
0x25d0   :  { %v10253_v36 = vld [vmem:[#allocation2 + $0x292] ss:$0 sm:$0xff] }
0x25d1   :  { %9124 = vmatpush3.msra.mxu0 %v4804_v19 }
0x25d2   :  { %9133 = vmatprep.subr.mxu0 %v9601_v1 }
0x2659   :  { %v4487_v54 = vpop.xlane.xlu1 %4486 }
0x265a   :  { %v4488_v38 = vsub.f32 %v4484_v10, %v4487_v54 }
0x265c   :  { %v4489_v56 = vmul.f32 1.442695, %v4488_v38 }
0x265e   :  { %9505 = vpow2.f32 %v4489_v56 }
0x2668   :  { %v9506_v25 = vpop.eup %9505 }
0x2669   :  { %v4491_v59 = vsel %vm438_vm7, %v9506_v25, 0.0 }
0x266a   :  { %4492 = vadd.xlane.f32.xlu0 %v4491_v59 }
0x26f7   :  { %v4493_v2 = vpop.xlane.xlu0 %4492 }
0x26f8   :  { %9507 = vrcp.f32 %v4493_v2 }
0x2702   :  { %v9508_v23 = vpop.eup %9507 }
0x2703   :  { %v4495_v57 = vmul.f32 %v9508_v23, %v9506_v25  ;;  %v10256_v25 = vld [vmem:[#allocation2 + $0x29a] ss:$0 sm:$0xff] }
0x2705   :  { %9101 = vmatmul.mubr.msk.f32.vlgmr.msra.gmra.mrb[60].mxu1 %vm438_vm7, %v4495_v57 }
0x2706   :  { %9109 = vmatpush3.xpose.msk.msra.mxu1 %vm152_vm5, %v10176_v26  ;;  %9110 = vmatprep.mubr.msk.f32.mxu1 %vm9602_vm6, %v9601_v1 }
0x2707   :  { %9118 = vmatprep.subr.mxu1 %v9601_v1 }
0x2709   :  { %9111 = vmatmul.mubr.msk.f32.vlgmr.msra.gmra.mrb[62].mxu1 %vm152_vm5, %v10112_v37 }
0x270a   :  { %9120 = vmatprep.mubr.msk.f32.mxu1 %vm9602_vm6, %v9601_v1 }
0x27d8   :  { %v4565_v27 = vpop.f32.mrb[60].mxu1 }
0x27d9   :  { %v9102_v8 = vpop.f32.mrb[61].mxu1 }
0x27dc   :  { %v4725_v3 = vpop.f32.mrb[62].mxu1 }
0x27dd   :  { %v4726_v58 = vadd.f32 %v10188_v22, %v4725_v3  ;;  %v9112_v17 = vpop.f32.mrb[63].mxu1 }
0x27df   :  { %9119 = vmatpush3.xpose.msk.msra.mxu1 %vm438_vm7, %v4726_v58 }
0x27e0   :  { %9128 = vmatprep.subr.mxu1 %v9601_v1 }
0x27e2   :  { %9121 = vmatmul.mubr.msk.f32.vlgmr.msra.gmra.mrb[64].mxu1 %vm438_vm7, %v4648_v7 }
0x27e3   :  { %9130 = vmatprep.mubr.msk.f32.mxu1 %vm9602_vm6, %v9601_v1  ;;  %9129 = vmatpush3.msra.mxu1 %v10202_v24 }
0x27e4   :  { %9138 = vmatprep.subr.mxu1 %v9601_v1 }
0x28b5   :  { %v4879_v29 = vpop.f32.mrb[64].mxu1 }
0x28b6   :  { %v4883_v32 = vmul.f32 0.35355338, %v4879_v29  ;;  %v9122_v11 = vpop.f32.mrb[65].mxu1 }
0x28b8   :  { %v4884_v33 = vadd.f32 %v4883_v32, %v9732_v16 }
0x28ba   :  { %v4885_v34 = vsel %vm438_vm7, %v4884_v33, -inf }
0x28bb   :  { %4886 = vmax.xlane.f32.xlu1 %v4885_v34 }
0x2948   :  { %v4887_v0 = vpop.xlane.xlu1 %4886 }
0x2949   :  { %v4888_v5 = vsub.f32 %v4884_v33, %v4887_v0  ;;  %v10266_v33 = vld [vmem:[#allocation2 + $0x220] sm:$0xff] }
0x294b   :  { %v4889_v30 = vmul.f32 1.442695, %v4888_v5 }
0x294d   :  { %9509 = vpow2.f32 %v4889_v30  ;;  %v10270_v30 = vld [vmem:[#allocation2 + $0x1c8] sm:$0xff] }
0x2957   :  { %v9510_v14 = vpop.eup %9509 }
0x2958   :  { %v4891_v35 = vsel %vm438_vm7, %v9510_v14, 0.0 }
0x2959   :  { %4892 = vadd.xlane.f32.xlu0 %v4891_v35  ;;  %v10291_v35 = vld [vmem:[#allocation2 + $0x1e8] sm:$0xff] }
0x29e6   :  { %v4893_v41 = vpop.xlane.xlu0 %4892 }
0x29e7   :  { %9511 = vrcp.f32 %v4893_v41 }
0x29f1   :  { %v9512_v42 = vpop.eup %9511 }
0x29f2   :  { %v4895_v28 = vmul.f32 %v9512_v42, %v9510_v14  ;;  %v10278_v14 = vld [vmem:[#allocation2 + $0x208] sm:$0xff] }
0x29f4   :  { %9126 = vmatmul.mubr.msk.f32.vlgmr.msra.gmra.mrb[54].mxu0 %vm438_vm7, %v4895_v28 }
0x29f5   :  { %9134 = vmatpush3.msra.mxu0 %v10206_v46  ;;  %9135 = vmatprep.mubr.msk.f32.mxu0 %vm9602_vm6, %v9601_v1 }
0x29f6   :  { %9143 = vmatprep.subr.mxu0 %v9601_v1 }
0x29f8   :  { %9136 = vmatmul.mubr.msk.f32.vlgmr.msra.gmra.mrb[56].mxu0 %vm438_vm7, %v4565_v27 }
0x29f9   :  { %9145 = vmatprep.mubr.msk.f32.mxu0 %vm9602_vm6, %v9601_v1 }
0x29fc   :  { %9144 = vmatpush3.xpose.msk.msra.mxu0 %vm152_vm5, %v10214_v47 }
0x29fd   :  { %9153 = vmatprep.subr.mxu0 %v9601_v1 }
0x29ff   :  { %9146 = vmatmul.mubr.msk.f32.vlgmr.msra.gmra.mrb[58].mxu0 %vm152_vm5, %v10112_v37 }
0x2a00   :  { %9155 = vmatprep.mubr.msk.f32.mxu0 %vm9602_vm6, %v9601_v1 }
0x2ac7   :  { %v4965_v52 = vpop.f32.mrb[54].mxu0 }
0x2ac8   :  { %v9127_v48 = vpop.f32.mrb[55].mxu0  ;;  %9131 = vmatmul.mubr.msk.f32.vlgmr.msra.gmra.mrb[66].mxu1 %vm438_vm7, %v4965_v52 }
0x2ac9   :  { %9139 = vmatpush3.xpose.msk.msra.mxu1 %vm152_vm5, %v10225_v50  ;;  %9140 = vmatprep.mubr.msk.f32.mxu1 %vm9602_vm6, %v9601_v1  ;;  %v10301_v48 = vld [vmem:[#allocation2 + $0x29b] ss:$0 sm:$0xff] }
0x2aca   :  { %9148 = vmatprep.subr.mxu1 %v9601_v1 }
0x2acb   :  { %v5111_v63 = vpop.f32.mrb[56].mxu0 }
0x2acc   :  { %v9137_v40 = vpop.f32.mrb[57].mxu0  ;;  %9141 = vmatmul.mubr.msk.f32.vlgmr.msra.gmra.mrb[68].mxu1 %vm152_vm5, %v10112_v37 }
0x2acd   :  { %9149 = vmatpush3.xpose.msk.msra.mxu1 %vm152_vm5, %v10233_v62  ;;  %9150 = vmatprep.mubr.msk.f32.mxu1 %vm9602_vm6, %v9601_v1 }
0x2ace   :  { %9158 = vmatprep.subr.mxu1 %v9601_v1 }
0x2ad0   :  { %9151 = vmatmul.mubr.msk.f32.vlgmr.msra.gmra.mrb[70].mxu1 %vm152_vm5, %v10112_v37 }
0x2ad1   :  { %9160 = vmatprep.mubr.msk.f32.mxu1 %vm9602_vm6, %v9601_v1 }
0x2ad2   :  { %v5271_v10 = vpop.f32.mrb[58].mxu0 }
0x2ad3   :  { %v5272_v12 = vadd.f32 %v10244_v53, %v5271_v10  ;;  %v9147_v31 = vpop.f32.mrb[59].mxu0 }
0x2ad5   :  { %9154 = vmatpush3.xpose.msk.msra.mxu0 %vm438_vm7, %v5272_v12 }
0x2ad6   :  { %9163 = vmatprep.subr.mxu0 %v9601_v1 }
0x2b9b   :  { %v5038_v13 = vpop.f32.mrb[66].mxu1 }
0x2b9c   :  { %v10251_v9 = vadd.f32 %v5111_v63, %v5038_v13  ;;  %v9132_v19 = vpop.f32.mrb[67].mxu1 }
0x2b9d   :  { %v10310_v19 = vld [vmem:[#allocation2 + $0x297] ss:$0 sm:$0xff] }
0x2b9f   :  { %v5193_v54 = vpop.f32.mrb[68].mxu1 }
0x2ba0   :  { %v5194_v38 = vadd.f32 %v10253_v36, %v5193_v54  ;;  %v9142_v56 = vpop.f32.mrb[69].mxu1 }
0x2ba2   :  { %9156 = vmatmul.mubr.msk.f32.vlgmr.msra.gmra.mrb[60].mxu0 %vm438_vm7, %v5194_v38  ;;  %v10312_v38 = vld [vmem:[#allocation2 + $0x293] ss:$0 sm:$0xff] }
0x2ba3   :  { %v5349_v59 = vpop.f32.mrb[70].mxu1  ;;  %9165 = vmatprep.mubr.msk.f32.mxu0 %vm9602_vm6, %v9601_v1  ;;  %9164 = vmatpush3.msra.mxu0 %v10266_v33 }
0x2ba4   :  { %v5350_v2 = vadd.f32 %v10256_v25, %v5349_v59  ;;  %v9152_v23 = vpop.f32.mrb[71].mxu1  ;;  %9173 = vmatprep.subr.mxu0 %v9601_v1 }
0x2ba6   :  { %9159 = vmatpush3.msra.mxu1 %v5350_v2 }
0x2ba7   :  { %9168 = vmatprep.subr.mxu1 %v9601_v1 }
0x2c75   :  { %v5425_v57 = vpop.f32.mrb[60].mxu0 }
0x2c76   :  { %v5429_v27 = vmul.f32 0.35355338, %v5425_v57  ;;  %v9157_v8 = vpop.f32.mrb[61].mxu0 }
0x2c78   :  { %v5430_v3 = vadd.f32 %v5429_v27, %v9732_v16 }
0x2c7a   :  { %v5431_v58 = vsel %vm438_vm7, %v5430_v3, -inf }
0x2c7b   :  { %5432 = vmax.xlane.f32.xlu1 %v5431_v58 }
0x2d08   :  { %v5433_v17 = vpop.xlane.xlu1 %5432 }
0x2d09   :  { %v5434_v7 = vsub.f32 %v5430_v3, %v5433_v17  ;;  %v4125_v3 = vadd.f32 %v10096_v49, %v10085_v21  ;;  %v10328_v21 = vld [vmem:[#allocation2 + $0x228] sm:$0xff] }
0x2d0b   :  { %v5435_v29 = vmul.f32 1.442695, %v5434_v7  ;;  %v4129_v58 = vsel %vm152_vm5, %v4125_v3, 0.0 }
0x2d0d   :  { %9513 = vpow2.f32 %v5435_v29 }
0x2d17   :  { %v9514_v32 = vpop.eup %9513 }
0x2d18   :  { %v5437_v11 = vsel %vm438_vm7, %v9514_v32, 0.0 }
0x2d19   :  { %5438 = vadd.xlane.f32.xlu0 %v5437_v11 }
0x2da6   :  { %v5439_v34 = vpop.xlane.xlu0 %5438 }
0x2da7   :  { %9515 = vrcp.f32 %v5439_v34 }
0x2db1   :  { %v9516_v0 = vpop.eup %9515 }
0x2db2   :  { %v5441_v5 = vmul.f32 %v9516_v0, %v9514_v32 }
0x2db4   :  { %9161 = vmatmul.mubr.msk.f32.vlgmr.msra.gmra.mrb[72].mxu1 %vm438_vm7, %v5441_v5 }
0x2db5   :  { %9169 = vmatpush3.xpose.msk.msra.mxu1 %vm152_vm5, %v10270_v30  ;;  %9170 = vmatprep.mubr.msk.f32.mxu1 %vm9602_vm6, %v9601_v1 }
0x2db6   :  { %9178 = vmatprep.subr.mxu1 %v9601_v1 }
0x2db8   :  { %9171 = vmatmul.mubr.msk.f32.vlgmr.msra.gmra.mrb[74].mxu1 %vm152_vm5, %v10112_v37 }
0x2db9   :  { %9179 = vmatpush3.xpose.msk.msra.mxu1 %vm152_vm5, %v10278_v14  ;;  %9180 = vmatprep.mubr.msk.f32.mxu1 %vm9602_vm6, %v9601_v1 }
0x2dba   :  { %9188 = vmatprep.subr.mxu1 %v9601_v1 }
0x2dbc   :  { %9181 = vmatmul.mubr.msk.f32.vlgmr.msra.gmra.mrb[76].mxu1 %vm152_vm5, %v10112_v37 }
0x2dbd   :  { %9190 = vmatprep.mubr.msk.f32.mxu1 %vm9602_vm6, %v9601_v1 }
0x2e87   :  { %v5511_v41 = vpop.f32.mrb[72].mxu1 }
0x2e88   :  { %v9162_v42 = vpop.f32.mrb[73].mxu1  ;;  %9166 = vmatmul.mubr.msk.f32.vlgmr.msra.gmra.mrb[62].mxu0 %vm438_vm7, %v5511_v41 }
0x2e89   :  { %9174 = vmatpush3.xpose.msk.msra.mxu0 %vm152_vm5, %v10291_v35  ;;  %9175 = vmatprep.mubr.msk.f32.mxu0 %vm9602_vm6, %v9601_v1 }
0x2e8a   :  { %9183 = vmatprep.subr.mxu0 %v9601_v1 }
0x2e8b   :  { %v5667_v28 = vpop.f32.mrb[74].mxu1 }
0x2e8c   :  { %v9172_v52 = vpop.f32.mrb[75].mxu1  ;;  %9176 = vmatmul.mubr.msk.f32.vlgmr.msra.gmra.mrb[64].mxu0 %vm152_vm5, %v10112_v37  ;;  %v5668_v2 = vadd.f32 %v10312_v38, %v5667_v28 }
0x2e8d   :  { %9185 = vmatprep.mubr.msk.f32.mxu0 %vm9602_vm6, %v9601_v1 }
0x2e8f   :  { %v5823_v63 = vpop.f32.mrb[76].mxu1 }
0x2e90   :  { %v5824_v40 = vadd.f32 %v10301_v48, %v5823_v63  ;;  %v9182_v10 = vpop.f32.mrb[77].mxu1 }
0x2e92   :  { %9189 = vmatpush3.msra.mxu1 %v5824_v40 }
0x2e93   :  { %9198 = vmatprep.subr.mxu1 %v9601_v1 }
0x2f5b   :  { %v5584_v12 = vpop.f32.mrb[62].mxu0 }
0x2f5c   :  { %v10308_v31 = vadd.f32 %v5584_v12, %v10251_v9  ;;  %v9167_v13 = vpop.f32.mrb[63].mxu0 }
0x2f5f   :  { %v5745_v54 = vpop.f32.mrb[64].mxu0 }
0x2f60   :  { %v5746_v56 = vadd.f32 %v10310_v19, %v5745_v54  ;;  %v9177_v59 = vpop.f32.mrb[65].mxu0 }
0x2f62   :  { %9184 = vmatpush3.xpose.msk.msra.mxu0 %vm438_vm7, %v5746_v56 }
0x2f63   :  { %9193 = vmatprep.subr.mxu0 %v9601_v1 }
0x2f65   :  { %9186 = vmatmul.mubr.msk.f32.vlgmr.msra.gmra.mrb[66].mxu0 %vm438_vm7, %v5668_v2 }
0x2f66   :  { %9195 = vmatprep.mubr.msk.f32.mxu0 %vm9602_vm6, %v9601_v1  ;;  %9194 = vmatpush3.msra.mxu0 %v10328_v21 }
0x2f67   :  { %9203 = vmatprep.subr.mxu0 %v9601_v1 }
0x3038   :  { %v5899_v9 = vpop.f32.mrb[66].mxu0 }
0x3039   :  { %v5903_v23 = vmul.f32 0.35355338, %v5899_v9  ;;  %v9187_v57 = vpop.f32.mrb[67].mxu0 }
0x303b   :  { %v5904_v27 = vadd.f32 %v5903_v23, %v9732_v16 }
0x303d   :  { %v5905_v8 = vsel %vm438_vm7, %v5904_v27, -inf }
0x303e   :  { %5906 = vmax.xlane.f32.xlu1 %v5905_v8 }
0x3042   :  { %4130 = vadd.xlane.f32.xlu1 %v4129_v58 }
0x30cb   :  { %v5907_v17 = vpop.xlane.xlu1 %5906 }
0x30cc   :  { %v5908_v7 = vsub.f32 %v5904_v27, %v5907_v17 }
0x30ce   :  { %v5909_v29 = vmul.f32 1.442695, %v5908_v7 }
0x30cf   :  { %v4131_v32 = vpop.xlane.xlu1 %4130 }
0x30d0   :  { %9517 = vpow2.f32 %v5909_v29  ;;  %v4133_v11 = vmul.f32 0.03125, %v4131_v32 }
0x30d2   :  { %v4135_v34 = vsub.f32 %v4125_v3, %v4133_v11 }
0x30d4   :  { %v4137_v16 = vmul.f32 %v4135_v34, %v4135_v34 }
0x30d6   :  { %v4141_v41 = vsel %vm152_vm5, %v4137_v16, 0.0 }
0x30da   :  { %v9518_v0 = vpop.eup %9517 }
0x30db   :  { %v5911_v5 = vsel %vm438_vm7, %v9518_v0, 0.0 }
0x30dc   :  { %5912 = vadd.xlane.f32.xlu0 %v5911_v5 }
0x30e0   :  { %4142 = vadd.xlane.f32.xlu0 %v4141_v41 }
0x3169   :  { %v5913_v49 = vpop.xlane.xlu0 %5912 }
0x316a   :  { %9519 = vrcp.f32 %v5913_v49 }
0x316d   :  { %v4143_v42 = vpop.xlane.xlu0 %4142 }
0x316e   :  { %v4145_v28 = vmul.f32 0.03125, %v4143_v42 }
0x3170   :  { %v4147_v52 = vadd.f32 1e-05, %v4145_v28 }
0x3172   :  { %9521 = vrsqrt.f32 %v4147_v52 }
0x3174   :  { %v9520_v63 = vpop.eup %9519 }
0x3175   :  { %v5915_v40 = vmul.f32 %v9520_v63, %v9518_v0 }
0x3177   :  { %9191 = vmatmul.mubr.msk.f32.vlgmr.msra.gmra.mrb[78].mxu1 %vm438_vm7, %v5915_v40 }
0x3178   :  { %9199 = vmatpush3.xpose.msk.msra.mxu1 %vm152_vm5, %v10101_v61  ;;  %9200 = vmatprep.mubr.msk.f32.mxu1 %vm9602_vm6, %v9601_v1 }
0x3179   :  { %9208 = vmatprep.subr.mxu1 %v9601_v1 }
0x317c   :  { %v9522_v10 = vpop.eup %9521 }
0x317d   :  { %v4151_v12 = vmul.f32 %v9522_v10, %v4135_v34 }
0x317f   :  { %v4158_v13 = vmul.f32 %v10106_v18, %v4151_v12 }
0x3181   :  { %v10340_v54 = vadd.f32 %v10108_v60, %v4158_v13 }
0x3183   :  { %9201 = vmatmul.mubr.msk.f32.vlgmr.msra.gmra.mrb[80].mxu1 %vm152_vm5, %v10340_v54 }
0x3184   :  { %9209 = vmatpush3.xpose.msk.msra.mxu1 %vm152_vm5, %v10123_v45  ;;  %9210 = vmatprep.mubr.msk.f32.mxu1 %vm9602_vm6, %v9601_v1 }
0x3185   :  { %9218 = vmatprep.subr.mxu1 %v9601_v1 }
0x3187   :  { %9211 = vmatmul.mubr.msk.f32.vlgmr.msra.gmra.mrb[82].mxu1 %vm152_vm5, %v10340_v54 }
0x3188   :  { %9220 = vmatprep.mubr.msk.f32.mxu1 %vm9602_vm6, %v9601_v1 }
0x324a   :  { %v5985_v61 = vpop.f32.mrb[78].mxu1 }
0x324b   :  { %v9192_v18 = vpop.f32.mrb[79].mxu1  ;;  %9196 = vmatmul.mubr.msk.f32.vlgmr.msra.gmra.mrb[68].mxu0 %vm438_vm7, %v5985_v61 }
0x324c   :  { %9204 = vmatpush3.xpose.msk.msra.mxu0 %vm152_vm5, %v10114_v39  ;;  %9205 = vmatprep.mubr.msk.f32.mxu0 %vm9602_vm6, %v9601_v1 }
0x324d   :  { %9213 = vmatprep.subr.mxu0 %v9601_v1 }
0x324f   :  { %9206 = vmatmul.mubr.msk.f32.vlgmr.msra.gmra.mrb[70].mxu0 %vm152_vm5, %v10340_v54 }
0x3250   :  { %9215 = vmatprep.mubr.msk.f32.mxu0 %vm9602_vm6, %v9601_v1 }
0x3256   :  { %v6138_v60 = vpop.f32.mrb[80].mxu1 }
0x3257   :  { %v9202_v45 = vpop.f32.mrb[81].mxu1  ;;  %v6139_v3 = vadd.f32 %v10138_v44, %v6138_v60 }
0x325a   :  { %v6278_v56 = vpop.f32.mrb[82].mxu1 }
0x325b   :  { %v6279_v59 = vadd.f32 %v10141_v51, %v6278_v56  ;;  %v9212_v2 = vpop.f32.mrb[83].mxu1 }
0x325d   :  { %9219 = vmatpush3.msra.mxu1 %v6279_v59 }
0x325e   :  { %9228 = vmatprep.subr.mxu1 %v9601_v1 }
0x331e   :  { %v6058_v39 = vpop.f32.mrb[68].mxu0 }
0x331f   :  { %v10366_v9 = vadd.f32 %v6058_v39, %v10308_v31  ;;  %v9197_v23 = vpop.f32.mrb[69].mxu0 }
0x3322   :  { %v6208_v57 = vpop.f32.mrb[70].mxu0 }
0x3323   :  { %v6209_v27 = vadd.f32 %v10136_v43, %v6208_v57  ;;  %v9207_v8 = vpop.f32.mrb[71].mxu0 }
0x3325   :  { %9214 = vmatpush3.xpose.msk.msra.mxu0 %vm438_vm7, %v6209_v27 }
0x3326   :  { %9223 = vmatprep.subr.mxu0 %v9601_v1 }
0x3328   :  { %9216 = vmatmul.mubr.msk.f32.vlgmr.msra.gmra.mrb[72].mxu0 %vm438_vm7, %v6139_v3 }
0x3329   :  { %9224 = vmatpush3.xpose.msk.msra.mxu0 %vm152_vm5, %v10146_v55  ;;  %9225 = vmatprep.mubr.msk.f32.mxu0 %vm9602_vm6, %v9601_v1 }
0x332a   :  { %9233 = vmatprep.subr.mxu0 %v9601_v1 }
0x332c   :  { %9226 = vmatmul.mubr.msk.f32.vlgmr.msra.gmra.mrb[74].mxu0 %vm152_vm5, %v10340_v54 }
0x332d   :  { %9234 = vmatpush3.xpose.msk.msra.mxu0 %vm152_vm5, %v10155_v6  ;;  %9235 = vmatprep.mubr.msk.f32.mxu0 %vm9602_vm6, %v9601_v1 }
0x332e   :  { %9243 = vmatprep.subr.mxu0 %v9601_v1 }
0x3330   :  { %9236 = vmatmul.mubr.msk.f32.vlgmr.msra.gmra.mrb[76].mxu0 %vm152_vm5, %v10340_v54 }
0x3331   :  { %9245 = vmatprep.mubr.msk.f32.mxu0 %vm9602_vm6, %v9601_v1 }
0x33fb   :  { %v6354_v43 = vpop.f32.mrb[72].mxu0 }
0x33fc   :  { %v6358_v44 = vmul.f32 0.35355338, %v6354_v43  ;;  %v9217_v51 = vpop.f32.mrb[73].mxu0 }
0x33fe   :  { %v6359_v55 = vadd.f32 %v6358_v44, %v9654_v20 }
0x33ff   :  { %v6510_v31 = vpop.f32.mrb[74].mxu0 }
0x3400   :  { %v9227_v58 = vpop.f32.mrb[75].mxu0  ;;  %v6360_v6 = vsel %vm438_vm7, %v6359_v55, -inf }
0x3401   :  { %6361 = vmax.xlane.f32.xlu1 %v6360_v6 }
0x3403   :  { %v6650_v17 = vpop.f32.mrb[76].mxu0 }
0x3404   :  { %v6651_v7 = vadd.f32 %v10171_v15, %v6650_v17  ;;  %v9237_v29 = vpop.f32.mrb[77].mxu0 }
0x3406   :  { %9244 = vmatpush3.msra.mxu0 %v6651_v7 }
0x3407   :  { %9253 = vmatprep.subr.mxu0 %v9601_v1 }
0x348e   :  { %v6362_v32 = vpop.xlane.xlu1 %6361 }
0x348f   :  { %v6363_v11 = vsub.f32 %v6359_v55, %v6362_v32 }
0x3491   :  { %v6364_v34 = vmul.f32 1.442695, %v6363_v11 }
0x3493   :  { %9523 = vpow2.f32 %v6364_v34 }
0x349d   :  { %v9524_v0 = vpop.eup %9523 }
0x349e   :  { %v6366_v5 = vsel %vm438_vm7, %v9524_v0, 0.0 }
0x349f   :  { %6367 = vadd.xlane.f32.xlu0 %v6366_v5 }
0x352c   :  { %v6368_v16 = vpop.xlane.xlu0 %6367 }
0x352d   :  { %9525 = vrcp.f32 %v6368_v16 }
0x3537   :  { %v9526_v41 = vpop.eup %9525 }
0x3538   :  { %v6370_v49 = vmul.f32 %v9526_v41, %v9524_v0 }
0x353a   :  { %9221 = vmatmul.mubr.msk.f32.vlgmr.msra.gmra.mrb[84].mxu1 %vm438_vm7, %v6370_v49 }
0x353b   :  { %9229 = vmatpush3.xpose.msk.msra.mxu1 %vm152_vm5, %v10176_v26  ;;  %9230 = vmatprep.mubr.msk.f32.mxu1 %vm9602_vm6, %v9601_v1  ;;  %v6511_v26 = vadd.f32 %v10190_v4, %v6510_v31 }
0x353c   :  { %9238 = vmatprep.subr.mxu1 %v9601_v1 }
0x353e   :  { %9231 = vmatmul.mubr.msk.f32.vlgmr.msra.gmra.mrb[86].mxu1 %vm152_vm5, %v10340_v54 }
0x353f   :  { %9240 = vmatprep.mubr.msk.f32.mxu1 %vm9602_vm6, %v9601_v1 }
0x360d   :  { %v6440_v15 = vpop.f32.mrb[84].mxu1 }
0x360e   :  { %v9222_v42 = vpop.f32.mrb[85].mxu1 }
0x3611   :  { %v6580_v28 = vpop.f32.mrb[86].mxu1 }
0x3612   :  { %v6581_v52 = vadd.f32 %v10188_v22, %v6580_v28  ;;  %v9232_v63 = vpop.f32.mrb[87].mxu1 }
0x3614   :  { %9239 = vmatpush3.xpose.msk.msra.mxu1 %vm438_vm7, %v6581_v52 }
0x3615   :  { %9248 = vmatprep.subr.mxu1 %v9601_v1 }
0x3617   :  { %9241 = vmatmul.mubr.msk.f32.vlgmr.msra.gmra.mrb[88].mxu1 %vm438_vm7, %v6511_v26 }
0x3618   :  { %9249 = vmatpush3.msra.mxu1 %v10202_v24  ;;  %9250 = vmatprep.mubr.msk.f32.mxu1 %vm9602_vm6, %v9601_v1 }
0x3619   :  { %9258 = vmatprep.subr.mxu1 %v9601_v1 }
0x36ea   :  { %v6726_v40 = vpop.f32.mrb[88].mxu1 }
0x36eb   :  { %v6730_v10 = vmul.f32 0.35355338, %v6726_v40  ;;  %v9242_v12 = vpop.f32.mrb[89].mxu1 }
0x36ed   :  { %v6731_v22 = vadd.f32 %v6730_v10, %v9654_v20 }
0x36ef   :  { %v6732_v13 = vsel %vm438_vm7, %v6731_v22, -inf }
0x36f0   :  { %6733 = vmax.xlane.f32.xlu1 %v6732_v13 }
0x377d   :  { %v6734_v4 = vpop.xlane.xlu1 %6733 }
0x377e   :  { %v6735_v61 = vsub.f32 %v6731_v22, %v6734_v4 }
0x3780   :  { %v6736_v18 = vmul.f32 1.442695, %v6735_v61 }
0x3782   :  { %9527 = vpow2.f32 %v6736_v18 }
0x378c   :  { %v9528_v60 = vpop.eup %9527 }
0x378d   :  { %v6738_v24 = vsel %vm438_vm7, %v9528_v60, 0.0 }
0x378e   :  { %6739 = vadd.xlane.f32.xlu0 %v6738_v24 }
0x381b   :  { %v6740_v45 = vpop.xlane.xlu0 %6739 }
0x381c   :  { %9529 = vrcp.f32 %v6740_v45 }
0x3826   :  { %v9530_v56 = vpop.eup %9529 }
0x3827   :  { %v6742_v59 = vmul.f32 %v9530_v56, %v9528_v60 }
0x3829   :  { %9246 = vmatmul.mubr.msk.f32.vlgmr.msra.gmra.mrb[78].mxu0 %vm438_vm7, %v6742_v59 }
0x382a   :  { %9254 = vmatpush3.msra.mxu0 %v10206_v46  ;;  %9255 = vmatprep.mubr.msk.f32.mxu0 %vm9602_vm6, %v9601_v1 }
0x382b   :  { %9263 = vmatprep.subr.mxu0 %v9601_v1 }
0x382d   :  { %9256 = vmatmul.mubr.msk.f32.vlgmr.msra.gmra.mrb[80].mxu0 %vm438_vm7, %v6440_v15 }
0x382e   :  { %9265 = vmatprep.mubr.msk.f32.mxu0 %vm9602_vm6, %v9601_v1 }
0x3831   :  { %9264 = vmatpush3.xpose.msk.msra.mxu0 %vm152_vm5, %v10214_v47 }
0x3832   :  { %9273 = vmatprep.subr.mxu0 %v9601_v1 }
0x3834   :  { %9266 = vmatmul.mubr.msk.f32.vlgmr.msra.gmra.mrb[82].mxu0 %vm152_vm5, %v10340_v54 }
0x3835   :  { %9275 = vmatprep.mubr.msk.f32.mxu0 %vm9602_vm6, %v9601_v1 }
0x38fc   :  { %v6812_v46 = vpop.f32.mrb[78].mxu0 }
0x38fd   :  { %v9247_v2 = vpop.f32.mrb[79].mxu0  ;;  %9251 = vmatmul.mubr.msk.f32.vlgmr.msra.gmra.mrb[90].mxu1 %vm438_vm7, %v6812_v46 }
0x38fe   :  { %9259 = vmatpush3.xpose.msk.msra.mxu1 %vm152_vm5, %v10225_v50  ;;  %9260 = vmatprep.mubr.msk.f32.mxu1 %vm9602_vm6, %v9601_v1 }
0x38ff   :  { %9268 = vmatprep.subr.mxu1 %v9601_v1 }
0x3900   :  { %v6958_v47 = vpop.f32.mrb[80].mxu0 }
0x3901   :  { %v9257_v39 = vpop.f32.mrb[81].mxu0  ;;  %9261 = vmatmul.mubr.msk.f32.vlgmr.msra.gmra.mrb[92].mxu1 %vm152_vm5, %v10340_v54 }
0x3902   :  { %9269 = vmatpush3.xpose.msk.msra.mxu1 %vm152_vm5, %v10233_v62  ;;  %9270 = vmatprep.mubr.msk.f32.mxu1 %vm9602_vm6, %v9601_v1 }
0x3903   :  { %9278 = vmatprep.subr.mxu1 %v9601_v1 }
0x3905   :  { %9271 = vmatmul.mubr.msk.f32.vlgmr.msra.gmra.mrb[94].mxu1 %vm152_vm5, %v10340_v54 }
0x3906   :  { %9280 = vmatprep.mubr.msk.f32.mxu1 %vm9602_vm6, %v9601_v1 }
0x3907   :  { %v7098_v50 = vpop.f32.mrb[82].mxu0 }
0x3908   :  { %v7099_v23 = vadd.f32 %v10244_v53, %v7098_v50  ;;  %v9267_v57 = vpop.f32.mrb[83].mxu0 }
0x390a   :  { %9274 = vmatpush3.xpose.msk.msra.mxu0 %vm438_vm7, %v7099_v23  ;;  %v8516_v23 = vld [vmem:[#allocation2 + $0x29d] ss:$0 sm:$0xff] }
0x390b   :  { %9283 = vmatprep.subr.mxu0 %v9601_v1 }
0x39d0   :  { %v6885_v62 = vpop.f32.mrb[90].mxu1 }
0x39d1   :  { %v6959_v27 = vadd.f32 %v6958_v47, %v6885_v62  ;;  %v9252_v8 = vpop.f32.mrb[91].mxu1 }
0x39d2   :  { %v8517_v8 = vld [vmem:[#allocation2 + $0x29e] ss:$0 sm:$0xff] }
0x39d4   :  { %v7028_v3 = vpop.f32.mrb[92].mxu1 }
0x39d5   :  { %v7029_v43 = vadd.f32 %v10253_v36, %v7028_v3  ;;  %v9262_v44 = vpop.f32.mrb[93].mxu1 }
0x39d7   :  { %9276 = vmatmul.mubr.msk.f32.vlgmr.msra.gmra.mrb[84].mxu0 %vm438_vm7, %v7029_v43 }
0x39d8   :  { %v7168_v51 = vpop.f32.mrb[94].mxu1  ;;  %9284 = vmatpush3.msra.mxu0 %v10266_v33  ;;  %9285 = vmatprep.mubr.msk.f32.mxu0 %vm9602_vm6, %v9601_v1 }
0x39d9   :  { %v7169_v53 = vadd.f32 %v10256_v25, %v7168_v51  ;;  %v9272_v55 = vpop.f32.mrb[95].mxu1  ;;  %9293 = vmatprep.subr.mxu0 %v9601_v1 }
0x39db   :  { %9279 = vmatpush3.msra.mxu1 %v7169_v53 }
0x39dc   :  { %9288 = vmatprep.subr.mxu1 %v9601_v1 }
0x3aaa   :  { %v7244_v31 = vpop.f32.mrb[84].mxu0 }
0x3aab   :  { %v7248_v58 = vmul.f32 0.35355338, %v7244_v31  ;;  %v9277_v36 = vpop.f32.mrb[85].mxu0 }
0x3aad   :  { %v7249_v6 = vadd.f32 %v7248_v58, %v9654_v20 }
0x3aaf   :  { %v7250_v17 = vsel %vm438_vm7, %v7249_v6, -inf }
0x3ab0   :  { %7251 = vmax.xlane.f32.xlu1 %v7250_v17 }
0x3b3d   :  { %v7252_v33 = vpop.xlane.xlu1 %7251 }
0x3b3e   :  { %v7253_v7 = vsub.f32 %v7249_v6, %v7252_v33 }
0x3b40   :  { %v7254_v29 = vmul.f32 1.442695, %v7253_v7 }
0x3b42   :  { %9531 = vpow2.f32 %v7254_v29 }
0x3b4c   :  { %v9532_v32 = vpop.eup %9531 }
0x3b4d   :  { %v7256_v25 = vsel %vm438_vm7, %v9532_v32, 0.0 }
0x3b4e   :  { %7257 = vadd.xlane.f32.xlu0 %v7256_v25  ;;  %v7897_v25 = vld [vmem:[#allocation2 + $0x230] sm:$0xff] }
0x3bdb   :  { %v7258_v11 = vpop.xlane.xlu0 %7257 }
0x3bdc   :  { %9533 = vrcp.f32 %v7258_v11  ;;  %v7898_v11 = vld [vmem:[#allocation2 + $0x238] sm:$0xff] }
0x3be6   :  { %v9534_v34 = vpop.eup %9533 }
0x3be7   :  { %v7260_v0 = vmul.f32 %v9534_v34, %v9532_v32  ;;  %v9418_v34 = vpack.c.bf16 %v7898_v11, %v7897_v25 }
0x3be9   :  { %9281 = vmatmul.mubr.msk.f32.vlgmr.msra.gmra.mrb[96].mxu1 %vm438_vm7, %v7260_v0  ;;  %v7899_v0 = vld [vmem:[#allocation2 + $0x240] sm:$0xff] }
0x3bea   :  { %9289 = vmatpush3.xpose.msk.msra.mxu1 %vm152_vm5, %v10270_v30  ;;  %9290 = vmatprep.mubr.msk.f32.mxu1 %vm9602_vm6, %v9601_v1 }
0x3beb   :  { %9298 = vmatprep.subr.mxu1 %v9601_v1 }
0x3bed   :  { %9291 = vmatmul.mubr.msk.f32.vlgmr.msra.gmra.mrb[98].mxu1 %vm152_vm5, %v10340_v54 }
0x3bee   :  { %9299 = vmatpush3.xpose.msk.msra.mxu1 %vm152_vm5, %v10278_v14  ;;  %9300 = vmatprep.mubr.msk.f32.mxu1 %vm9602_vm6, %v9601_v1 }
0x3bef   :  { %9308 = vmatprep.subr.mxu1 %v9601_v1 }
0x3bf1   :  { %9301 = vmatmul.mubr.msk.f32.vlgmr.msra.gmra.mrb[100].mxu1 %vm152_vm5, %v10340_v54 }
0x3bf2   :  { %9310 = vmatprep.mubr.msk.f32.mxu1 %vm9602_vm6, %v9601_v1 }
0x3cbc   :  { %v7330_v30 = vpop.f32.mrb[96].mxu1 }
0x3cbd   :  { %v9282_v5 = vpop.f32.mrb[97].mxu1  ;;  %9286 = vmatmul.mubr.msk.f32.vlgmr.msra.gmra.mrb[86].mxu0 %vm438_vm7, %v7330_v30  ;;  %v7900_v30 = vld [vmem:[#allocation2 + $0x248] sm:$0xff] }
0x3cbe   :  { %9294 = vmatpush3.xpose.msk.msra.mxu0 %vm152_vm5, %v10291_v35  ;;  %9295 = vmatprep.mubr.msk.f32.mxu0 %vm9602_vm6, %v9601_v1  ;;  %v9422_v5 = vpack.c.bf16 %v7900_v30, %v7899_v0 }
0x3cbf   :  { %9303 = vmatprep.subr.mxu0 %v9601_v1 }
0x3cc0   :  { %v7474_v14 = vpop.f32.mrb[98].mxu1 }
0x3cc1   :  { %v9292_v16 = vpop.f32.mrb[99].mxu1  ;;  %9296 = vmatmul.mubr.msk.f32.vlgmr.msra.gmra.mrb[88].mxu0 %vm152_vm5, %v10340_v54  ;;  %v7475_v40 = vadd.f32 %v10312_v38, %v7474_v14  ;;  %v7990_v14 = vld [vmem:[#allocation2 + $0x258] sm:$0xff] }
0x3cc2   :  { %9305 = vmatprep.mubr.msk.f32.mxu0 %vm9602_vm6, %v9601_v1  ;;  %v7991_v16 = vld [vmem:[#allocation2 + $0x260] sm:$0xff] }
0x3cc4   :  { %v7614_v41 = vpop.f32.mrb[100].mxu1 }
0x3cc5   :  { %v7615_v49 = vadd.f32 %v10301_v48, %v7614_v41  ;;  %v9302_v15 = vpop.f32.mrb[101].mxu1  ;;  %v8475_v48 = vld [vmem:[#allocation2 + $0x29c] ss:$0 sm:$0xff] }
0x3cc6   :  { %v6068_v12 = vadd.f32 %v8475_v48, %v10366_v9 }
0x3cc7   :  { %9309 = vmatpush3.msra.mxu1 %v7615_v49  ;;  %v7992_v49 = vld [vmem:[#allocation2 + $0x268] sm:$0xff] }
0x3cc8   :  { %v7855_v38 = vadd.f32 %v6068_v12, %v10112_v37  ;;  %9419 = vmatprep.subr.bf16.mxu1 %v9418_v34  ;;  %v9430_v15 = vpack.c.bf16 %v7992_v49, %v7991_v16 }
0x3cca   :  { %v7857_v61 = vsel %vm152_vm5, %v7855_v38, 0.0 }
0x3d90   :  { %v7403_v42 = vpop.f32.mrb[86].mxu0 }
0x3d91   :  { %v7407_v35 = vadd.f32 %v7403_v42, %v6959_v27  ;;  %v9287_v28 = vpop.f32.mrb[87].mxu0  ;;  %v7993_v42 = vld [vmem:[#allocation2 + $0x270] sm:$0xff] }
0x3d94   :  { %v7544_v52 = vpop.f32.mrb[88].mxu0 }
0x3d95   :  { %v7545_v63 = vadd.f32 %v10310_v19, %v7544_v52  ;;  %v9297_v26 = vpop.f32.mrb[89].mxu0 }
0x3d97   :  { %9304 = vmatpush3.xpose.msk.msra.mxu0 %vm438_vm7, %v7545_v63 }
0x3d98   :  { %9313 = vmatprep.subr.mxu0 %v9601_v1 }
0x3d9a   :  { %9306 = vmatmul.mubr.msk.f32.vlgmr.msra.gmra.mrb[90].mxu0 %vm438_vm7, %v7475_v40 }
0x3d9b   :  { %9314 = vmatpush3.msra.mxu0 %v10328_v21  ;;  %9315 = vmatprep.mubr.msk.f32.mxu0 %vm9602_vm6, %v9601_v1 }
0x3e6d   :  { %v7690_v10 = vpop.f32.mrb[90].mxu0 }
0x3e6e   :  { %v7694_v22 = vmul.f32 0.35355338, %v7690_v10  ;;  %v9307_v19 = vpop.f32.mrb[91].mxu0 }
0x3e6f   :  { %v7996_v19 = vld [vmem:[#allocation2 + $0x288] sm:$0xff] }
0x3e70   :  { %v7695_v13 = vadd.f32 %v7694_v22, %v9654_v20  ;;  %v7995_v22 = vld [vmem:[#allocation2 + $0x280] sm:$0xff] }
0x3e72   :  { %v7696_v4 = vsel %vm438_vm7, %v7695_v13, -inf }
0x3e73   :  { %7697 = vmax.xlane.f32.xlu1 %v7696_v4  ;;  %v8518_v4 = vld [vmem:[#allocation2 + $0x29f] ss:$0 sm:$0xff] }
0x3e77   :  { %7858 = vadd.xlane.f32.xlu1 %v7857_v61 }
0x3f00   :  { %v7698_v21 = vpop.xlane.xlu1 %7697 }
0x3f01   :  { %v7699_v18 = vsub.f32 %v7695_v13, %v7698_v21  ;;  %v9438_v13 = vpack.c.bf16 %v7996_v19, %v7995_v22 }
0x3f03   :  { %v7700_v60 = vmul.f32 1.442695, %v7699_v18 }
0x3f04   :  { %v7859_v24 = vpop.xlane.xlu1 %7858 }
0x3f05   :  { %9535 = vpow2.f32 %v7700_v60  ;;  %v7863_v45 = vmul.f32 0.03125, %v7859_v24 }
0x3f07   :  { %v7865_v56 = vsub.f32 %v7855_v38, %v7863_v45  ;;  %v8521_v45 = vld [vmem:[#allocation2 + $0x2a0] ss:$0 sm:$0xff] }
0x3f09   :  { %v7867_v9 = vmul.f32 %v7865_v56, %v7865_v56 }
0x3f0b   :  { %v7869_v59 = vsel %vm152_vm5, %v7867_v9, 0.0 }
0x3f0c   :  { %7870 = vadd.xlane.f32.xlu1 %v7869_v59 }
0x3f0f   :  { %v9536_v20 = vpop.eup %9535 }
0x3f10   :  { %v7702_v46 = vsel %vm438_vm7, %v9536_v20, 0.0 }
0x3f11   :  { %7703 = vadd.xlane.f32.xlu0 %v7702_v46 }
0x3f99   :  { %v7871_v37 = vpop.xlane.xlu1 %7870 }
0x3f9a   :  { %v7875_v2 = vmul.f32 0.03125, %v7871_v37 }
0x3f9c   :  { %v7877_v47 = vadd.f32 1e-05, %v7875_v2 }
0x3f9e   :  { %9537 = vrsqrt.f32 %v7877_v47  ;;  %v7704_v39 = vpop.xlane.xlu0 %7703 }
0x3f9f   :  { %9539 = vrcp.f32 %v7704_v39 }
0x3fa8   :  { %v9538_v50 = vpop.eup %9537 }
0x3fa9   :  { %v9540_v57 = vpop.eup %9539  ;;  %v7881_v62 = vmul.f32 %v9538_v50, %v7865_v56 }
0x3faa   :  { %v7706_v27 = vmul.f32 %v9540_v57, %v9536_v20 }
0x3fab   :  { %v7888_v3 = vmul.f32 %v8516_v23, %v7881_v62 }
0x3fac   :  { %9311 = vmatmul.mubr.msk.f32.vlgmr.msra.gmra.mrb[102].mxu1 %vm438_vm7, %v7706_v27 }
0x3fad   :  { %v10506_v43 = vadd.f32 %v8517_v8, %v7888_v3  ;;  %9421 = vmatpush3.bf16.msra.mxu1 %v9418_v34  ;;  %v8524_v34 = vld [vmem:[#allocation2 + $0x2a1] ss:$0 sm:$0xff] }
0x3fae   :  { %9423 = vmatprep.subr.bf16.mxu1 %v9422_v5 }
0x3faf   :  { %9326 = vmatprep.mubr.msk.f32.mxu1 %vm152_vm5, %v10506_v43 }
0x3fb1   :  { %9425 = vmatpush3.bf16.msra.mxu1 %v9422_v5 }
0x407f   :  { %v7776_v44 = vpop.f32.mrb[102].mxu1 }
0x4080   :  { %v9312_v51 = vpop.f32.mrb[103].mxu1  ;;  %9316 = vmatmul.mubr.msk.f32.vlgmr.msra.gmra.mrb[92].mxu0 %vm438_vm7, %v7776_v44 }
0x4153   :  { %v7849_v53 = vpop.f32.mrb[92].mxu0 }
0x4154   :  { %v7853_v55 = vadd.f32 %v7849_v53, %v7407_v35  ;;  %v9317_v31 = vpop.f32.mrb[93].mxu0  ;;  %v7994_v35 = vld [vmem:[#allocation2 + $0x278] sm:$0xff]  ;;  %v8131_v53 = vld [vmem:[#allocation2 + $0x80] sm:$0xff] }
0x4155   :  { %v9434_v28 = vpack.c.bf16 %v7994_v35, %v7993_v42  ;;  %v8132_v31 = vld [vmem:[#allocation2 + $0x88] sm:$0xff]  ;;  %v8213_v35 = vld [vmem:[#allocation2 + $0x98] sm:$0xff] }
0x4156   :  { %v7854_v58 = vadd.f32 %v8475_v48, %v7853_v55 }
0x4158   :  { %v7856_v36 = vadd.f32 %v7854_v58, %v10340_v54  ;;  %v7989_v54 = vld [vmem:[#allocation2 + $0x250] sm:$0xff] }
0x4159   :  { %v9426_v41 = vpack.c.bf16 %v7990_v14, %v7989_v54  ;;  %v8133_v58 = vld [vmem:[#allocation2 + $0x90] sm:$0xff]  ;;  %v8525_v54 = vld [vmem:[#allocation2 + $0x2a2] ss:$0 sm:$0xff] }
0x415a   :  { %v7860_v6 = vsel %vm152_vm5, %v7856_v36, 0.0 }
0x415b   :  { %7861 = vadd.xlane.f32.xlu0 %v7860_v6  ;;  %9427 = vmatprep.subr.bf16.mxu0 %v9426_v41  ;;  %v9446_v6 = vpack.c.bf16 %v8133_v58, %v8132_v31 }
0x415c   :  { %9429 = vmatpush3.bf16.msra.mxu0 %v9426_v41 }
0x415d   :  { %9431 = vmatprep.subr.bf16.mxu0 %v9430_v15 }
0x4160   :  { %9433 = vmatpush3.bf16.msra.mxu0 %v9430_v15 }
0x4161   :  { %9435 = vmatprep.subr.bf16.mxu0 %v9434_v28 }
0x4164   :  { %9437 = vmatpush3.bf16.msra.mxu0 %v9434_v28  ;;  %v8214_v28 = vld [vmem:[#allocation2 + $0xa0] sm:$0xff] }
0x4165   :  { %9439 = vmatprep.subr.bf16.mxu0 %v9438_v13 }
0x4168   :  { %9441 = vmatpush3.bf16.msra.mxu0 %v9438_v13  ;;  %v8528_v13 = vld [vmem:[#allocation2 + $0x74] ss:$0 sm:$0xff] }
0x41e8   :  { %v7862_v17 = vpop.xlane.xlu0 %7861 }
0x41e9   :  { %v7864_v33 = vmul.f32 0.03125, %v7862_v17 }
0x41eb   :  { %v7866_v7 = vsub.f32 %v7856_v36, %v7864_v33  ;;  %v9603_v36 = vmov 0.0|0.0  }
0x41ec   :  { %9442 = vmatprep.subr.bf16.mxu1 %v9603_v36 }
0x41ed   :  { %v7868_v29 = vmul.f32 %v7866_v7, %v7866_v7 }
0x41ef   :  { %v7872_v32 = vsel %vm152_vm5, %v7868_v29, 0.0 }
0x41f0   :  { %7873 = vadd.xlane.f32.xlu0 %v7872_v32 }
0x427d   :  { %v7874_v52 = vpop.xlane.xlu0 %7873 }
0x427e   :  { %v7876_v63 = vmul.f32 0.03125, %v7874_v52  ;;  %v8215_v52 = vld [vmem:[#allocation2 + $0xa8] sm:$0xff] }
0x4280   :  { %v7878_v26 = vadd.f32 1e-05, %v7876_v63  ;;  %v9449_v63 = vpack.c.bf16 %v8214_v28, %v8213_v35 }
0x4282   :  { %9541 = vrsqrt.f32 %v7878_v26  ;;  %v8216_v26 = vld [vmem:[#allocation2 + $0xb0] sm:$0xff] }
0x428c   :  { %v9542_v40 = vpop.eup %9541 }
0x428d   :  { %v7882_v48 = vmul.f32 %v9542_v40, %v7866_v7  ;;  %v9452_v40 = vpack.c.bf16 %v8216_v26, %v8215_v52 }
0x428f   :  { %v7889_v10 = vmul.f32 %v8516_v23, %v7882_v48  ;;  %v8526_v48 = vld [vmem:[#allocation2 + $0x73] ss:$0 sm:$0xff] }
0x4291   :  { %v7896_v12 = vadd.f32 %v8517_v8, %v7889_v10 }
0x4293   :  { %9327 = vmatmul.mubr.msk.f32.vlgmr.msra.gmra.mrb[104].mxu1 %vm152_vm5, %v7896_v12 }
0x4294   :  { %9356 = vmatprep.mubr.msk.f32.mxu1 %vm9602_vm6, %v9601_v1 }
0x4366   :  { %v9328_v38 = vpop.f32.mrb[104].mxu1 }
0x4367   :  { %v7984_v61 = vadd.f32 %v9328_v38, %v8518_v4  ;;  %v7978_v21 = vpop.f32.mrb[105].mxu1 }
0x4368   :  { %v7979_v18 = vadd.f32 %v8518_v4, %v7978_v21 }
0x4369   :  { %v7988_v24 = vmax.f32 %v7984_v61, 0.0 }
0x436a   :  { %v7987_v60 = vmax.f32 %v7979_v18, 0.0 }
0x436c   :  { %9345 = vmatprep.mubr.msk.f32.mxu0 %vm4042_vm8, %v7987_v60 }
0x436d   :  { %9346 = vmatmul.mubr.msk.f32.vlgmr.msra.gmra.mrb[94].mxu0 %vm4042_vm8, %v7988_v24 }
0x4440   :  { %v9347_v56 = vpop.f32.mrb[94].mxu0 }
0x4441   :  { %v8080_v9 = vadd.f32 %v9347_v56, %v8521_v45  ;;  %v8074_v59 = vpop.f32.mrb[95].mxu0 }
0x4442   :  { %v8075_v20 = vadd.f32 %v8521_v45, %v8074_v59 }
0x4443   :  { %v8084_v46 = vadd.f32 %v8080_v9, %v7896_v12 }
0x4444   :  { %v8083_v37 = vadd.f32 %v8075_v20, %v10506_v43  ;;  %v8130_v43 = vld [vmem:[#allocation2 + $0x78] sm:$0xff] }
0x4445   :  { %v8088_v2 = vsel %vm152_vm5, %v8084_v46, 0.0  ;;  %v9443_v55 = vpack.c.bf16 %v8131_v53, %v8130_v43 }
0x4446   :  { %8089 = vadd.xlane.f32.xlu1 %v8088_v2  ;;  %v8085_v47 = vsel %vm152_vm5, %v8083_v37, 0.0 }
0x4447   :  { %8086 = vadd.xlane.f32.xlu0 %v8085_v47  ;;  %9444 = vmatpush3.bf16.msra.mxu1 %v9443_v55 }
0x4448   :  { %9445 = vmatprep.subr.bf16.mxu1 %v9603_v36 }
0x444b   :  { %9447 = vmatpush3.bf16.msra.mxu1 %v9446_v6 }
0x444c   :  { %9448 = vmatprep.subr.bf16.mxu1 %v9603_v36 }
0x44d3   :  { %v8090_v39 = vpop.xlane.xlu1 %8089 }
0x44d4   :  { %v8092_v50 = vmul.f32 0.03125, %v8090_v39  ;;  %v8087_v23 = vpop.xlane.xlu0 %8086 }
0x44d5   :  { %v8091_v57 = vmul.f32 0.03125, %v8087_v23 }
0x44d6   :  { %v8094_v62 = vsub.f32 %v8084_v46, %v8092_v50 }
0x44d7   :  { %v8093_v27 = vsub.f32 %v8083_v37, %v8091_v57 }
0x44d8   :  { %v8096_v8 = vmul.f32 %v8094_v62, %v8094_v62 }
0x44d9   :  { %v8095_v3 = vmul.f32 %v8093_v27, %v8093_v27 }
0x44da   :  { %v8100_v44 = vsel %vm152_vm5, %v8096_v8, 0.0 }
0x44db   :  { %8101 = vadd.xlane.f32.xlu1 %v8100_v44  ;;  %v8097_v51 = vsel %vm152_vm5, %v8095_v3, 0.0 }
0x44dc   :  { %8098 = vadd.xlane.f32.xlu0 %v8097_v51 }
0x4568   :  { %v8102_v17 = vpop.xlane.xlu1 %8101 }
0x4569   :  { %v8104_v33 = vmul.f32 0.03125, %v8102_v17  ;;  %v8099_v7 = vpop.xlane.xlu0 %8098 }
0x456a   :  { %v8103_v29 = vmul.f32 0.03125, %v8099_v7 }
0x456b   :  { %v8106_v32 = vadd.f32 1e-05, %v8104_v33 }
0x456c   :  { %v8105_v25 = vadd.f32 1e-05, %v8103_v29 }
0x456d   :  { %9543 = vrsqrt.f32 %v8106_v32 }
0x456e   :  { %9545 = vrsqrt.f32 %v8105_v25 }
0x4577   :  { %v9544_v11 = vpop.eup %9543 }
0x4578   :  { %v9546_v0 = vpop.eup %9545  ;;  %v8110_v30 = vmul.f32 %v9544_v11, %v8094_v62 }
0x4579   :  { %v8109_v5 = vmul.f32 %v9546_v0, %v8093_v27 }
0x457a   :  { %v8117_v14 = vmul.f32 %v8524_v34, %v8110_v30 }
0x457b   :  { %v8116_v16 = vmul.f32 %v8524_v34, %v8109_v5 }
0x457c   :  { %v8124_v41 = vadd.f32 %v8525_v54, %v8117_v14 }
0x457d   :  { %v8123_v49 = vadd.f32 %v8525_v54, %v8116_v16 }
0x457e   :  { %v8126_v15 = vrot.slane %v8124_v41, 7 }
0x4580   :  { %v8129_v42 = vsel %vm8128_vm9, %v8123_v49, %v8126_v15 }
0x4581   :  { %9357 = vmatmul.mubr.msk.f32.vlgmr.msra.gmra.mrb[106].mxu1 %vm152_vm5, %v8129_v42 }
0x4582   :  { %9367 = vmatprep.mubr.msk.f32.mxu1 %vm9602_vm6, %v9601_v1  ;;  %9450 = vmatpush3.bf16.msra.mxu1 %v9449_v63 }
0x4583   :  { %9451 = vmatprep.subr.bf16.mxu1 %v9603_v36 }
0x4586   :  { %9453 = vmatpush3.bf16.msra.mxu1 %v9452_v40 }
0x4654   :  { %v8208_v10 = vpop.f32.mrb[106].mxu1 }
0x4655   :  { %v8209_v12 = vadd.f32 %v8526_v48, %v8208_v10  ;;  %v9358_v22 = vpop.f32.mrb[107].mxu1 }
0x4657   :  { %9547 = vtanh.f32 %v8209_v12 }
0x4661   :  { %v9548_v19 = vpop.eup %9547 }
0x4662   :  { %9368 = vmatmul.mubr.msk.f32.vlgmr.msra.gmra.mrb[108].mxu1 %vm152_vm5, %v9548_v19 }
0x4735   :  { %v8291_v1 = vpop.f32.mrb[108].mxu1 }
0x4736   :  { %v8292_v4 = vadd.f32 %v8528_v13, %v8291_v1  ;;  %v9369_v38 = vpop.f32.mrb[109].mxu1 }
0x4738   :  { %8296 = vst.msk [vmem:[#allocation5] sm:$0x3] %vm8295_vm10, %v8292_v4 }
0x4739   :  { %9582 = shalt.err (!%p9579_p12)
}
0x473a   :  { %s9583_s7 = scalar_lea.hbm %s10543_s3, 32 }
0x473b   :  { %p9584_p13 = scmp.ne.s32.totalorder %s10543_s3, %s9583_s7  ;;  %p9587_p0 = scmp.lt.u32.totalorder %s9583_s7, %s10543_s3 }
0x473d   :  { %p9589_p1 = pnand %p9587_p0, %p9584_p13 }
0x473f   :  { %9592 = shalt.err (!%p9589_p1)
}
0x4740   :  { %8306 = dma.vmem_to_hbm [thread:$0]  %s8304_s1, 32, %s10543_s3, [#allocation4]  }
0x4741   :  { %9595 = dma.done.wait [#allocation4], 32  }
0x4742   :  { %9596 = vsyncadd [#allocation4], 4294967264 }
0x4743   :  { %8310 = vsyncpa [#allocation3], 1 }
0x4744   :  { %8311 = vsyncpa [#allocation4], 1 }

</bundles_post_ra>
